<compile_context>
chip_gen: v7x
topology: tpu7x:2x2x1
jax: 0.10.0
libtpu: 0.0.40
codegen_flags: <defaults>
</compile_context>

<pallas_src>
import functools

import jax
import jax.numpy as jnp
from jax import lax
from jax.experimental import pallas as pl
from jax.experimental.pallas import tpu as pltpu

_LANE = 128      # f32 lane tile
_SUBLANE = 8     # f32 sublane tile


def _round_up(n, m):
    return ((n + m - 1) // m) * m


# ----------------------------------------------------------------------------
# Fused Pallas kernel: all GRU layers + final Linear in one pallas_call.
# ----------------------------------------------------------------------------
def fused_gru_fc_kernel(*refs, num_layers, seq_len, batch_pad, hidden):
    """refs = (x2d, [w_ih, w_hh, b_ih, b_hn] * num_layers, w_fc, b_fc,
               out, gx_scr, hid_scr)

    x2d     : (T*Bp, Fp)    time-major, batch- and lane-padded input
    w_ih    : (Fp or H, 128) packed gate columns r|z|n at lanes [0, 3H)
    w_hh    : (H, 128)       packed gate columns
    b_ih    : (1, 128)       b_ih with b_hr, b_hz already folded in
    b_hn    : (1, H)         recurrent bias of the n gate (added per step)
    w_fc    : (H, 128) zero-padded columns, b_fc : (1, 128)
    out     : (Bp, 128)
    gx_scr  : (T*Bp, 128) f32 — hoisted input-projection result (per layer)
    hid_scr : (T*Bp, H)   f32 — layer output sequence (next layer's input)
    """
    T, Bp, H = seq_len, batch_pad, hidden
    H2, H3 = 2 * H, 3 * H

    x_ref = refs[0]
    layer_refs = refs[1:1 + 4 * num_layers]
    wfc_ref = refs[1 + 4 * num_layers]
    bfc_ref = refs[2 + 4 * num_layers]
    out_ref = refs[3 + 4 * num_layers]
    gx_scr = refs[4 + 4 * num_layers]
    hid_scr = refs[5 + 4 * num_layers]

    h = None
    for layer in range(num_layers):
        w_ih = layer_refs[4 * layer][...]            # (Fin, 128)
        w_hh = layer_refs[4 * layer + 1][...]        # (H, 128)
        b_ih = layer_refs[4 * layer + 2][...]        # (1, 128)
        b_hn = layer_refs[4 * layer + 3][...]        # (1, H)

        # Input of layer 0 is the padded x; later layers read the previous
        # layer's hidden sequence (fully consumed here, before it is reused).
        seq_in = x_ref[...] if layer == 0 else hid_scr[...]

        # Input projection hoisted out of the recurrence: one MXU matmul for
        # the whole sequence, biases (b_ih + folded b_hr/b_hz) added once.
        # Stored to VMEM scratch so no large SSA value lives across the
        # unrolled time loop.
        gx_scr[...] = (jnp.dot(seq_in, w_ih,
                               preferred_element_type=jnp.float32) + b_ih)

        # Hoist the n-gate recurrent-bias broadcast out of the time loop.
        b_hn_b = jnp.broadcast_to(b_hn, (Bp, H))

        is_last = layer == num_layers - 1

        # h0 = zeros, matching torch.zeros(num_layers, B, H) in the module.
        h = jnp.zeros((Bp, H), jnp.float32)
        for t in range(T):                  # fully unrolled (T is static)
            gx = gx_scr[t * Bp:(t + 1) * Bp, :]                    # (Bp, 128)
            gh = jnp.dot(h, w_hh, preferred_element_type=jnp.float32)
            # Fused sigmoid over the concatenated r|z lane range.
            rz = jax.nn.sigmoid(gx[:, 0:H2] + gh[:, 0:H2])         # (Bp, 2H)
            r = rz[:, 0:H]
            z = rz[:, H:H2]
            n = jnp.tanh(gx[:, H2:H3] + r * (gh[:, H2:H3] + b_hn_b))
            h = n + z * (h - n)             # == (1 - z) * n + z * h
            if not is_last:
                hid_scr[t * Bp:(t + 1) * Bp, :] = h

    # Final Linear on the last time step of the last layer.
    logits = jnp.dot(h, wfc_ref[...],
                     preferred_element_type=jnp.float32) + bfc_ref[...]
    out_ref[...] = logits.astype(out_ref.dtype)


# ----------------------------------------------------------------------------
# Padding helpers (zero-pad trailing columns / rows)
# ----------------------------------------------------------------------------
def _pad_cols(a, width):
    pad = width - a.shape[-1]
    if pad == 0:
        return a
    return jnp.pad(a, [(0, 0)] * (a.ndim - 1) + [(0, pad)])


def _pad_rows(a, rows):
    pad = rows - a.shape[0]
    if pad == 0:
        return a
    return jnp.pad(a, [(0, pad)] + [(0, 0)] * (a.ndim - 1))


# ----------------------------------------------------------------------------
# Wrappers
# ----------------------------------------------------------------------------
def gru_signal_forward(x, params, *, hidden_size, num_layers):
    """Equivalent of GruSignal.forward: x (B, T, F) -> logits (B, num_classes)."""
    B, T, F = x.shape
    H = hidden_size
    assert 3 * H <= _LANE, "packed-gate layout requires 3*hidden_size <= 128"
    Bp = _round_up(B, _SUBLANE)   # sublane-align the batch tile (4 -> 8)
    Fp = _round_up(F, _LANE)      # lane-dense layer-0 input (8 -> 128)
    Cp = _LANE                    # lane-dense output (3 -> 128)

    # Time-major, zero-pad batch rows + feature lanes, flatten.
    x_tbf = jnp.transpose(x, (1, 0, 2)).astype(jnp.float32)        # (T, B, F)
    x_tbf = jnp.pad(x_tbf, ((0, 0), (0, Bp - B), (0, Fp - F)))
    x2d = x_tbf.reshape(T * Bp, Fp)                                # (T*Bp, Fp)

    inputs = [x2d]
    for layer in range(num_layers):
        w_ih, w_hh, b_ih, b_hh = params["layers"][layer]
        w_ih = w_ih.astype(jnp.float32)
        w_hh = w_hh.astype(jnp.float32)
        b_ih = b_ih.astype(jnp.float32)
        b_hh = b_hh.astype(jnp.float32)

        # Fold b_hr, b_hz into the input-projection bias; keep only b_hn
        # (it sits inside the r * (...) term and must stay per-step).
        b_comb = b_ih.at[:, :2 * H].add(b_hh[:, :2 * H])
        b_hn = b_hh[:, 2 * H:3 * H]                                 # (1, H)

        w_ih_p = _pad_cols(w_ih, _LANE)        # packed gates: pad 3H -> 128
        if layer == 0:
            w_ih_p = _pad_rows(w_ih_p, Fp)     # match lane-padded input
        inputs += [
            w_ih_p,
            _pad_cols(w_hh, _LANE),
            _pad_cols(b_comb, _LANE),
            b_hn,
        ]

    w_fc, b_fc = params["fc"]
    C = w_fc.shape[1]
    inputs += [_pad_cols(w_fc.astype(jnp.float32), Cp),
               _pad_cols(b_fc.astype(jnp.float32), Cp)]

    kernel = functools.partial(fused_gru_fc_kernel, num_layers=num_layers,
                               seq_len=T, batch_pad=Bp, hidden=H)

    # Advisory cost estimate so XLA schedules surrounding ops sensibly.
    flops = 2 * T * Bp * Fp * _LANE                       # layer-0 projection
    flops += 2 * (num_layers - 1) * T * Bp * H * _LANE    # layer>0 projections
    flops += 2 * num_layers * T * Bp * H * _LANE          # recurrent matmuls
    flops += 2 * Bp * H * Cp                              # final FC
    transcendentals = num_layers * T * Bp * 3 * H
    bytes_accessed = sum(int(a.size) * 4 for a in inputs) + Bp * Cp * 4

    vmem = pl.BlockSpec(memory_space=pltpu.MemorySpace.VMEM)
    out = pl.pallas_call(
        kernel,
        out_shape=jax.ShapeDtypeStruct((Bp, Cp), jnp.float32),
        in_specs=[vmem] * len(inputs),
        out_specs=vmem,
        scratch_shapes=[pltpu.VMEM((T * Bp, _LANE), jnp.float32),  # gx_scr
                        pltpu.VMEM((T * Bp, H), jnp.float32)],     # hid_scr
        cost_estimate=pl.CostEstimate(flops=flops,
                                      transcendentals=transcendentals,
                                      bytes_accessed=bytes_accessed),
    )(*inputs)
    return out[:B, :C]


def predict_proba(x, params, *, hidden_size, num_layers, temperature=1.0):
    logits = gru_signal_forward(x, params, hidden_size=hidden_size,
                                num_layers=num_layers)
    return jax.nn.softmax(logits / temperature, axis=1)


# ----------------------------------------------------------------------------
# Deterministic parameter construction (PyTorch-shape equivalents, transposed)
# ----------------------------------------------------------------------------
def init_params(key, input_size, hidden_size, num_layers, num_classes):
    bound = 1.0 / jnp.sqrt(jnp.float32(hidden_size))
    layers = []
    for layer in range(num_layers):
        f_in = input_size if layer == 0 else hidden_size
        key, k1, k2, k3, k4 = jax.random.split(key, 5)
        # PyTorch stores weight_ih_l{k} as (3H, f_in); we keep the transpose.
        w_ih = jax.random.uniform(k1, (f_in, 3 * hidden_size), jnp.float32,
                                  -bound, bound)
        w_hh = jax.random.uniform(k2, (hidden_size, 3 * hidden_size),
                                  jnp.float32, -bound, bound)
        b_ih = jax.random.uniform(k3, (1, 3 * hidden_size), jnp.float32,
                                  -bound, bound)
        b_hh = jax.random.uniform(k4, (1, 3 * hidden_size), jnp.float32,
                                  -bound, bound)
        layers.append((w_ih, w_hh, b_ih, b_hh))
    key, k1, k2 = jax.random.split(key, 3)
    w_fc = jax.random.uniform(k1, (hidden_size, num_classes), jnp.float32,
                              -bound, bound)
    b_fc = jax.random.uniform(k2, (1, num_classes), jnp.float32, -bound, bound)
    return {"layers": layers, "fc": (w_fc, b_fc)}


# ----------------------------------------------------------------------------
# Pure-JAX reference (for a correctness sanity check)
# ----------------------------------------------------------------------------
def reference_forward(x, params, *, hidden_size, num_layers):
    B = x.shape[0]
    seq = x
    for layer in range(num_layers):
        w_ih, w_hh, b_ih, b_hh = params["layers"][layer]
        H = hidden_size

        def step(h, x_t):
            gx = x_t @ w_ih + b_ih
            gh = h @ w_hh + b_hh
            r = jax.nn.sigmoid(gx[:, 0:H] + gh[:, 0:H])
            z = jax.nn.sigmoid(gx[:, H:2 * H] + gh[:, H:2 * H])
            n = jnp.tanh(gx[:, 2 * H:3 * H] + r * gh[:, 2 * H:3 * H])
            h_new = (1.0 - z) * n + z * h
            return h_new, h_new

        h0 = jnp.zeros((B, H), jnp.float32)
        _, outs = lax.scan(step, h0, jnp.transpose(seq, (1, 0, 2)))
        seq = jnp.transpose(outs, (1, 0, 2))
    w_fc, b_fc = params["fc"]
    return seq[:, -1, :] @ w_fc + b_fc


# ----------------------------------------------------------------------------
if __name__ == "__main__":
    INPUT_SIZE = 8
    HIDDEN_SIZE = 32
    NUM_LAYERS = 3
    NUM_CLASSES = 3
    BATCH = 4
    SEQ = 8

    key = jax.random.PRNGKey(0)
    key_x, key_p = jax.random.split(key)
    x = jax.random.normal(key_x, (BATCH, SEQ, INPUT_SIZE), dtype=jnp.float32)
    params = init_params(key_p, INPUT_SIZE, HIDDEN_SIZE, NUM_LAYERS,
                         NUM_CLASSES)

    logits = gru_signal_forward(x, params, hidden_size=HIDDEN_SIZE,
                                num_layers=NUM_LAYERS)
    logits = jax.block_until_ready(logits)

    ref = reference_forward(x, params, hidden_size=HIDDEN_SIZE,
                            num_layers=NUM_LAYERS)
    assert logits.shape == (BATCH, NUM_CLASSES)
    assert jnp.allclose(logits, ref, rtol=1e-4, atol=1e-4), (
        "Pallas GRU output mismatch vs reference")

    # predict_proba path (temperature-scaled softmax over the Pallas logits)
    proba = jax.block_until_ready(
        predict_proba(x, params, hidden_size=HIDDEN_SIZE,
                      num_layers=NUM_LAYERS, temperature=1.5))
    assert jnp.allclose(jnp.sum(proba, axis=1), 1.0, atol=1e-5)

    print("KERNEL_OK")
</pallas_src>

<mosaic_0001>
module attributes {stable_mosaic.version = 11 : i64} {
  func.func @fused_gru_fc_kernel(%arg0: memref<64x128xf32, #tpu.memory_space<vmem>>, %arg1: memref<128x128xf32, #tpu.memory_space<vmem>>, %arg2: memref<32x128xf32, #tpu.memory_space<vmem>>, %arg3: memref<1x128xf32, #tpu.memory_space<vmem>>, %arg4: memref<1x32xf32, #tpu.memory_space<vmem>>, %arg5: memref<32x128xf32, #tpu.memory_space<vmem>>, %arg6: memref<32x128xf32, #tpu.memory_space<vmem>>, %arg7: memref<1x128xf32, #tpu.memory_space<vmem>>, %arg8: memref<1x32xf32, #tpu.memory_space<vmem>>, %arg9: memref<32x128xf32, #tpu.memory_space<vmem>>, %arg10: memref<32x128xf32, #tpu.memory_space<vmem>>, %arg11: memref<1x128xf32, #tpu.memory_space<vmem>>, %arg12: memref<1x32xf32, #tpu.memory_space<vmem>>, %arg13: memref<32x128xf32, #tpu.memory_space<vmem>>, %arg14: memref<1x128xf32, #tpu.memory_space<vmem>>, %arg15: memref<8x128xf32, #tpu.memory_space<vmem>>, %arg16: memref<64x128xf32, #tpu.memory_space<vmem>>, %arg17: memref<64x32xf32, #tpu.memory_space<vmem>>) attributes {dimension_semantics = [], scalar_prefetch = 0 : i64, scratch_operands = 2 : i64, tpu.core_type = #tpu.core_type<tc>} {
    %c0 = arith.constant 0 : index
    %c0_0 = arith.constant 0 : index
    %0 = vector.load %arg1[%c0, %c0_0] : memref<128x128xf32, #tpu.memory_space<vmem>>, vector<128x128xf32>
    %c0_1 = arith.constant 0 : index
    %c0_2 = arith.constant 0 : index
    %1 = vector.load %arg2[%c0_1, %c0_2] : memref<32x128xf32, #tpu.memory_space<vmem>>, vector<32x128xf32>
    %c0_3 = arith.constant 0 : index
    %c0_4 = arith.constant 0 : index
    %2 = vector.load %arg3[%c0_3, %c0_4] : memref<1x128xf32, #tpu.memory_space<vmem>>, vector<1x128xf32>
    %c0_5 = arith.constant 0 : index
    %c0_6 = arith.constant 0 : index
    %3 = vector.load %arg4[%c0_5, %c0_6] : memref<1x32xf32, #tpu.memory_space<vmem>>, vector<1x32xf32>
    %c0_7 = arith.constant 0 : index
    %c0_8 = arith.constant 0 : index
    %4 = vector.load %arg0[%c0_7, %c0_8] : memref<64x128xf32, #tpu.memory_space<vmem>>, vector<64x128xf32>
    %cst = arith.constant dense<0.000000e+00> : vector<64x128xf32>
    %5 = tpu.matmul %4, %0, %cst {dimension_numbers = #tpu.dot_dimension_numbers<[1], [0], [0], [1], [0, 0, 1, 1], [], []>} : vector<64x128xf32>, vector<128x128xf32>, vector<64x128xf32> -> vector<64x128xf32>
    %6 = vector.broadcast %2 : vector<1x128xf32> to vector<64x128xf32>
    %7 = arith.addf %5, %6 : vector<64x128xf32>
    %c0_9 = arith.constant 0 : index
    %c0_10 = arith.constant 0 : index
    %8 = vector.load %arg16[%c0_9, %c0_10] : memref<64x128xf32, #tpu.memory_space<vmem>>, vector<64x128xf32>
    tpu.vector_store %arg16[%c0_9, %c0_10], %7 {strides = array<i32>} : memref<64x128xf32, #tpu.memory_space<vmem>>, vector<64x128xf32>,
    %9 = vector.shape_cast %3 : vector<1x32xf32> to vector<1x32xf32>
    %10 = vector.broadcast %9 : vector<1x32xf32> to vector<8x32xf32>
    %cst_11 = arith.constant 0.000000e+00 : f32
    %11 = vector.broadcast %cst_11 : f32 to vector<8x32xf32>
    %c0_12 = arith.constant 0 : index
    %c0_13 = arith.constant 0 : index
    %12 = vector.load %arg16[%c0_12, %c0_13] : memref<64x128xf32, #tpu.memory_space<vmem>>, vector<8x128xf32>
    %cst_14 = arith.constant dense<0.000000e+00> : vector<8x128xf32>
    %13 = tpu.matmul %11, %1, %cst_14 {dimension_numbers = #tpu.dot_dimension_numbers<[1], [0], [0], [1], [0, 0, 1, 1], [], []>} : vector<8x32xf32>, vector<32x128xf32>, vector<8x128xf32> -> vector<8x128xf32>
    %14 = vector.extract_strided_slice %12 {offsets = [0, 0], sizes = [8, 64], strides = [1, 1]} : vector<8x128xf32> to vector<8x64xf32>
    %15 = vector.extract_strided_slice %13 {offsets = [0, 0], sizes = [8, 64], strides = [1, 1]} : vector<8x128xf32> to vector<8x64xf32>
    %16 = arith.addf %14, %15 : vector<8x64xf32>
    %17 = arith.negf %16 : vector<8x64xf32>
    %18 = math.exp %17 : vector<8x64xf32>
    %cst_15 = arith.constant 1.000000e+00 : f32
    %19 = vector.broadcast %cst_15 : f32 to vector<8x64xf32>
    %20 = arith.addf %19, %18 : vector<8x64xf32>
    %21 = arith.divf %19, %20 : vector<8x64xf32>
    %22 = vector.extract_strided_slice %21 {offsets = [0, 0], sizes = [8, 32], strides = [1, 1]} : vector<8x64xf32> to vector<8x32xf32>
    %23 = vector.extract_strided_slice %21 {offsets = [0, 32], sizes = [8, 32], strides = [1, 1]} : vector<8x64xf32> to vector<8x32xf32>
    %24 = vector.extract_strided_slice %12 {offsets = [0, 64], sizes = [8, 32], strides = [1, 1]} : vector<8x128xf32> to vector<8x32xf32>
    %25 = vector.extract_strided_slice %13 {offsets = [0, 64], sizes = [8, 32], strides = [1, 1]} : vector<8x128xf32> to vector<8x32xf32>
    %26 = arith.addf %25, %10 : vector<8x32xf32>
    %27 = arith.mulf %22, %26 : vector<8x32xf32>
    %28 = arith.addf %24, %27 : vector<8x32xf32>
    %29 = math.tanh %28 : vector<8x32xf32>
    %30 = arith.subf %11, %29 : vector<8x32xf32>
    %31 = arith.mulf %23, %30 : vector<8x32xf32>
    %32 = arith.addf %29, %31 : vector<8x32xf32>
    %c0_16 = arith.constant 0 : index
    %c0_17 = arith.constant 0 : index
    %33 = vector.load %arg17[%c0_16, %c0_17] : memref<64x32xf32, #tpu.memory_space<vmem>>, vector<8x32xf32>
    tpu.vector_store %arg17[%c0_16, %c0_17], %32 {strides = array<i32>} : memref<64x32xf32, #tpu.memory_space<vmem>>, vector<8x32xf32>,
    %c8 = arith.constant 8 : index
    %c0_18 = arith.constant 0 : index
    %34 = vector.load %arg16[%c8, %c0_18] : memref<64x128xf32, #tpu.memory_space<vmem>>, vector<8x128xf32>
    %cst_19 = arith.constant dense<0.000000e+00> : vector<8x128xf32>
    %35 = tpu.matmul %32, %1, %cst_19 {dimension_numbers = #tpu.dot_dimension_numbers<[1], [0], [0], [1], [0, 0, 1, 1], [], []>} : vector<8x32xf32>, vector<32x128xf32>, vector<8x128xf32> -> vector<8x128xf32>
    %36 = vector.extract_strided_slice %34 {offsets = [0, 0], sizes = [8, 64], strides = [1, 1]} : vector<8x128xf32> to vector<8x64xf32>
    %37 = vector.extract_strided_slice %35 {offsets = [0, 0], sizes = [8, 64], strides = [1, 1]} : vector<8x128xf32> to vector<8x64xf32>
    %38 = arith.addf %36, %37 : vector<8x64xf32>
    %39 = arith.negf %38 : vector<8x64xf32>
    %40 = math.exp %39 : vector<8x64xf32>
    %cst_20 = arith.constant 1.000000e+00 : f32
    %41 = vector.broadcast %cst_20 : f32 to vector<8x64xf32>
    %42 = arith.addf %41, %40 : vector<8x64xf32>
    %43 = arith.divf %41, %42 : vector<8x64xf32>
    %44 = vector.extract_strided_slice %43 {offsets = [0, 0], sizes = [8, 32], strides = [1, 1]} : vector<8x64xf32> to vector<8x32xf32>
    %45 = vector.extract_strided_slice %43 {offsets = [0, 32], sizes = [8, 32], strides = [1, 1]} : vector<8x64xf32> to vector<8x32xf32>
    %46 = vector.extract_strided_slice %34 {offsets = [0, 64], sizes = [8, 32], strides = [1, 1]} : vector<8x128xf32> to vector<8x32xf32>
    %47 = vector.extract_strided_slice %35 {offsets = [0, 64], sizes = [8, 32], strides = [1, 1]} : vector<8x128xf32> to vector<8x32xf32>
    %48 = arith.addf %47, %10 : vector<8x32xf32>
    %49 = arith.mulf %44, %48 : vector<8x32xf32>
    %50 = arith.addf %46, %49 : vector<8x32xf32>
    %51 = math.tanh %50 : vector<8x32xf32>
    %52 = arith.subf %32, %51 : vector<8x32xf32>
    %53 = arith.mulf %45, %52 : vector<8x32xf32>
    %54 = arith.addf %51, %53 : vector<8x32xf32>
    %c8_21 = arith.constant 8 : index
    %c0_22 = arith.constant 0 : index
    %55 = vector.load %arg17[%c8_21, %c0_22] : memref<64x32xf32, #tpu.memory_space<vmem>>, vector<8x32xf32>
    tpu.vector_store %arg17[%c8_21, %c0_22], %54 {strides = array<i32>} : memref<64x32xf32, #tpu.memory_space<vmem>>, vector<8x32xf32>,
    %c16 = arith.constant 16 : index
    %c0_23 = arith.constant 0 : index
    %56 = vector.load %arg16[%c16, %c0_23] : memref<64x128xf32, #tpu.memory_space<vmem>>, vector<8x128xf32>
    %cst_24 = arith.constant dense<0.000000e+00> : vector<8x128xf32>
    %57 = tpu.matmul %54, %1, %cst_24 {dimension_numbers = #tpu.dot_dimension_numbers<[1], [0], [0], [1], [0, 0, 1, 1], [], []>} : vector<8x32xf32>, vector<32x128xf32>, vector<8x128xf32> -> vector<8x128xf32>
    %58 = vector.extract_strided_slice %56 {offsets = [0, 0], sizes = [8, 64], strides = [1, 1]} : vector<8x128xf32> to vector<8x64xf32>
    %59 = vector.extract_strided_slice %57 {offsets = [0, 0], sizes = [8, 64], strides = [1, 1]} : vector<8x128xf32> to vector<8x64xf32>
    %60 = arith.addf %58, %59 : vector<8x64xf32>
    %61 = arith.negf %60 : vector<8x64xf32>
    %62 = math.exp %61 : vector<8x64xf32>
    %cst_25 = arith.constant 1.000000e+00 : f32
    %63 = vector.broadcast %cst_25 : f32 to vector<8x64xf32>
    %64 = arith.addf %63, %62 : vector<8x64xf32>
    %65 = arith.divf %63, %64 : vector<8x64xf32>
    %66 = vector.extract_strided_slice %65 {offsets = [0, 0], sizes = [8, 32], strides = [1, 1]} : vector<8x64xf32> to vector<8x32xf32>
    %67 = vector.extract_strided_slice %65 {offsets = [0, 32], sizes = [8, 32], strides = [1, 1]} : vector<8x64xf32> to vector<8x32xf32>
    %68 = vector.extract_strided_slice %56 {offsets = [0, 64], sizes = [8, 32], strides = [1, 1]} : vector<8x128xf32> to vector<8x32xf32>
    %69 = vector.extract_strided_slice %57 {offsets = [0, 64], sizes = [8, 32], strides = [1, 1]} : vector<8x128xf32> to vector<8x32xf32>
    %70 = arith.addf %69, %10 : vector<8x32xf32>
    %71 = arith.mulf %66, %70 : vector<8x32xf32>
    %72 = arith.addf %68, %71 : vector<8x32xf32>
    %73 = math.tanh %72 : vector<8x32xf32>
    %74 = arith.subf %54, %73 : vector<8x32xf32>
    %75 = arith.mulf %67, %74 : vector<8x32xf32>
    %76 = arith.addf %73, %75 : vector<8x32xf32>
    %c16_26 = arith.constant 16 : index
    %c0_27 = arith.constant 0 : index
    %77 = vector.load %arg17[%c16_26, %c0_27] : memref<64x32xf32, #tpu.memory_space<vmem>>, vector<8x32xf32>
    tpu.vector_store %arg17[%c16_26, %c0_27], %76 {strides = array<i32>} : memref<64x32xf32, #tpu.memory_space<vmem>>, vector<8x32xf32>,
    %c24 = arith.constant 24 : index
    %c0_28 = arith.constant 0 : index
    %78 = vector.load %arg16[%c24, %c0_28] : memref<64x128xf32, #tpu.memory_space<vmem>>, vector<8x128xf32>
    %cst_29 = arith.constant dense<0.000000e+00> : vector<8x128xf32>
    %79 = tpu.matmul %76, %1, %cst_29 {dimension_numbers = #tpu.dot_dimension_numbers<[1], [0], [0], [1], [0, 0, 1, 1], [], []>} : vector<8x32xf32>, vector<32x128xf32>, vector<8x128xf32> -> vector<8x128xf32>
    %80 = vector.extract_strided_slice %78 {offsets = [0, 0], sizes = [8, 64], strides = [1, 1]} : vector<8x128xf32> to vector<8x64xf32>
    %81 = vector.extract_strided_slice %79 {offsets = [0, 0], sizes = [8, 64], strides = [1, 1]} : vector<8x128xf32> to vector<8x64xf32>
    %82 = arith.addf %80, %81 : vector<8x64xf32>
    %83 = arith.negf %82 : vector<8x64xf32>
    %84 = math.exp %83 : vector<8x64xf32>
    %cst_30 = arith.constant 1.000000e+00 : f32
    %85 = vector.broadcast %cst_30 : f32 to vector<8x64xf32>
    %86 = arith.addf %85, %84 : vector<8x64xf32>
    %87 = arith.divf %85, %86 : vector<8x64xf32>
    %88 = vector.extract_strided_slice %87 {offsets = [0, 0], sizes = [8, 32], strides = [1, 1]} : vector<8x64xf32> to vector<8x32xf32>
    %89 = vector.extract_strided_slice %87 {offsets = [0, 32], sizes = [8, 32], strides = [1, 1]} : vector<8x64xf32> to vector<8x32xf32>
    %90 = vector.extract_strided_slice %78 {offsets = [0, 64], sizes = [8, 32], strides = [1, 1]} : vector<8x128xf32> to vector<8x32xf32>
    %91 = vector.extract_strided_slice %79 {offsets = [0, 64], sizes = [8, 32], strides = [1, 1]} : vector<8x128xf32> to vector<8x32xf32>
    %92 = arith.addf %91, %10 : vector<8x32xf32>
    %93 = arith.mulf %88, %92 : vector<8x32xf32>
    %94 = arith.addf %90, %93 : vector<8x32xf32>
    %95 = math.tanh %94 : vector<8x32xf32>
    %96 = arith.subf %76, %95 : vector<8x32xf32>
    %97 = arith.mulf %89, %96 : vector<8x32xf32>
    %98 = arith.addf %95, %97 : vector<8x32xf32>
    %c24_31 = arith.constant 24 : index
    %c0_32 = arith.constant 0 : index
    %99 = vector.load %arg17[%c24_31, %c0_32] : memref<64x32xf32, #tpu.memory_space<vmem>>, vector<8x32xf32>
    tpu.vector_store %arg17[%c24_31, %c0_32], %98 {strides = array<i32>} : memref<64x32xf32, #tpu.memory_space<vmem>>, vector<8x32xf32>,
    %c32 = arith.constant 32 : index
    %c0_33 = arith.constant 0 : index
    %100 = vector.load %arg16[%c32, %c0_33] : memref<64x128xf32, #tpu.memory_space<vmem>>, vector<8x128xf32>
    %cst_34 = arith.constant dense<0.000000e+00> : vector<8x128xf32>
    %101 = tpu.matmul %98, %1, %cst_34 {dimension_numbers = #tpu.dot_dimension_numbers<[1], [0], [0], [1], [0, 0, 1, 1], [], []>} : vector<8x32xf32>, vector<32x128xf32>, vector<8x128xf32> -> vector<8x128xf32>
    %102 = vector.extract_strided_slice %100 {offsets = [0, 0], sizes = [8, 64], strides = [1, 1]} : vector<8x128xf32> to vector<8x64xf32>
    %103 = vector.extract_strided_slice %101 {offsets = [0, 0], sizes = [8, 64], strides = [1, 1]} : vector<8x128xf32> to vector<8x64xf32>
    %104 = arith.addf %102, %103 : vector<8x64xf32>
    %105 = arith.negf %104 : vector<8x64xf32>
    %106 = math.exp %105 : vector<8x64xf32>
    %cst_35 = arith.constant 1.000000e+00 : f32
    %107 = vector.broadcast %cst_35 : f32 to vector<8x64xf32>
    %108 = arith.addf %107, %106 : vector<8x64xf32>
    %109 = arith.divf %107, %108 : vector<8x64xf32>
    %110 = vector.extract_strided_slice %109 {offsets = [0, 0], sizes = [8, 32], strides = [1, 1]} : vector<8x64xf32> to vector<8x32xf32>
    %111 = vector.extract_strided_slice %109 {offsets = [0, 32], sizes = [8, 32], strides = [1, 1]} : vector<8x64xf32> to vector<8x32xf32>
    %112 = vector.extract_strided_slice %100 {offsets = [0, 64], sizes = [8, 32], strides = [1, 1]} : vector<8x128xf32> to vector<8x32xf32>
    %113 = vector.extract_strided_slice %101 {offsets = [0, 64], sizes = [8, 32], strides = [1, 1]} : vector<8x128xf32> to vector<8x32xf32>
    %114 = arith.addf %113, %10 : vector<8x32xf32>
    %115 = arith.mulf %110, %114 : vector<8x32xf32>
    %116 = arith.addf %112, %115 : vector<8x32xf32>
    %117 = math.tanh %116 : vector<8x32xf32>
    %118 = arith.subf %98, %117 : vector<8x32xf32>
    %119 = arith.mulf %111, %118 : vector<8x32xf32>
    %120 = arith.addf %117, %119 : vector<8x32xf32>
    %c32_36 = arith.constant 32 : index
    %c0_37 = arith.constant 0 : index
    %121 = vector.load %arg17[%c32_36, %c0_37] : memref<64x32xf32, #tpu.memory_space<vmem>>, vector<8x32xf32>
    tpu.vector_store %arg17[%c32_36, %c0_37], %120 {strides = array<i32>} : memref<64x32xf32, #tpu.memory_space<vmem>>, vector<8x32xf32>,
    %c40 = arith.constant 40 : index
    %c0_38 = arith.constant 0 : index
    %122 = vector.load %arg16[%c40, %c0_38] : memref<64x128xf32, #tpu.memory_space<vmem>>, vector<8x128xf32>
    %cst_39 = arith.constant dense<0.000000e+00> : vector<8x128xf32>
    %123 = tpu.matmul %120, %1, %cst_39 {dimension_numbers = #tpu.dot_dimension_numbers<[1], [0], [0], [1], [0, 0, 1, 1], [], []>} : vector<8x32xf32>, vector<32x128xf32>, vector<8x128xf32> -> vector<8x128xf32>
    %124 = vector.extract_strided_slice %122 {offsets = [0, 0], sizes = [8, 64], strides = [1, 1]} : vector<8x128xf32> to vector<8x64xf32>
    %125 = vector.extract_strided_slice %123 {offsets = [0, 0], sizes = [8, 64], strides = [1, 1]} : vector<8x128xf32> to vector<8x64xf32>
    %126 = arith.addf %124, %125 : vector<8x64xf32>
    %127 = arith.negf %126 : vector<8x64xf32>
    %128 = math.exp %127 : vector<8x64xf32>
    %cst_40 = arith.constant 1.000000e+00 : f32
    %129 = vector.broadcast %cst_40 : f32 to vector<8x64xf32>
    %130 = arith.addf %129, %128 : vector<8x64xf32>
    %131 = arith.divf %129, %130 : vector<8x64xf32>
    %132 = vector.extract_strided_slice %131 {offsets = [0, 0], sizes = [8, 32], strides = [1, 1]} : vector<8x64xf32> to vector<8x32xf32>
    %133 = vector.extract_strided_slice %131 {offsets = [0, 32], sizes = [8, 32], strides = [1, 1]} : vector<8x64xf32> to vector<8x32xf32>
    %134 = vector.extract_strided_slice %122 {offsets = [0, 64], sizes = [8, 32], strides = [1, 1]} : vector<8x128xf32> to vector<8x32xf32>
    %135 = vector.extract_strided_slice %123 {offsets = [0, 64], sizes = [8, 32], strides = [1, 1]} : vector<8x128xf32> to vector<8x32xf32>
    %136 = arith.addf %135, %10 : vector<8x32xf32>
    %137 = arith.mulf %132, %136 : vector<8x32xf32>
    %138 = arith.addf %134, %137 : vector<8x32xf32>
    %139 = math.tanh %138 : vector<8x32xf32>
    %140 = arith.subf %120, %139 : vector<8x32xf32>
    %141 = arith.mulf %133, %140 : vector<8x32xf32>
    %142 = arith.addf %139, %141 : vector<8x32xf32>
    %c40_41 = arith.constant 40 : index
    %c0_42 = arith.constant 0 : index
    %143 = vector.load %arg17[%c40_41, %c0_42] : memref<64x32xf32, #tpu.memory_space<vmem>>, vector<8x32xf32>
    tpu.vector_store %arg17[%c40_41, %c0_42], %142 {strides = array<i32>} : memref<64x32xf32, #tpu.memory_space<vmem>>, vector<8x32xf32>,
    %c48 = arith.constant 48 : index
    %c0_43 = arith.constant 0 : index
    %144 = vector.load %arg16[%c48, %c0_43] : memref<64x128xf32, #tpu.memory_space<vmem>>, vector<8x128xf32>
    %cst_44 = arith.constant dense<0.000000e+00> : vector<8x128xf32>
    %145 = tpu.matmul %142, %1, %cst_44 {dimension_numbers = #tpu.dot_dimension_numbers<[1], [0], [0], [1], [0, 0, 1, 1], [], []>} : vector<8x32xf32>, vector<32x128xf32>, vector<8x128xf32> -> vector<8x128xf32>
    %146 = vector.extract_strided_slice %144 {offsets = [0, 0], sizes = [8, 64], strides = [1, 1]} : vector<8x128xf32> to vector<8x64xf32>
    %147 = vector.extract_strided_slice %145 {offsets = [0, 0], sizes = [8, 64], strides = [1, 1]} : vector<8x128xf32> to vector<8x64xf32>
    %148 = arith.addf %146, %147 : vector<8x64xf32>
    %149 = arith.negf %148 : vector<8x64xf32>
    %150 = math.exp %149 : vector<8x64xf32>
    %cst_45 = arith.constant 1.000000e+00 : f32
    %151 = vector.broadcast %cst_45 : f32 to vector<8x64xf32>
    %152 = arith.addf %151, %150 : vector<8x64xf32>
    %153 = arith.divf %151, %152 : vector<8x64xf32>
    %154 = vector.extract_strided_slice %153 {offsets = [0, 0], sizes = [8, 32], strides = [1, 1]} : vector<8x64xf32> to vector<8x32xf32>
    %155 = vector.extract_strided_slice %153 {offsets = [0, 32], sizes = [8, 32], strides = [1, 1]} : vector<8x64xf32> to vector<8x32xf32>
    %156 = vector.extract_strided_slice %144 {offsets = [0, 64], sizes = [8, 32], strides = [1, 1]} : vector<8x128xf32> to vector<8x32xf32>
    %157 = vector.extract_strided_slice %145 {offsets = [0, 64], sizes = [8, 32], strides = [1, 1]} : vector<8x128xf32> to vector<8x32xf32>
    %158 = arith.addf %157, %10 : vector<8x32xf32>
    %159 = arith.mulf %154, %158 : vector<8x32xf32>
    %160 = arith.addf %156, %159 : vector<8x32xf32>
    %161 = math.tanh %160 : vector<8x32xf32>
    %162 = arith.subf %142, %161 : vector<8x32xf32>
    %163 = arith.mulf %155, %162 : vector<8x32xf32>
    %164 = arith.addf %161, %163 : vector<8x32xf32>
    %c48_46 = arith.constant 48 : index
    %c0_47 = arith.constant 0 : index
    %165 = vector.load %arg17[%c48_46, %c0_47] : memref<64x32xf32, #tpu.memory_space<vmem>>, vector<8x32xf32>
    tpu.vector_store %arg17[%c48_46, %c0_47], %164 {strides = array<i32>} : memref<64x32xf32, #tpu.memory_space<vmem>>, vector<8x32xf32>,
    %c56 = arith.constant 56 : index
    %c0_48 = arith.constant 0 : index
    %166 = vector.load %arg16[%c56, %c0_48] : memref<64x128xf32, #tpu.memory_space<vmem>>, vector<8x128xf32>
    %cst_49 = arith.constant dense<0.000000e+00> : vector<8x128xf32>
    %167 = tpu.matmul %164, %1, %cst_49 {dimension_numbers = #tpu.dot_dimension_numbers<[1], [0], [0], [1], [0, 0, 1, 1], [], []>} : vector<8x32xf32>, vector<32x128xf32>, vector<8x128xf32> -> vector<8x128xf32>
    %168 = vector.extract_strided_slice %166 {offsets = [0, 0], sizes = [8, 64], strides = [1, 1]} : vector<8x128xf32> to vector<8x64xf32>
    %169 = vector.extract_strided_slice %167 {offsets = [0, 0], sizes = [8, 64], strides = [1, 1]} : vector<8x128xf32> to vector<8x64xf32>
    %170 = arith.addf %168, %169 : vector<8x64xf32>
    %171 = arith.negf %170 : vector<8x64xf32>
    %172 = math.exp %171 : vector<8x64xf32>
    %cst_50 = arith.constant 1.000000e+00 : f32
    %173 = vector.broadcast %cst_50 : f32 to vector<8x64xf32>
    %174 = arith.addf %173, %172 : vector<8x64xf32>
    %175 = arith.divf %173, %174 : vector<8x64xf32>
    %176 = vector.extract_strided_slice %175 {offsets = [0, 0], sizes = [8, 32], strides = [1, 1]} : vector<8x64xf32> to vector<8x32xf32>
    %177 = vector.extract_strided_slice %175 {offsets = [0, 32], sizes = [8, 32], strides = [1, 1]} : vector<8x64xf32> to vector<8x32xf32>
    %178 = vector.extract_strided_slice %166 {offsets = [0, 64], sizes = [8, 32], strides = [1, 1]} : vector<8x128xf32> to vector<8x32xf32>
    %179 = vector.extract_strided_slice %167 {offsets = [0, 64], sizes = [8, 32], strides = [1, 1]} : vector<8x128xf32> to vector<8x32xf32>
    %180 = arith.addf %179, %10 : vector<8x32xf32>
    %181 = arith.mulf %176, %180 : vector<8x32xf32>
    %182 = arith.addf %178, %181 : vector<8x32xf32>
    %183 = math.tanh %182 : vector<8x32xf32>
    %184 = arith.subf %164, %183 : vector<8x32xf32>
    %185 = arith.mulf %177, %184 : vector<8x32xf32>
    %186 = arith.addf %183, %185 : vector<8x32xf32>
    %c56_51 = arith.constant 56 : index
    %c0_52 = arith.constant 0 : index
    %187 = vector.load %arg17[%c56_51, %c0_52] : memref<64x32xf32, #tpu.memory_space<vmem>>, vector<8x32xf32>
    tpu.vector_store %arg17[%c56_51, %c0_52], %186 {strides = array<i32>} : memref<64x32xf32, #tpu.memory_space<vmem>>, vector<8x32xf32>,
    %c0_53 = arith.constant 0 : index
    %c0_54 = arith.constant 0 : index
    %188 = vector.load %arg5[%c0_53, %c0_54] : memref<32x128xf32, #tpu.memory_space<vmem>>, vector<32x128xf32>
    %c0_55 = arith.constant 0 : index
    %c0_56 = arith.constant 0 : index
    %189 = vector.load %arg6[%c0_55, %c0_56] : memref<32x128xf32, #tpu.memory_space<vmem>>, vector<32x128xf32>
    %c0_57 = arith.constant 0 : index
    %c0_58 = arith.constant 0 : index
    %190 = vector.load %arg7[%c0_57, %c0_58] : memref<1x128xf32, #tpu.memory_space<vmem>>, vector<1x128xf32>
    %c0_59 = arith.constant 0 : index
    %c0_60 = arith.constant 0 : index
    %191 = vector.load %arg8[%c0_59, %c0_60] : memref<1x32xf32, #tpu.memory_space<vmem>>, vector<1x32xf32>
    %c0_61 = arith.constant 0 : index
    %c0_62 = arith.constant 0 : index
    %192 = vector.load %arg17[%c0_61, %c0_62] : memref<64x32xf32, #tpu.memory_space<vmem>>, vector<64x32xf32>
    %cst_63 = arith.constant dense<0.000000e+00> : vector<64x128xf32>
    %193 = tpu.matmul %192, %188, %cst_63 {dimension_numbers = #tpu.dot_dimension_numbers<[1], [0], [0], [1], [0, 0, 1, 1], [], []>} : vector<64x32xf32>, vector<32x128xf32>, vector<64x128xf32> -> vector<64x128xf32>
    %194 = vector.broadcast %190 : vector<1x128xf32> to vector<64x128xf32>
    %195 = arith.addf %193, %194 : vector<64x128xf32>
    %c0_64 = arith.constant 0 : index
    %c0_65 = arith.constant 0 : index
    %196 = vector.load %arg16[%c0_64, %c0_65] : memref<64x128xf32, #tpu.memory_space<vmem>>, vector<64x128xf32>
    tpu.vector_store %arg16[%c0_64, %c0_65], %195 {strides = array<i32>} : memref<64x128xf32, #tpu.memory_space<vmem>>, vector<64x128xf32>,
    %197 = vector.shape_cast %191 : vector<1x32xf32> to vector<1x32xf32>
    %198 = vector.broadcast %197 : vector<1x32xf32> to vector<8x32xf32>
    %cst_66 = arith.constant 0.000000e+00 : f32
    %199 = vector.broadcast %cst_66 : f32 to vector<8x32xf32>
    %c0_67 = arith.constant 0 : index
    %c0_68 = arith.constant 0 : index
    %200 = vector.load %arg16[%c0_67, %c0_68] : memref<64x128xf32, #tpu.memory_space<vmem>>, vector<8x128xf32>
    %cst_69 = arith.constant dense<0.000000e+00> : vector<8x128xf32>
    %201 = tpu.matmul %199, %189, %cst_69 {dimension_numbers = #tpu.dot_dimension_numbers<[1], [0], [0], [1], [0, 0, 1, 1], [], []>} : vector<8x32xf32>, vector<32x128xf32>, vector<8x128xf32> -> vector<8x128xf32>
    %202 = vector.extract_strided_slice %200 {offsets = [0, 0], sizes = [8, 64], strides = [1, 1]} : vector<8x128xf32> to vector<8x64xf32>
    %203 = vector.extract_strided_slice %201 {offsets = [0, 0], sizes = [8, 64], strides = [1, 1]} : vector<8x128xf32> to vector<8x64xf32>
    %204 = arith.addf %202, %203 : vector<8x64xf32>
    %205 = arith.negf %204 : vector<8x64xf32>
    %206 = math.exp %205 : vector<8x64xf32>
    %cst_70 = arith.constant 1.000000e+00 : f32
    %207 = vector.broadcast %cst_70 : f32 to vector<8x64xf32>
    %208 = arith.addf %207, %206 : vector<8x64xf32>
    %209 = arith.divf %207, %208 : vector<8x64xf32>
    %210 = vector.extract_strided_slice %209 {offsets = [0, 0], sizes = [8, 32], strides = [1, 1]} : vector<8x64xf32> to vector<8x32xf32>
    %211 = vector.extract_strided_slice %209 {offsets = [0, 32], sizes = [8, 32], strides = [1, 1]} : vector<8x64xf32> to vector<8x32xf32>
    %212 = vector.extract_strided_slice %200 {offsets = [0, 64], sizes = [8, 32], strides = [1, 1]} : vector<8x128xf32> to vector<8x32xf32>
    %213 = vector.extract_strided_slice %201 {offsets = [0, 64], sizes = [8, 32], strides = [1, 1]} : vector<8x128xf32> to vector<8x32xf32>
    %214 = arith.addf %213, %198 : vector<8x32xf32>
    %215 = arith.mulf %210, %214 : vector<8x32xf32>
    %216 = arith.addf %212, %215 : vector<8x32xf32>
    %217 = math.tanh %216 : vector<8x32xf32>
    %218 = arith.subf %199, %217 : vector<8x32xf32>
    %219 = arith.mulf %211, %218 : vector<8x32xf32>
    %220 = arith.addf %217, %219 : vector<8x32xf32>
    %c0_71 = arith.constant 0 : index
    %c0_72 = arith.constant 0 : index
    %221 = vector.load %arg17[%c0_71, %c0_72] : memref<64x32xf32, #tpu.memory_space<vmem>>, vector<8x32xf32>
    tpu.vector_store %arg17[%c0_71, %c0_72], %220 {strides = array<i32>} : memref<64x32xf32, #tpu.memory_space<vmem>>, vector<8x32xf32>,
    %c8_73 = arith.constant 8 : index
    %c0_74 = arith.constant 0 : index
    %222 = vector.load %arg16[%c8_73, %c0_74] : memref<64x128xf32, #tpu.memory_space<vmem>>, vector<8x128xf32>
    %cst_75 = arith.constant dense<0.000000e+00> : vector<8x128xf32>
    %223 = tpu.matmul %220, %189, %cst_75 {dimension_numbers = #tpu.dot_dimension_numbers<[1], [0], [0], [1], [0, 0, 1, 1], [], []>} : vector<8x32xf32>, vector<32x128xf32>, vector<8x128xf32> -> vector<8x128xf32>
    %224 = vector.extract_strided_slice %222 {offsets = [0, 0], sizes = [8, 64], strides = [1, 1]} : vector<8x128xf32> to vector<8x64xf32>
    %225 = vector.extract_strided_slice %223 {offsets = [0, 0], sizes = [8, 64], strides = [1, 1]} : vector<8x128xf32> to vector<8x64xf32>
    %226 = arith.addf %224, %225 : vector<8x64xf32>
    %227 = arith.negf %226 : vector<8x64xf32>
    %228 = math.exp %227 : vector<8x64xf32>
    %cst_76 = arith.constant 1.000000e+00 : f32
    %229 = vector.broadcast %cst_76 : f32 to vector<8x64xf32>
    %230 = arith.addf %229, %228 : vector<8x64xf32>
    %231 = arith.divf %229, %230 : vector<8x64xf32>
    %232 = vector.extract_strided_slice %231 {offsets = [0, 0], sizes = [8, 32], strides = [1, 1]} : vector<8x64xf32> to vector<8x32xf32>
    %233 = vector.extract_strided_slice %231 {offsets = [0, 32], sizes = [8, 32], strides = [1, 1]} : vector<8x64xf32> to vector<8x32xf32>
    %234 = vector.extract_strided_slice %222 {offsets = [0, 64], sizes = [8, 32], strides = [1, 1]} : vector<8x128xf32> to vector<8x32xf32>
    %235 = vector.extract_strided_slice %223 {offsets = [0, 64], sizes = [8, 32], strides = [1, 1]} : vector<8x128xf32> to vector<8x32xf32>
    %236 = arith.addf %235, %198 : vector<8x32xf32>
    %237 = arith.mulf %232, %236 : vector<8x32xf32>
    %238 = arith.addf %234, %237 : vector<8x32xf32>
    %239 = math.tanh %238 : vector<8x32xf32>
    %240 = arith.subf %220, %239 : vector<8x32xf32>
    %241 = arith.mulf %233, %240 : vector<8x32xf32>
    %242 = arith.addf %239, %241 : vector<8x32xf32>
    %c8_77 = arith.constant 8 : index
    %c0_78 = arith.constant 0 : index
    %243 = vector.load %arg17[%c8_77, %c0_78] : memref<64x32xf32, #tpu.memory_space<vmem>>, vector<8x32xf32>
    tpu.vector_store %arg17[%c8_77, %c0_78], %242 {strides = array<i32>} : memref<64x32xf32, #tpu.memory_space<vmem>>, vector<8x32xf32>,
    %c16_79 = arith.constant 16 : index
    %c0_80 = arith.constant 0 : index
    %244 = vector.load %arg16[%c16_79, %c0_80] : memref<64x128xf32, #tpu.memory_space<vmem>>, vector<8x128xf32>
    %cst_81 = arith.constant dense<0.000000e+00> : vector<8x128xf32>
    %245 = tpu.matmul %242, %189, %cst_81 {dimension_numbers = #tpu.dot_dimension_numbers<[1], [0], [0], [1], [0, 0, 1, 1], [], []>} : vector<8x32xf32>, vector<32x128xf32>, vector<8x128xf32> -> vector<8x128xf32>
    %246 = vector.extract_strided_slice %244 {offsets = [0, 0], sizes = [8, 64], strides = [1, 1]} : vector<8x128xf32> to vector<8x64xf32>
    %247 = vector.extract_strided_slice %245 {offsets = [0, 0], sizes = [8, 64], strides = [1, 1]} : vector<8x128xf32> to vector<8x64xf32>
    %248 = arith.addf %246, %247 : vector<8x64xf32>
    %249 = arith.negf %248 : vector<8x64xf32>
    %250 = math.exp %249 : vector<8x64xf32>
    %cst_82 = arith.constant 1.000000e+00 : f32
    %251 = vector.broadcast %cst_82 : f32 to vector<8x64xf32>
    %252 = arith.addf %251, %250 : vector<8x64xf32>
    %253 = arith.divf %251, %252 : vector<8x64xf32>
    %254 = vector.extract_strided_slice %253 {offsets = [0, 0], sizes = [8, 32], strides = [1, 1]} : vector<8x64xf32> to vector<8x32xf32>
    %255 = vector.extract_strided_slice %253 {offsets = [0, 32], sizes = [8, 32], strides = [1, 1]} : vector<8x64xf32> to vector<8x32xf32>
    %256 = vector.extract_strided_slice %244 {offsets = [0, 64], sizes = [8, 32], strides = [1, 1]} : vector<8x128xf32> to vector<8x32xf32>
    %257 = vector.extract_strided_slice %245 {offsets = [0, 64], sizes = [8, 32], strides = [1, 1]} : vector<8x128xf32> to vector<8x32xf32>
    %258 = arith.addf %257, %198 : vector<8x32xf32>
    %259 = arith.mulf %254, %258 : vector<8x32xf32>
    %260 = arith.addf %256, %259 : vector<8x32xf32>
    %261 = math.tanh %260 : vector<8x32xf32>
    %262 = arith.subf %242, %261 : vector<8x32xf32>
    %263 = arith.mulf %255, %262 : vector<8x32xf32>
    %264 = arith.addf %261, %263 : vector<8x32xf32>
    %c16_83 = arith.constant 16 : index
    %c0_84 = arith.constant 0 : index
    %265 = vector.load %arg17[%c16_83, %c0_84] : memref<64x32xf32, #tpu.memory_space<vmem>>, vector<8x32xf32>
    tpu.vector_store %arg17[%c16_83, %c0_84], %264 {strides = array<i32>} : memref<64x32xf32, #tpu.memory_space<vmem>>, vector<8x32xf32>,
    %c24_85 = arith.constant 24 : index
    %c0_86 = arith.constant 0 : index
    %266 = vector.load %arg16[%c24_85, %c0_86] : memref<64x128xf32, #tpu.memory_space<vmem>>, vector<8x128xf32>
    %cst_87 = arith.constant dense<0.000000e+00> : vector<8x128xf32>
    %267 = tpu.matmul %264, %189, %cst_87 {dimension_numbers = #tpu.dot_dimension_numbers<[1], [0], [0], [1], [0, 0, 1, 1], [], []>} : vector<8x32xf32>, vector<32x128xf32>, vector<8x128xf32> -> vector<8x128xf32>
    %268 = vector.extract_strided_slice %266 {offsets = [0, 0], sizes = [8, 64], strides = [1, 1]} : vector<8x128xf32> to vector<8x64xf32>
    %269 = vector.extract_strided_slice %267 {offsets = [0, 0], sizes = [8, 64], strides = [1, 1]} : vector<8x128xf32> to vector<8x64xf32>
    %270 = arith.addf %268, %269 : vector<8x64xf32>
    %271 = arith.negf %270 : vector<8x64xf32>
    %272 = math.exp %271 : vector<8x64xf32>
    %cst_88 = arith.constant 1.000000e+00 : f32
    %273 = vector.broadcast %cst_88 : f32 to vector<8x64xf32>
    %274 = arith.addf %273, %272 : vector<8x64xf32>
    %275 = arith.divf %273, %274 : vector<8x64xf32>
    %276 = vector.extract_strided_slice %275 {offsets = [0, 0], sizes = [8, 32], strides = [1, 1]} : vector<8x64xf32> to vector<8x32xf32>
    %277 = vector.extract_strided_slice %275 {offsets = [0, 32], sizes = [8, 32], strides = [1, 1]} : vector<8x64xf32> to vector<8x32xf32>
    %278 = vector.extract_strided_slice %266 {offsets = [0, 64], sizes = [8, 32], strides = [1, 1]} : vector<8x128xf32> to vector<8x32xf32>
    %279 = vector.extract_strided_slice %267 {offsets = [0, 64], sizes = [8, 32], strides = [1, 1]} : vector<8x128xf32> to vector<8x32xf32>
    %280 = arith.addf %279, %198 : vector<8x32xf32>
    %281 = arith.mulf %276, %280 : vector<8x32xf32>
    %282 = arith.addf %278, %281 : vector<8x32xf32>
    %283 = math.tanh %282 : vector<8x32xf32>
    %284 = arith.subf %264, %283 : vector<8x32xf32>
    %285 = arith.mulf %277, %284 : vector<8x32xf32>
    %286 = arith.addf %283, %285 : vector<8x32xf32>
    %c24_89 = arith.constant 24 : index
    %c0_90 = arith.constant 0 : index
    %287 = vector.load %arg17[%c24_89, %c0_90] : memref<64x32xf32, #tpu.memory_space<vmem>>, vector<8x32xf32>
    tpu.vector_store %arg17[%c24_89, %c0_90], %286 {strides = array<i32>} : memref<64x32xf32, #tpu.memory_space<vmem>>, vector<8x32xf32>,
    %c32_91 = arith.constant 32 : index
    %c0_92 = arith.constant 0 : index
    %288 = vector.load %arg16[%c32_91, %c0_92] : memref<64x128xf32, #tpu.memory_space<vmem>>, vector<8x128xf32>
    %cst_93 = arith.constant dense<0.000000e+00> : vector<8x128xf32>
    %289 = tpu.matmul %286, %189, %cst_93 {dimension_numbers = #tpu.dot_dimension_numbers<[1], [0], [0], [1], [0, 0, 1, 1], [], []>} : vector<8x32xf32>, vector<32x128xf32>, vector<8x128xf32> -> vector<8x128xf32>
    %290 = vector.extract_strided_slice %288 {offsets = [0, 0], sizes = [8, 64], strides = [1, 1]} : vector<8x128xf32> to vector<8x64xf32>
    %291 = vector.extract_strided_slice %289 {offsets = [0, 0], sizes = [8, 64], strides = [1, 1]} : vector<8x128xf32> to vector<8x64xf32>
    %292 = arith.addf %290, %291 : vector<8x64xf32>
    %293 = arith.negf %292 : vector<8x64xf32>
    %294 = math.exp %293 : vector<8x64xf32>
    %cst_94 = arith.constant 1.000000e+00 : f32
    %295 = vector.broadcast %cst_94 : f32 to vector<8x64xf32>
    %296 = arith.addf %295, %294 : vector<8x64xf32>
    %297 = arith.divf %295, %296 : vector<8x64xf32>
    %298 = vector.extract_strided_slice %297 {offsets = [0, 0], sizes = [8, 32], strides = [1, 1]} : vector<8x64xf32> to vector<8x32xf32>
    %299 = vector.extract_strided_slice %297 {offsets = [0, 32], sizes = [8, 32], strides = [1, 1]} : vector<8x64xf32> to vector<8x32xf32>
    %300 = vector.extract_strided_slice %288 {offsets = [0, 64], sizes = [8, 32], strides = [1, 1]} : vector<8x128xf32> to vector<8x32xf32>
    %301 = vector.extract_strided_slice %289 {offsets = [0, 64], sizes = [8, 32], strides = [1, 1]} : vector<8x128xf32> to vector<8x32xf32>
    %302 = arith.addf %301, %198 : vector<8x32xf32>
    %303 = arith.mulf %298, %302 : vector<8x32xf32>
    %304 = arith.addf %300, %303 : vector<8x32xf32>
    %305 = math.tanh %304 : vector<8x32xf32>
    %306 = arith.subf %286, %305 : vector<8x32xf32>
    %307 = arith.mulf %299, %306 : vector<8x32xf32>
    %308 = arith.addf %305, %307 : vector<8x32xf32>
    %c32_95 = arith.constant 32 : index
    %c0_96 = arith.constant 0 : index
    %309 = vector.load %arg17[%c32_95, %c0_96] : memref<64x32xf32, #tpu.memory_space<vmem>>, vector<8x32xf32>
    tpu.vector_store %arg17[%c32_95, %c0_96], %308 {strides = array<i32>} : memref<64x32xf32, #tpu.memory_space<vmem>>, vector<8x32xf32>,
    %c40_97 = arith.constant 40 : index
    %c0_98 = arith.constant 0 : index
    %310 = vector.load %arg16[%c40_97, %c0_98] : memref<64x128xf32, #tpu.memory_space<vmem>>, vector<8x128xf32>
    %cst_99 = arith.constant dense<0.000000e+00> : vector<8x128xf32>
    %311 = tpu.matmul %308, %189, %cst_99 {dimension_numbers = #tpu.dot_dimension_numbers<[1], [0], [0], [1], [0, 0, 1, 1], [], []>} : vector<8x32xf32>, vector<32x128xf32>, vector<8x128xf32> -> vector<8x128xf32>
    %312 = vector.extract_strided_slice %310 {offsets = [0, 0], sizes = [8, 64], strides = [1, 1]} : vector<8x128xf32> to vector<8x64xf32>
    %313 = vector.extract_strided_slice %311 {offsets = [0, 0], sizes = [8, 64], strides = [1, 1]} : vector<8x128xf32> to vector<8x64xf32>
    %314 = arith.addf %312, %313 : vector<8x64xf32>
    %315 = arith.negf %314 : vector<8x64xf32>
    %316 = math.exp %315 : vector<8x64xf32>
    %cst_100 = arith.constant 1.000000e+00 : f32
    %317 = vector.broadcast %cst_100 : f32 to vector<8x64xf32>
    %318 = arith.addf %317, %316 : vector<8x64xf32>
    %319 = arith.divf %317, %318 : vector<8x64xf32>
    %320 = vector.extract_strided_slice %319 {offsets = [0, 0], sizes = [8, 32], strides = [1, 1]} : vector<8x64xf32> to vector<8x32xf32>
    %321 = vector.extract_strided_slice %319 {offsets = [0, 32], sizes = [8, 32], strides = [1, 1]} : vector<8x64xf32> to vector<8x32xf32>
    %322 = vector.extract_strided_slice %310 {offsets = [0, 64], sizes = [8, 32], strides = [1, 1]} : vector<8x128xf32> to vector<8x32xf32>
    %323 = vector.extract_strided_slice %311 {offsets = [0, 64], sizes = [8, 32], strides = [1, 1]} : vector<8x128xf32> to vector<8x32xf32>
    %324 = arith.addf %323, %198 : vector<8x32xf32>
    %325 = arith.mulf %320, %324 : vector<8x32xf32>
    %326 = arith.addf %322, %325 : vector<8x32xf32>
    %327 = math.tanh %326 : vector<8x32xf32>
    %328 = arith.subf %308, %327 : vector<8x32xf32>
    %329 = arith.mulf %321, %328 : vector<8x32xf32>
    %330 = arith.addf %327, %329 : vector<8x32xf32>
    %c40_101 = arith.constant 40 : index
    %c0_102 = arith.constant 0 : index
    %331 = vector.load %arg17[%c40_101, %c0_102] : memref<64x32xf32, #tpu.memory_space<vmem>>, vector<8x32xf32>
    tpu.vector_store %arg17[%c40_101, %c0_102], %330 {strides = array<i32>} : memref<64x32xf32, #tpu.memory_space<vmem>>, vector<8x32xf32>,
    %c48_103 = arith.constant 48 : index
    %c0_104 = arith.constant 0 : index
    %332 = vector.load %arg16[%c48_103, %c0_104] : memref<64x128xf32, #tpu.memory_space<vmem>>, vector<8x128xf32>
    %cst_105 = arith.constant dense<0.000000e+00> : vector<8x128xf32>
    %333 = tpu.matmul %330, %189, %cst_105 {dimension_numbers = #tpu.dot_dimension_numbers<[1], [0], [0], [1], [0, 0, 1, 1], [], []>} : vector<8x32xf32>, vector<32x128xf32>, vector<8x128xf32> -> vector<8x128xf32>
    %334 = vector.extract_strided_slice %332 {offsets = [0, 0], sizes = [8, 64], strides = [1, 1]} : vector<8x128xf32> to vector<8x64xf32>
    %335 = vector.extract_strided_slice %333 {offsets = [0, 0], sizes = [8, 64], strides = [1, 1]} : vector<8x128xf32> to vector<8x64xf32>
    %336 = arith.addf %334, %335 : vector<8x64xf32>
    %337 = arith.negf %336 : vector<8x64xf32>
    %338 = math.exp %337 : vector<8x64xf32>
    %cst_106 = arith.constant 1.000000e+00 : f32
    %339 = vector.broadcast %cst_106 : f32 to vector<8x64xf32>
    %340 = arith.addf %339, %338 : vector<8x64xf32>
    %341 = arith.divf %339, %340 : vector<8x64xf32>
    %342 = vector.extract_strided_slice %341 {offsets = [0, 0], sizes = [8, 32], strides = [1, 1]} : vector<8x64xf32> to vector<8x32xf32>
    %343 = vector.extract_strided_slice %341 {offsets = [0, 32], sizes = [8, 32], strides = [1, 1]} : vector<8x64xf32> to vector<8x32xf32>
    %344 = vector.extract_strided_slice %332 {offsets = [0, 64], sizes = [8, 32], strides = [1, 1]} : vector<8x128xf32> to vector<8x32xf32>
    %345 = vector.extract_strided_slice %333 {offsets = [0, 64], sizes = [8, 32], strides = [1, 1]} : vector<8x128xf32> to vector<8x32xf32>
    %346 = arith.addf %345, %198 : vector<8x32xf32>
    %347 = arith.mulf %342, %346 : vector<8x32xf32>
    %348 = arith.addf %344, %347 : vector<8x32xf32>
    %349 = math.tanh %348 : vector<8x32xf32>
    %350 = arith.subf %330, %349 : vector<8x32xf32>
    %351 = arith.mulf %343, %350 : vector<8x32xf32>
    %352 = arith.addf %349, %351 : vector<8x32xf32>
    %c48_107 = arith.constant 48 : index
    %c0_108 = arith.constant 0 : index
    %353 = vector.load %arg17[%c48_107, %c0_108] : memref<64x32xf32, #tpu.memory_space<vmem>>, vector<8x32xf32>
    tpu.vector_store %arg17[%c48_107, %c0_108], %352 {strides = array<i32>} : memref<64x32xf32, #tpu.memory_space<vmem>>, vector<8x32xf32>,
    %c56_109 = arith.constant 56 : index
    %c0_110 = arith.constant 0 : index
    %354 = vector.load %arg16[%c56_109, %c0_110] : memref<64x128xf32, #tpu.memory_space<vmem>>, vector<8x128xf32>
    %cst_111 = arith.constant dense<0.000000e+00> : vector<8x128xf32>
    %355 = tpu.matmul %352, %189, %cst_111 {dimension_numbers = #tpu.dot_dimension_numbers<[1], [0], [0], [1], [0, 0, 1, 1], [], []>} : vector<8x32xf32>, vector<32x128xf32>, vector<8x128xf32> -> vector<8x128xf32>
    %356 = vector.extract_strided_slice %354 {offsets = [0, 0], sizes = [8, 64], strides = [1, 1]} : vector<8x128xf32> to vector<8x64xf32>
    %357 = vector.extract_strided_slice %355 {offsets = [0, 0], sizes = [8, 64], strides = [1, 1]} : vector<8x128xf32> to vector<8x64xf32>
    %358 = arith.addf %356, %357 : vector<8x64xf32>
    %359 = arith.negf %358 : vector<8x64xf32>
    %360 = math.exp %359 : vector<8x64xf32>
    %cst_112 = arith.constant 1.000000e+00 : f32
    %361 = vector.broadcast %cst_112 : f32 to vector<8x64xf32>
    %362 = arith.addf %361, %360 : vector<8x64xf32>
    %363 = arith.divf %361, %362 : vector<8x64xf32>
    %364 = vector.extract_strided_slice %363 {offsets = [0, 0], sizes = [8, 32], strides = [1, 1]} : vector<8x64xf32> to vector<8x32xf32>
    %365 = vector.extract_strided_slice %363 {offsets = [0, 32], sizes = [8, 32], strides = [1, 1]} : vector<8x64xf32> to vector<8x32xf32>
    %366 = vector.extract_strided_slice %354 {offsets = [0, 64], sizes = [8, 32], strides = [1, 1]} : vector<8x128xf32> to vector<8x32xf32>
    %367 = vector.extract_strided_slice %355 {offsets = [0, 64], sizes = [8, 32], strides = [1, 1]} : vector<8x128xf32> to vector<8x32xf32>
    %368 = arith.addf %367, %198 : vector<8x32xf32>
    %369 = arith.mulf %364, %368 : vector<8x32xf32>
    %370 = arith.addf %366, %369 : vector<8x32xf32>
    %371 = math.tanh %370 : vector<8x32xf32>
    %372 = arith.subf %352, %371 : vector<8x32xf32>
    %373 = arith.mulf %365, %372 : vector<8x32xf32>
    %374 = arith.addf %371, %373 : vector<8x32xf32>
    %c56_113 = arith.constant 56 : index
    %c0_114 = arith.constant 0 : index
    %375 = vector.load %arg17[%c56_113, %c0_114] : memref<64x32xf32, #tpu.memory_space<vmem>>, vector<8x32xf32>
    tpu.vector_store %arg17[%c56_113, %c0_114], %374 {strides = array<i32>} : memref<64x32xf32, #tpu.memory_space<vmem>>, vector<8x32xf32>,
    %c0_115 = arith.constant 0 : index
    %c0_116 = arith.constant 0 : index
    %376 = vector.load %arg9[%c0_115, %c0_116] : memref<32x128xf32, #tpu.memory_space<vmem>>, vector<32x128xf32>
    %c0_117 = arith.constant 0 : index
    %c0_118 = arith.constant 0 : index
    %377 = vector.load %arg10[%c0_117, %c0_118] : memref<32x128xf32, #tpu.memory_space<vmem>>, vector<32x128xf32>
    %c0_119 = arith.constant 0 : index
    %c0_120 = arith.constant 0 : index
    %378 = vector.load %arg11[%c0_119, %c0_120] : memref<1x128xf32, #tpu.memory_space<vmem>>, vector<1x128xf32>
    %c0_121 = arith.constant 0 : index
    %c0_122 = arith.constant 0 : index
    %379 = vector.load %arg12[%c0_121, %c0_122] : memref<1x32xf32, #tpu.memory_space<vmem>>, vector<1x32xf32>
    %c0_123 = arith.constant 0 : index
    %c0_124 = arith.constant 0 : index
    %380 = vector.load %arg17[%c0_123, %c0_124] : memref<64x32xf32, #tpu.memory_space<vmem>>, vector<64x32xf32>
    %cst_125 = arith.constant dense<0.000000e+00> : vector<64x128xf32>
    %381 = tpu.matmul %380, %376, %cst_125 {dimension_numbers = #tpu.dot_dimension_numbers<[1], [0], [0], [1], [0, 0, 1, 1], [], []>} : vector<64x32xf32>, vector<32x128xf32>, vector<64x128xf32> -> vector<64x128xf32>
    %382 = vector.broadcast %378 : vector<1x128xf32> to vector<64x128xf32>
    %383 = arith.addf %381, %382 : vector<64x128xf32>
    %c0_126 = arith.constant 0 : index
    %c0_127 = arith.constant 0 : index
    %384 = vector.load %arg16[%c0_126, %c0_127] : memref<64x128xf32, #tpu.memory_space<vmem>>, vector<64x128xf32>
    tpu.vector_store %arg16[%c0_126, %c0_127], %383 {strides = array<i32>} : memref<64x128xf32, #tpu.memory_space<vmem>>, vector<64x128xf32>,
    %385 = vector.shape_cast %379 : vector<1x32xf32> to vector<1x32xf32>
    %386 = vector.broadcast %385 : vector<1x32xf32> to vector<8x32xf32>
    %cst_128 = arith.constant 0.000000e+00 : f32
    %387 = vector.broadcast %cst_128 : f32 to vector<8x32xf32>
    %c0_129 = arith.constant 0 : index
    %c0_130 = arith.constant 0 : index
    %388 = vector.load %arg16[%c0_129, %c0_130] : memref<64x128xf32, #tpu.memory_space<vmem>>, vector<8x128xf32>
    %cst_131 = arith.constant dense<0.000000e+00> : vector<8x128xf32>
    %389 = tpu.matmul %387, %377, %cst_131 {dimension_numbers = #tpu.dot_dimension_numbers<[1], [0], [0], [1], [0, 0, 1, 1], [], []>} : vector<8x32xf32>, vector<32x128xf32>, vector<8x128xf32> -> vector<8x128xf32>
    %390 = vector.extract_strided_slice %388 {offsets = [0, 0], sizes = [8, 64], strides = [1, 1]} : vector<8x128xf32> to vector<8x64xf32>
    %391 = vector.extract_strided_slice %389 {offsets = [0, 0], sizes = [8, 64], strides = [1, 1]} : vector<8x128xf32> to vector<8x64xf32>
    %392 = arith.addf %390, %391 : vector<8x64xf32>
    %393 = arith.negf %392 : vector<8x64xf32>
    %394 = math.exp %393 : vector<8x64xf32>
    %cst_132 = arith.constant 1.000000e+00 : f32
    %395 = vector.broadcast %cst_132 : f32 to vector<8x64xf32>
    %396 = arith.addf %395, %394 : vector<8x64xf32>
    %397 = arith.divf %395, %396 : vector<8x64xf32>
    %398 = vector.extract_strided_slice %397 {offsets = [0, 0], sizes = [8, 32], strides = [1, 1]} : vector<8x64xf32> to vector<8x32xf32>
    %399 = vector.extract_strided_slice %397 {offsets = [0, 32], sizes = [8, 32], strides = [1, 1]} : vector<8x64xf32> to vector<8x32xf32>
    %400 = vector.extract_strided_slice %388 {offsets = [0, 64], sizes = [8, 32], strides = [1, 1]} : vector<8x128xf32> to vector<8x32xf32>
    %401 = vector.extract_strided_slice %389 {offsets = [0, 64], sizes = [8, 32], strides = [1, 1]} : vector<8x128xf32> to vector<8x32xf32>
    %402 = arith.addf %401, %386 : vector<8x32xf32>
    %403 = arith.mulf %398, %402 : vector<8x32xf32>
    %404 = arith.addf %400, %403 : vector<8x32xf32>
    %405 = math.tanh %404 : vector<8x32xf32>
    %406 = arith.subf %387, %405 : vector<8x32xf32>
    %407 = arith.mulf %399, %406 : vector<8x32xf32>
    %408 = arith.addf %405, %407 : vector<8x32xf32>
    %c8_133 = arith.constant 8 : index
    %c0_134 = arith.constant 0 : index
    %409 = vector.load %arg16[%c8_133, %c0_134] : memref<64x128xf32, #tpu.memory_space<vmem>>, vector<8x128xf32>
    %cst_135 = arith.constant dense<0.000000e+00> : vector<8x128xf32>
    %410 = tpu.matmul %408, %377, %cst_135 {dimension_numbers = #tpu.dot_dimension_numbers<[1], [0], [0], [1], [0, 0, 1, 1], [], []>} : vector<8x32xf32>, vector<32x128xf32>, vector<8x128xf32> -> vector<8x128xf32>
    %411 = vector.extract_strided_slice %409 {offsets = [0, 0], sizes = [8, 64], strides = [1, 1]} : vector<8x128xf32> to vector<8x64xf32>
    %412 = vector.extract_strided_slice %410 {offsets = [0, 0], sizes = [8, 64], strides = [1, 1]} : vector<8x128xf32> to vector<8x64xf32>
    %413 = arith.addf %411, %412 : vector<8x64xf32>
    %414 = arith.negf %413 : vector<8x64xf32>
    %415 = math.exp %414 : vector<8x64xf32>
    %cst_136 = arith.constant 1.000000e+00 : f32
    %416 = vector.broadcast %cst_136 : f32 to vector<8x64xf32>
    %417 = arith.addf %416, %415 : vector<8x64xf32>
    %418 = arith.divf %416, %417 : vector<8x64xf32>
    %419 = vector.extract_strided_slice %418 {offsets = [0, 0], sizes = [8, 32], strides = [1, 1]} : vector<8x64xf32> to vector<8x32xf32>
    %420 = vector.extract_strided_slice %418 {offsets = [0, 32], sizes = [8, 32], strides = [1, 1]} : vector<8x64xf32> to vector<8x32xf32>
    %421 = vector.extract_strided_slice %409 {offsets = [0, 64], sizes = [8, 32], strides = [1, 1]} : vector<8x128xf32> to vector<8x32xf32>
    %422 = vector.extract_strided_slice %410 {offsets = [0, 64], sizes = [8, 32], strides = [1, 1]} : vector<8x128xf32> to vector<8x32xf32>
    %423 = arith.addf %422, %386 : vector<8x32xf32>
    %424 = arith.mulf %419, %423 : vector<8x32xf32>
    %425 = arith.addf %421, %424 : vector<8x32xf32>
    %426 = math.tanh %425 : vector<8x32xf32>
    %427 = arith.subf %408, %426 : vector<8x32xf32>
    %428 = arith.mulf %420, %427 : vector<8x32xf32>
    %429 = arith.addf %426, %428 : vector<8x32xf32>
    %c16_137 = arith.constant 16 : index
    %c0_138 = arith.constant 0 : index
    %430 = vector.load %arg16[%c16_137, %c0_138] : memref<64x128xf32, #tpu.memory_space<vmem>>, vector<8x128xf32>
    %cst_139 = arith.constant dense<0.000000e+00> : vector<8x128xf32>
    %431 = tpu.matmul %429, %377, %cst_139 {dimension_numbers = #tpu.dot_dimension_numbers<[1], [0], [0], [1], [0, 0, 1, 1], [], []>} : vector<8x32xf32>, vector<32x128xf32>, vector<8x128xf32> -> vector<8x128xf32>
    %432 = vector.extract_strided_slice %430 {offsets = [0, 0], sizes = [8, 64], strides = [1, 1]} : vector<8x128xf32> to vector<8x64xf32>
    %433 = vector.extract_strided_slice %431 {offsets = [0, 0], sizes = [8, 64], strides = [1, 1]} : vector<8x128xf32> to vector<8x64xf32>
    %434 = arith.addf %432, %433 : vector<8x64xf32>
    %435 = arith.negf %434 : vector<8x64xf32>
    %436 = math.exp %435 : vector<8x64xf32>
    %cst_140 = arith.constant 1.000000e+00 : f32
    %437 = vector.broadcast %cst_140 : f32 to vector<8x64xf32>
    %438 = arith.addf %437, %436 : vector<8x64xf32>
    %439 = arith.divf %437, %438 : vector<8x64xf32>
    %440 = vector.extract_strided_slice %439 {offsets = [0, 0], sizes = [8, 32], strides = [1, 1]} : vector<8x64xf32> to vector<8x32xf32>
    %441 = vector.extract_strided_slice %439 {offsets = [0, 32], sizes = [8, 32], strides = [1, 1]} : vector<8x64xf32> to vector<8x32xf32>
    %442 = vector.extract_strided_slice %430 {offsets = [0, 64], sizes = [8, 32], strides = [1, 1]} : vector<8x128xf32> to vector<8x32xf32>
    %443 = vector.extract_strided_slice %431 {offsets = [0, 64], sizes = [8, 32], strides = [1, 1]} : vector<8x128xf32> to vector<8x32xf32>
    %444 = arith.addf %443, %386 : vector<8x32xf32>
    %445 = arith.mulf %440, %444 : vector<8x32xf32>
    %446 = arith.addf %442, %445 : vector<8x32xf32>
    %447 = math.tanh %446 : vector<8x32xf32>
    %448 = arith.subf %429, %447 : vector<8x32xf32>
    %449 = arith.mulf %441, %448 : vector<8x32xf32>
    %450 = arith.addf %447, %449 : vector<8x32xf32>
    %c24_141 = arith.constant 24 : index
    %c0_142 = arith.constant 0 : index
    %451 = vector.load %arg16[%c24_141, %c0_142] : memref<64x128xf32, #tpu.memory_space<vmem>>, vector<8x128xf32>
    %cst_143 = arith.constant dense<0.000000e+00> : vector<8x128xf32>
    %452 = tpu.matmul %450, %377, %cst_143 {dimension_numbers = #tpu.dot_dimension_numbers<[1], [0], [0], [1], [0, 0, 1, 1], [], []>} : vector<8x32xf32>, vector<32x128xf32>, vector<8x128xf32> -> vector<8x128xf32>
    %453 = vector.extract_strided_slice %451 {offsets = [0, 0], sizes = [8, 64], strides = [1, 1]} : vector<8x128xf32> to vector<8x64xf32>
    %454 = vector.extract_strided_slice %452 {offsets = [0, 0], sizes = [8, 64], strides = [1, 1]} : vector<8x128xf32> to vector<8x64xf32>
    %455 = arith.addf %453, %454 : vector<8x64xf32>
    %456 = arith.negf %455 : vector<8x64xf32>
    %457 = math.exp %456 : vector<8x64xf32>
    %cst_144 = arith.constant 1.000000e+00 : f32
    %458 = vector.broadcast %cst_144 : f32 to vector<8x64xf32>
    %459 = arith.addf %458, %457 : vector<8x64xf32>
    %460 = arith.divf %458, %459 : vector<8x64xf32>
    %461 = vector.extract_strided_slice %460 {offsets = [0, 0], sizes = [8, 32], strides = [1, 1]} : vector<8x64xf32> to vector<8x32xf32>
    %462 = vector.extract_strided_slice %460 {offsets = [0, 32], sizes = [8, 32], strides = [1, 1]} : vector<8x64xf32> to vector<8x32xf32>
    %463 = vector.extract_strided_slice %451 {offsets = [0, 64], sizes = [8, 32], strides = [1, 1]} : vector<8x128xf32> to vector<8x32xf32>
    %464 = vector.extract_strided_slice %452 {offsets = [0, 64], sizes = [8, 32], strides = [1, 1]} : vector<8x128xf32> to vector<8x32xf32>
    %465 = arith.addf %464, %386 : vector<8x32xf32>
    %466 = arith.mulf %461, %465 : vector<8x32xf32>
    %467 = arith.addf %463, %466 : vector<8x32xf32>
    %468 = math.tanh %467 : vector<8x32xf32>
    %469 = arith.subf %450, %468 : vector<8x32xf32>
    %470 = arith.mulf %462, %469 : vector<8x32xf32>
    %471 = arith.addf %468, %470 : vector<8x32xf32>
    %c32_145 = arith.constant 32 : index
    %c0_146 = arith.constant 0 : index
    %472 = vector.load %arg16[%c32_145, %c0_146] : memref<64x128xf32, #tpu.memory_space<vmem>>, vector<8x128xf32>
    %cst_147 = arith.constant dense<0.000000e+00> : vector<8x128xf32>
    %473 = tpu.matmul %471, %377, %cst_147 {dimension_numbers = #tpu.dot_dimension_numbers<[1], [0], [0], [1], [0, 0, 1, 1], [], []>} : vector<8x32xf32>, vector<32x128xf32>, vector<8x128xf32> -> vector<8x128xf32>
    %474 = vector.extract_strided_slice %472 {offsets = [0, 0], sizes = [8, 64], strides = [1, 1]} : vector<8x128xf32> to vector<8x64xf32>
    %475 = vector.extract_strided_slice %473 {offsets = [0, 0], sizes = [8, 64], strides = [1, 1]} : vector<8x128xf32> to vector<8x64xf32>
    %476 = arith.addf %474, %475 : vector<8x64xf32>
    %477 = arith.negf %476 : vector<8x64xf32>
    %478 = math.exp %477 : vector<8x64xf32>
    %cst_148 = arith.constant 1.000000e+00 : f32
    %479 = vector.broadcast %cst_148 : f32 to vector<8x64xf32>
    %480 = arith.addf %479, %478 : vector<8x64xf32>
    %481 = arith.divf %479, %480 : vector<8x64xf32>
    %482 = vector.extract_strided_slice %481 {offsets = [0, 0], sizes = [8, 32], strides = [1, 1]} : vector<8x64xf32> to vector<8x32xf32>
    %483 = vector.extract_strided_slice %481 {offsets = [0, 32], sizes = [8, 32], strides = [1, 1]} : vector<8x64xf32> to vector<8x32xf32>
    %484 = vector.extract_strided_slice %472 {offsets = [0, 64], sizes = [8, 32], strides = [1, 1]} : vector<8x128xf32> to vector<8x32xf32>
    %485 = vector.extract_strided_slice %473 {offsets = [0, 64], sizes = [8, 32], strides = [1, 1]} : vector<8x128xf32> to vector<8x32xf32>
    %486 = arith.addf %485, %386 : vector<8x32xf32>
    %487 = arith.mulf %482, %486 : vector<8x32xf32>
    %488 = arith.addf %484, %487 : vector<8x32xf32>
    %489 = math.tanh %488 : vector<8x32xf32>
    %490 = arith.subf %471, %489 : vector<8x32xf32>
    %491 = arith.mulf %483, %490 : vector<8x32xf32>
    %492 = arith.addf %489, %491 : vector<8x32xf32>
    %c40_149 = arith.constant 40 : index
    %c0_150 = arith.constant 0 : index
    %493 = vector.load %arg16[%c40_149, %c0_150] : memref<64x128xf32, #tpu.memory_space<vmem>>, vector<8x128xf32>
    %cst_151 = arith.constant dense<0.000000e+00> : vector<8x128xf32>
    %494 = tpu.matmul %492, %377, %cst_151 {dimension_numbers = #tpu.dot_dimension_numbers<[1], [0], [0], [1], [0, 0, 1, 1], [], []>} : vector<8x32xf32>, vector<32x128xf32>, vector<8x128xf32> -> vector<8x128xf32>
    %495 = vector.extract_strided_slice %493 {offsets = [0, 0], sizes = [8, 64], strides = [1, 1]} : vector<8x128xf32> to vector<8x64xf32>
    %496 = vector.extract_strided_slice %494 {offsets = [0, 0], sizes = [8, 64], strides = [1, 1]} : vector<8x128xf32> to vector<8x64xf32>
    %497 = arith.addf %495, %496 : vector<8x64xf32>
    %498 = arith.negf %497 : vector<8x64xf32>
    %499 = math.exp %498 : vector<8x64xf32>
    %cst_152 = arith.constant 1.000000e+00 : f32
    %500 = vector.broadcast %cst_152 : f32 to vector<8x64xf32>
    %501 = arith.addf %500, %499 : vector<8x64xf32>
    %502 = arith.divf %500, %501 : vector<8x64xf32>
    %503 = vector.extract_strided_slice %502 {offsets = [0, 0], sizes = [8, 32], strides = [1, 1]} : vector<8x64xf32> to vector<8x32xf32>
    %504 = vector.extract_strided_slice %502 {offsets = [0, 32], sizes = [8, 32], strides = [1, 1]} : vector<8x64xf32> to vector<8x32xf32>
    %505 = vector.extract_strided_slice %493 {offsets = [0, 64], sizes = [8, 32], strides = [1, 1]} : vector<8x128xf32> to vector<8x32xf32>
    %506 = vector.extract_strided_slice %494 {offsets = [0, 64], sizes = [8, 32], strides = [1, 1]} : vector<8x128xf32> to vector<8x32xf32>
    %507 = arith.addf %506, %386 : vector<8x32xf32>
    %508 = arith.mulf %503, %507 : vector<8x32xf32>
    %509 = arith.addf %505, %508 : vector<8x32xf32>
    %510 = math.tanh %509 : vector<8x32xf32>
    %511 = arith.subf %492, %510 : vector<8x32xf32>
    %512 = arith.mulf %504, %511 : vector<8x32xf32>
    %513 = arith.addf %510, %512 : vector<8x32xf32>
    %c48_153 = arith.constant 48 : index
    %c0_154 = arith.constant 0 : index
    %514 = vector.load %arg16[%c48_153, %c0_154] : memref<64x128xf32, #tpu.memory_space<vmem>>, vector<8x128xf32>
    %cst_155 = arith.constant dense<0.000000e+00> : vector<8x128xf32>
    %515 = tpu.matmul %513, %377, %cst_155 {dimension_numbers = #tpu.dot_dimension_numbers<[1], [0], [0], [1], [0, 0, 1, 1], [], []>} : vector<8x32xf32>, vector<32x128xf32>, vector<8x128xf32> -> vector<8x128xf32>
    %516 = vector.extract_strided_slice %514 {offsets = [0, 0], sizes = [8, 64], strides = [1, 1]} : vector<8x128xf32> to vector<8x64xf32>
    %517 = vector.extract_strided_slice %515 {offsets = [0, 0], sizes = [8, 64], strides = [1, 1]} : vector<8x128xf32> to vector<8x64xf32>
    %518 = arith.addf %516, %517 : vector<8x64xf32>
    %519 = arith.negf %518 : vector<8x64xf32>
    %520 = math.exp %519 : vector<8x64xf32>
    %cst_156 = arith.constant 1.000000e+00 : f32
    %521 = vector.broadcast %cst_156 : f32 to vector<8x64xf32>
    %522 = arith.addf %521, %520 : vector<8x64xf32>
    %523 = arith.divf %521, %522 : vector<8x64xf32>
    %524 = vector.extract_strided_slice %523 {offsets = [0, 0], sizes = [8, 32], strides = [1, 1]} : vector<8x64xf32> to vector<8x32xf32>
    %525 = vector.extract_strided_slice %523 {offsets = [0, 32], sizes = [8, 32], strides = [1, 1]} : vector<8x64xf32> to vector<8x32xf32>
    %526 = vector.extract_strided_slice %514 {offsets = [0, 64], sizes = [8, 32], strides = [1, 1]} : vector<8x128xf32> to vector<8x32xf32>
    %527 = vector.extract_strided_slice %515 {offsets = [0, 64], sizes = [8, 32], strides = [1, 1]} : vector<8x128xf32> to vector<8x32xf32>
    %528 = arith.addf %527, %386 : vector<8x32xf32>
    %529 = arith.mulf %524, %528 : vector<8x32xf32>
    %530 = arith.addf %526, %529 : vector<8x32xf32>
    %531 = math.tanh %530 : vector<8x32xf32>
    %532 = arith.subf %513, %531 : vector<8x32xf32>
    %533 = arith.mulf %525, %532 : vector<8x32xf32>
    %534 = arith.addf %531, %533 : vector<8x32xf32>
    %c56_157 = arith.constant 56 : index
    %c0_158 = arith.constant 0 : index
    %535 = vector.load %arg16[%c56_157, %c0_158] : memref<64x128xf32, #tpu.memory_space<vmem>>, vector<8x128xf32>
    %cst_159 = arith.constant dense<0.000000e+00> : vector<8x128xf32>
    %536 = tpu.matmul %534, %377, %cst_159 {dimension_numbers = #tpu.dot_dimension_numbers<[1], [0], [0], [1], [0, 0, 1, 1], [], []>} : vector<8x32xf32>, vector<32x128xf32>, vector<8x128xf32> -> vector<8x128xf32>
    %537 = vector.extract_strided_slice %535 {offsets = [0, 0], sizes = [8, 64], strides = [1, 1]} : vector<8x128xf32> to vector<8x64xf32>
    %538 = vector.extract_strided_slice %536 {offsets = [0, 0], sizes = [8, 64], strides = [1, 1]} : vector<8x128xf32> to vector<8x64xf32>
    %539 = arith.addf %537, %538 : vector<8x64xf32>
    %540 = arith.negf %539 : vector<8x64xf32>
    %541 = math.exp %540 : vector<8x64xf32>
    %cst_160 = arith.constant 1.000000e+00 : f32
    %542 = vector.broadcast %cst_160 : f32 to vector<8x64xf32>
    %543 = arith.addf %542, %541 : vector<8x64xf32>
    %544 = arith.divf %542, %543 : vector<8x64xf32>
    %545 = vector.extract_strided_slice %544 {offsets = [0, 0], sizes = [8, 32], strides = [1, 1]} : vector<8x64xf32> to vector<8x32xf32>
    %546 = vector.extract_strided_slice %544 {offsets = [0, 32], sizes = [8, 32], strides = [1, 1]} : vector<8x64xf32> to vector<8x32xf32>
    %547 = vector.extract_strided_slice %535 {offsets = [0, 64], sizes = [8, 32], strides = [1, 1]} : vector<8x128xf32> to vector<8x32xf32>
    %548 = vector.extract_strided_slice %536 {offsets = [0, 64], sizes = [8, 32], strides = [1, 1]} : vector<8x128xf32> to vector<8x32xf32>
    %549 = arith.addf %548, %386 : vector<8x32xf32>
    %550 = arith.mulf %545, %549 : vector<8x32xf32>
    %551 = arith.addf %547, %550 : vector<8x32xf32>
    %552 = math.tanh %551 : vector<8x32xf32>
    %553 = arith.subf %534, %552 : vector<8x32xf32>
    %554 = arith.mulf %546, %553 : vector<8x32xf32>
    %555 = arith.addf %552, %554 : vector<8x32xf32>
    %c0_161 = arith.constant 0 : index
    %c0_162 = arith.constant 0 : index
    %556 = vector.load %arg13[%c0_161, %c0_162] : memref<32x128xf32, #tpu.memory_space<vmem>>, vector<32x128xf32>
    %cst_163 = arith.constant dense<0.000000e+00> : vector<8x128xf32>
    %557 = tpu.matmul %555, %556, %cst_163 {dimension_numbers = #tpu.dot_dimension_numbers<[1], [0], [0], [1], [0, 0, 1, 1], [], []>} : vector<8x32xf32>, vector<32x128xf32>, vector<8x128xf32> -> vector<8x128xf32>
    %c0_164 = arith.constant 0 : index
    %c0_165 = arith.constant 0 : index
    %558 = vector.load %arg14[%c0_164, %c0_165] : memref<1x128xf32, #tpu.memory_space<vmem>>, vector<1x128xf32>
    %559 = vector.broadcast %558 : vector<1x128xf32> to vector<8x128xf32>
    %560 = arith.addf %557, %559 : vector<8x128xf32>
    %c0_166 = arith.constant 0 : index
    %c0_167 = arith.constant 0 : index
    %561 = vector.load %arg15[%c0_166, %c0_167] : memref<8x128xf32, #tpu.memory_space<vmem>>, vector<8x128xf32>
    tpu.vector_store %arg15[%c0_166, %c0_167], %560 {strides = array<i32>} : memref<8x128xf32, #tpu.memory_space<vmem>>, vector<8x128xf32>,
    return
  }
}

</mosaic_0001>

<bundles_post_ra>
// kernel: tpu_custom_call.1
= control target key start
LH: loop header
LB: loop body
LE: loop exit
PB: predicated region body
PF: predicated region fallthrough
CT: control target
= control target key end

     0   :  { %20 = vsyncpa [#allocation5], 0  ;;  %s5283_s0 = inlined_call_operand.hbm [shape: f32[64,128], index: 0, kind: input, shape index: {}]   ;;  %s5284_s1 = inlined_call_operand.hbm [shape: f32[128,128], index: 1, kind: input, shape index: {}]   ;;  %s5285_s2 = inlined_call_operand.hbm [shape: f32[32,128], index: 2, kind: input, shape index: {}]   ;;  %s5286_s3 = inlined_call_operand.vmem [shape: f32[1,128], index: 3, kind: input, shape index: {}]   ;;  %s5287_s4 = inlined_call_operand.vmem [shape: f32[1,32], index: 4, kind: input, shape index: {}]   ;;  %s5288_s5 = inlined_call_operand.hbm [shape: f32[32,128], index: 5, kind: input, shape index: {}]   ;;  %s5289_s6 = inlined_call_operand.hbm [shape: f32[32,128], index: 6, kind: input, shape index: {}]   ;;  %s5290_s7 = inlined_call_operand.hbm [shape: f32[1,128], index: 7, kind: input, shape index: {}]   ;;  %s5291_s8 = inlined_call_operand.hbm [shape: f32[1,32], index: 8, kind: input, shape index: {}]   ;;  %s5292_s9 = inlined_call_operand.vmem [shape: f32[32,128], index: 9, kind: input, shape index: {}]   ;;  %s5293_s10 = inlined_call_operand.hbm [shape: f32[32,128], index: 10, kind: input, shape index: {}]   ;;  %s5294_s11 = inlined_call_operand.vmem [shape: f32[1,128], index: 11, kind: input, shape index: {}]   ;;  %s5295_s12 = inlined_call_operand.vmem [shape: f32[1,32], index: 12, kind: input, shape index: {}]   ;;  %s5296_s13 = inlined_call_operand.hbm [shape: f32[32,128], index: 13, kind: input, shape index: {}]   ;;  %s5297_s14 = inlined_call_operand.vmem [shape: f32[1,128], index: 14, kind: input, shape index: {}]   ;;  %s5298_s15 = inlined_call_operand.hbm [shape: f32[8,128], index: 15, kind: output, shape index: {}]  }
   0x1   :  { %21 = vsyncpa [#allocation8], 0 }
   0x2   :  { %22 = vsyncpa [#allocation11], 0 }
   0x3   :  { %23 = vsyncpa [#allocation14], 0 }
   0x4   :  { %24 = vsyncpa [#allocation17], 0 }
   0x5   :  { %25 = vsyncpa [#allocation6], 0  ;;  %s4534_s18 = smov [#allocation7]   ;;  %s4535_s20 = smov [#allocation10]  }
   0x6   :  { %s43_s19 = sshll.u32 %s4534_s18, 4  ;;  %s71_s21 = sshll.u32 %s4535_s20, 4  ;;  %s44_s19 = int_to_ptr.vmem [resolvable:$true] %s43_s19  ;;  %s4632_s21 = int_to_ptr.vmem [resolvable:$true] %s71_s21 }
   0x7   :  { %s4302_s24 = scalar_lea.hbm %s5284_s1, 2048 }
   0x8   :  { %p4303_p0 = scmp.ne.s32.totalorder %s5284_s1, %s4302_s24  ;;  %p4306_p1 = scmp.lt.u32.totalorder %s4302_s24, %s5284_s1 }
   0xa   :  { %p4308_p2 = pnand %p4306_p1, %p4303_p0 }
   0xc   :  { %4311 = shalt.err (!%p4308_p2)
}
   0xd   :  { %s4312_s29 = scalar_lea.vmem %s44_s19, 2048  ;;  %p4317_p4 = scmp.lt.s32.totalorder %s44_s19, %s44_s19 }
   0xe   :  { %p4313_p3 = scmp.ne.s32.totalorder %s44_s19, %s4312_s29  ;;  %p4318_p5 = scmp.lt.s32.totalorder %s4312_s29, %s4312_s29 }
  0x10   :  { %p4319_p6 = por %p4318_p5, %p4317_p4 }
  0x12   :  { %p4320_p7 = pnand %p4319_p6, %p4313_p3 }
  0x14   :  { %4323 = shalt.err (!%p4320_p7)
}
  0x15   :  { %s4536_s30 = smov 128   ;;  %s4537_s16 = smov 8  }
  0x16   :  { %49 = dma.hbm_to_vmem [thread:$0]  %s5284_s1, 2048, %s44_s19, [#allocation8], %s4536_s30, %s4536_s30, %s4537_s16  }
  0x17   :  { %s4324_s23 = scalar_lea.hbm %s5288_s5, 512 }
  0x18   :  { %p4325_p8 = scmp.ne.s32.totalorder %s5288_s5, %s4324_s23  ;;  %p4328_p9 = scmp.lt.u32.totalorder %s4324_s23, %s5288_s5 }
  0x1a   :  { %p4330_p10 = pnand %p4328_p9, %p4325_p8 }
  0x1c   :  { %4333 = shalt.err (!%p4330_p10)
}
  0x1d   :  { %s4334_s28 = scalar_lea.vmem %s4632_s21, 512  ;;  %p4339_p12 = scmp.lt.s32.totalorder %s4632_s21, %s4632_s21 }
  0x1e   :  { %p4335_p11 = scmp.ne.s32.totalorder %s4632_s21, %s4334_s28  ;;  %p4340_p13 = scmp.lt.s32.totalorder %s4334_s28, %s4334_s28 }
  0x20   :  { %p4341_p0 = por %p4340_p13, %p4339_p12 }
  0x22   :  { %p4342_p1 = pnand %p4341_p0, %p4335_p11 }
  0x24   :  { %4345 = shalt.err (!%p4342_p1)
}
  0x25   :  { %77 = dma.hbm_to_vmem [thread:$0]  %s5288_s5, 512, %s4632_s21, [#allocation11], %s4536_s30, %s4536_s30, %s4537_s16  }
  0x26   :  { %s4538_s29 = smov [#allocation13]   ;;  %s4539_s18 = smov [#allocation16]  }
  0x27   :  { %s96_s17 = sshll.u32 %s4538_s29, 4  ;;  %s117_s20 = sshll.u32 %s4539_s18, 4  ;;  %s97_s17 = int_to_ptr.vmem [resolvable:$true] %s96_s17  ;;  %s4669_s20 = int_to_ptr.vmem [resolvable:$true] %s117_s20 }
  0x28   :  { %s4346_s24 = scalar_lea.hbm %s5290_s7, 16 }
  0x29   :  { %p4347_p2 = scmp.ne.s32.totalorder %s5290_s7, %s4346_s24  ;;  %p4350_p3 = scmp.lt.u32.totalorder %s4346_s24, %s5290_s7 }
  0x2b   :  { %p4352_p4 = pnand %p4350_p3, %p4347_p2 }
  0x2d   :  { %4355 = shalt.err (!%p4352_p4)
}
  0x2e   :  { %s4356_s5 = scalar_lea.vmem %s97_s17, 16  ;;  %s4360_s21 = scalar_lea.vmem %s97_s17, 32 }
  0x2f   :  { %p4357_p5 = scmp.ne.s32.totalorder %s97_s17, %s4356_s5  ;;  %p4361_p6 = scmp.lt.s32.totalorder %s97_s17, %s97_s17 }
  0x30   :  { %p4362_p7 = scmp.lt.s32.totalorder %s4360_s21, %s4356_s5 }
  0x32   :  { %p4363_p8 = por %p4362_p7, %p4361_p6 }
  0x34   :  { %p4364_p9 = pnand %p4363_p8, %p4357_p5 }
  0x36   :  { %4367 = shalt.err (!%p4364_p9)
}
  0x37   :  { %99 = dma.hbm_to_vmem [thread:$0]  %s5290_s7, 16, %s97_s17, [#allocation14]  }
  0x38   :  { %s4368_s22 = scalar_lea.hbm %s5293_s10, 512 }
  0x39   :  { %p4369_p10 = scmp.ne.s32.totalorder %s5293_s10, %s4368_s22  ;;  %p4372_p11 = scmp.lt.u32.totalorder %s4368_s22, %s5293_s10 }
  0x3b   :  { %p4374_p12 = pnand %p4372_p11, %p4369_p10 }
  0x3d   :  { %4377 = shalt.err (!%p4374_p12)
}
  0x3e   :  { %s4378_s27 = scalar_lea.vmem %s4669_s20, 512  ;;  %p4383_p0 = scmp.lt.s32.totalorder %s4669_s20, %s4669_s20 }
  0x3f   :  { %p4379_p13 = scmp.ne.s32.totalorder %s4669_s20, %s4378_s27  ;;  %p4384_p1 = scmp.lt.s32.totalorder %s4378_s27, %s4378_s27 }
  0x41   :  { %p4385_p2 = por %p4384_p1, %p4383_p0 }
  0x43   :  { %p4386_p3 = pnand %p4385_p2, %p4379_p13 }
  0x45   :  { %4389 = shalt.err (!%p4386_p3)
}
  0x46   :  { %123 = dma.hbm_to_vmem [thread:$0]  %s5293_s10, 512, %s4669_s20, [#allocation17], %s4536_s30, %s4536_s30, %s4537_s16  }
  0x47   :  { %s4540_s28 = smov [#allocation4]   ;;  %s4541_s21 = smov [#allocation9]  }
  0x48   :  { %s31_s5 = sshll.u32 %s4540_s28, 4  ;;  %s55_s1 = sshll.u32 %s4541_s21, 4  ;;  %s32_s5 = int_to_ptr.vmem [resolvable:$true] %s31_s5  ;;  %s4703_s1 = int_to_ptr.vmem [resolvable:$true] %s55_s1 }
  0x49   :  { %s4390_s18 = scalar_lea.hbm %s5283_s0, 1024 }
  0x4a   :  { %p4391_p4 = scmp.ne.s32.totalorder %s5283_s0, %s4390_s18  ;;  %p4394_p5 = scmp.lt.u32.totalorder %s4390_s18, %s5283_s0 }
  0x4c   :  { %p4396_p6 = pnand %p4394_p5, %p4391_p4 }
  0x4e   :  { %4399 = shalt.err (!%p4396_p6)
}
  0x4f   :  { %s4400_s10 = scalar_lea.vmem %s32_s5, 1024  ;;  %p4405_p8 = scmp.lt.s32.totalorder %s32_s5, %s32_s5 }
  0x50   :  { %p4401_p7 = scmp.ne.s32.totalorder %s32_s5, %s4400_s10  ;;  %p4406_p9 = scmp.lt.s32.totalorder %s4400_s10, %s4400_s10 }
  0x52   :  { %p4407_p10 = por %p4406_p9, %p4405_p8 }
  0x54   :  { %p4408_p11 = pnand %p4407_p10, %p4401_p7 }
  0x56   :  { %4411 = shalt.err (!%p4408_p11)
}
  0x57   :  { %37 = dma.hbm_to_vmem [thread:$0]  %s5283_s0, 1024, %s32_s5, [#allocation5], %s4536_s30, %s4536_s30, %s4537_s16  }
  0x58   :  { %s4412_s17 = scalar_lea.hbm %s5285_s2, 512 }
  0x59   :  { %p4413_p12 = scmp.ne.s32.totalorder %s5285_s2, %s4412_s17  ;;  %p4416_p13 = scmp.lt.u32.totalorder %s4412_s17, %s5285_s2 }
  0x5b   :  { %p4418_p0 = pnand %p4416_p13, %p4413_p12 }
  0x5d   :  { %4421 = shalt.err (!%p4418_p0)
}
  0x5e   :  { %s4422_s18 = scalar_lea.vmem %s4703_s1, 512  ;;  %p4427_p2 = scmp.lt.s32.totalorder %s4703_s1, %s4703_s1 }
  0x5f   :  { %p4423_p1 = scmp.ne.s32.totalorder %s4703_s1, %s4422_s18  ;;  %p4428_p3 = scmp.lt.s32.totalorder %s4422_s18, %s4422_s18 }
  0x61   :  { %p4429_p4 = por %p4428_p3, %p4427_p2 }
  0x63   :  { %p4430_p5 = pnand %p4429_p4, %p4423_p1 }
  0x65   :  { %4433 = shalt.err (!%p4430_p5)
}
  0x66   :  { %61 = dma.hbm_to_vmem [thread:$0]  %s5285_s2, 512, %s4703_s1, [#allocation8], %s4536_s30, %s4536_s30, %s4537_s16  }
  0x67   :  { %s4542_s22 = smov [#allocation12]   ;;  %s4543_s24 = smov [#allocation15]  }
  0x68   :  { %s83_s23 = sshll.u32 %s4542_s22, 4  ;;  %s106_s25 = sshll.u32 %s4543_s24, 4  ;;  %s84_s23 = int_to_ptr.vmem [resolvable:$true] %s83_s23  ;;  %s107_s25 = int_to_ptr.vmem [resolvable:$true] %s106_s25 }
  0x69   :  { %s4434_s26 = scalar_lea.hbm %s5289_s6, 512 }
  0x6a   :  { %p4435_p6 = scmp.ne.s32.totalorder %s5289_s6, %s4434_s26  ;;  %p4438_p7 = scmp.lt.u32.totalorder %s4434_s26, %s5289_s6 }
  0x6c   :  { %p4440_p8 = pnand %p4438_p7, %p4435_p6 }
  0x6e   :  { %4443 = shalt.err (!%p4440_p8)
}
  0x6f   :  { %s4444_s2 = scalar_lea.vmem %s84_s23, 512  ;;  %p4449_p10 = scmp.lt.s32.totalorder %s84_s23, %s84_s23 }
  0x70   :  { %p4445_p9 = scmp.ne.s32.totalorder %s84_s23, %s4444_s2  ;;  %p4450_p11 = scmp.lt.s32.totalorder %s4444_s2, %s4444_s2 }
  0x72   :  { %p4451_p12 = por %p4450_p11, %p4449_p10 }
  0x74   :  { %p4452_p13 = pnand %p4451_p12, %p4445_p9 }
  0x76   :  { %4455 = shalt.err (!%p4452_p13)
}
  0x77   :  { %89 = dma.hbm_to_vmem [thread:$0]  %s5289_s6, 512, %s84_s23, [#allocation11], %s4536_s30, %s4536_s30, %s4537_s16  }
  0x78   :  { %s4456_s18 = scalar_lea.hbm %s5291_s8, 16 }
  0x79   :  { %p4457_p0 = scmp.ne.s32.totalorder %s5291_s8, %s4456_s18  ;;  %p4460_p1 = scmp.lt.u32.totalorder %s4456_s18, %s5291_s8 }
  0x7b   :  { %p4462_p2 = pnand %p4460_p1, %p4457_p0 }
  0x7d   :  { %4465 = shalt.err (!%p4462_p2)
}
  0x7e   :  { %s4466_s10 = scalar_lea.vmem %s107_s25, 16  ;;  %s4470_s20 = scalar_lea.vmem %s107_s25, 32 }
  0x7f   :  { %p4467_p3 = scmp.ne.s32.totalorder %s107_s25, %s4466_s10  ;;  %p4471_p4 = scmp.lt.s32.totalorder %s107_s25, %s107_s25 }
  0x80   :  { %p4472_p5 = scmp.lt.s32.totalorder %s4470_s20, %s4466_s10 }
  0x82   :  { %p4473_p6 = por %p4472_p5, %p4471_p4 }
  0x84   :  { %p4474_p7 = pnand %p4473_p6, %p4467_p3 }
  0x86   :  { %4477 = shalt.err (!%p4474_p7)
}
  0x87   :  { %109 = dma.hbm_to_vmem [thread:$0]  %s5291_s8, 16, %s107_s25, [#allocation14]  }
  0x88   :  { %s4544_s26 = smov [#allocation18]   ;;  %s4478_s28 = scalar_lea.hbm %s5296_s13, 512 }
  0x89   :  { %s133_s27 = sshll.u32 %s4544_s26, 4  ;;  %p4479_p8 = scmp.ne.s32.totalorder %s5296_s13, %s4478_s28  ;;  %s134_s27 = int_to_ptr.vmem [resolvable:$true] %s133_s27 }
  0x8a   :  { %p4482_p9 = scmp.lt.u32.totalorder %s4478_s28, %s5296_s13 }
  0x8c   :  { %p4484_p10 = pnand %p4482_p9, %p4479_p8 }
  0x8e   :  { %4487 = shalt.err (!%p4484_p10)
}
  0x8f   :  { %s4488_s29 = scalar_lea.vmem %s134_s27, 512  ;;  %p4493_p12 = scmp.lt.s32.totalorder %s134_s27, %s134_s27 }
  0x90   :  { %p4489_p11 = scmp.ne.s32.totalorder %s134_s27, %s4488_s29  ;;  %p4494_p13 = scmp.lt.s32.totalorder %s4488_s29, %s4488_s29 }
  0x92   :  { %p4495_p0 = por %p4494_p13, %p4493_p12 }
  0x94   :  { %p4496_p1 = pnand %p4495_p0, %p4489_p11 }
  0x96   :  { %4499 = shalt.err (!%p4496_p1)
}
  0x97   :  { %139 = dma.hbm_to_vmem [thread:$0]  %s5296_s13, 512, %s134_s27, [#allocation17], %s4536_s30, %s4536_s30, %s4537_s16  }
  0x98   :  { %4522 = dma.done.wait [#allocation5], 1024  }
  0x99   :  { %4523 = vsyncadd [#allocation5], 4294966272 }
  0x9a   :  { %4524 = dma.done.wait [#allocation8], 2560  }
  0x9b   :  { %4525 = vsyncadd [#allocation8], 4294964736 }
  0x9c   :  { %4526 = dma.done.wait [#allocation11], 1024  }
  0x9d   :  { %4527 = vsyncadd [#allocation11], 4294966272 }
  0x9e   :  { %4528 = dma.done.wait [#allocation14], 32  }
  0x9f   :  { %4529 = vsyncadd [#allocation14], 4294967264 }
  0xa0   :  { %4530 = dma.done.wait [#allocation17], 1024  }
  0xa1   :  { %4531 = vsyncadd [#allocation17], 4294966272  ;;  %v4545_v0 = vmov 0.0|0.0   ;;  %vm4546_vm0 = vmmov 0   ;;  %v4547_v1 = vmov 0.0   ;;  %v169_v2 = vld [vmem:[#allocation7] sm:$0xff] }
  0xa2   :  { %3974 = vmatprep.subr.bf16.mxu1 %v4545_v0  ;;  %3635 = vmatprep.mubr.msk.f32.mxu1 %vm4546_vm0, %v4547_v1  ;;  %v170_v3 = vld [vmem:[#allocation7 + $0x8] sm:$0xff]  ;;  %v185_v4 = vld [vmem:[#allocation9] sm:$0xff]  ;;  %v171_v7 = vld [vmem:[#allocation7 + $0x10] sm:$0xff]  ;;  %s4548_s16 = smov 64   ;;  %s4550_s0 = smov 32   ;;  %vm324_vm1 = vcmask 261120  }
  0xa3   :  { %v3942_v5 = vpack.c.bf16 %v170_v3, %v169_v2  ;;  %v186_v6 = vld [vmem:[#allocation9 + $0x8] sm:$0xff]  ;;  %v172_v8 = vld [vmem:[#allocation7 + $0x18] sm:$0xff]  ;;  %v187_v11 = vld [vmem:[#allocation9 + $0x10] sm:$0xff]  ;;  %s4551_s28 = smov [#allocation19]  }
  0xa4   :  { %v4785_v9 = vpack.c.bf16 %v186_v6, %v185_v4  ;;  %v3946_v10 = vpack.c.bf16 %v172_v8, %v171_v7  ;;  %v188_v12 = vld [vmem:[#allocation9 + $0x18] sm:$0xff]  ;;  %v173_v13 = vld [vmem:[#allocation7 + $0x20] sm:$0xff]  ;;  %v174_v14 = vld [vmem:[#allocation7 + $0x28] sm:$0xff]  ;;  %s3328_s2 = sshll.u32 %s4551_s28, 4  ;;  %s3329_s2 = int_to_ptr.vmem [resolvable:$true] %s3328_s2 }
  0xa5   :  { %3943 = vmatprep.subr.bf16.mxu0 %v3942_v5  ;;  %v4788_v15 = vpack.c.bf16 %v188_v12, %v187_v11  ;;  %v3950_v16 = vpack.c.bf16 %v174_v14, %v173_v13  ;;  %v175_v17 = vld [vmem:[#allocation7 + $0x30] sm:$0xff]  ;;  %v176_v18 = vld [vmem:[#allocation7 + $0x38] sm:$0xff]  ;;  %v191_v19 = vld [vmem:[#allocation4] sm:$0xff]  ;;  %s4500_s1 = scalar_lea.vmem %s3329_s2, 128  ;;  %p4505_p3 = scmp.lt.s32.totalorder %s3329_s2, %s3329_s2 }
  0xa6   :  { %3976 = vmatpush3.bf16.msra.mxu1 %v4785_v9  ;;  %3945 = vmatpush3.bf16.msra.mxu0 %v3942_v5  ;;  %v3342_v20 = vld [vmem:[%s5287_s4] ss:$0 sm:$0xff]  ;;  %v3954_v21 = vpack.c.bf16 %v176_v18, %v175_v17  ;;  %v178_v23 = vld [vmem:[#allocation7 + $0x48] sm:$0xff]  ;;  %v179_v25 = vld [vmem:[#allocation7 + $0x50] sm:$0xff]  ;;  %p4501_p2 = scmp.ne.s32.totalorder %s3329_s2, %s4500_s1  ;;  %p4506_p4 = scmp.lt.s32.totalorder %s4500_s1, %s4500_s1 }
  0xa7   :  { %3977 = vmatprep.subr.bf16.mxu1 %v4545_v0  ;;  %3947 = vmatprep.subr.bf16.mxu0 %v3946_v10  ;;  %v177_v22 = vld [vmem:[#allocation7 + $0x40] sm:$0xff]  ;;  %v180_v26 = vld [vmem:[#allocation7 + $0x58] sm:$0xff]  ;;  %v182_v29 = vld [vmem:[#allocation7 + $0x68] sm:$0xff] }
  0xa8   :  { %3615 = vmatprep.mubr.f32.mxu0 %v191_v19  ;;  %405 = vrot.lane.b32.xlu0 %v3342_v20, %s4548_s16  ;;  %v3958_v24 = vpack.c.bf16 %v178_v23, %v177_v22  ;;  %v3962_v27 = vpack.c.bf16 %v180_v26, %v179_v25  ;;  %v181_v28 = vld [vmem:[#allocation7 + $0x60] sm:$0xff]  ;;  %v183_v31 = vld [vmem:[#allocation7 + $0x70] sm:$0xff]  ;;  %v184_v32 = vld [vmem:[#allocation7 + $0x78] sm:$0xff]  ;;  %p4507_p5 = por %p4506_p4, %p4505_p3 }
  0xa9   :  { %v3966_v30 = vpack.c.bf16 %v182_v29, %v181_v28  ;;  %v3970_v33 = vpack.c.bf16 %v184_v32, %v183_v31  ;;  %v192_v34 = vld [vmem:[#allocation4 + $0x8] sm:$0xff]  ;;  %v4816_v41 = vld [vmem:[%s5286_s3] ss:$0 sm:$0xff]  ;;  %s4549_s3 = smov 96   ;;  %v193_v13 = vld [vmem:[#allocation4 + $0x10] sm:$0xff] }
  0xaa   :  { %3979 = vmatpush3.bf16.msra.mxu1 %v4788_v15  ;;  %3949 = vmatpush3.bf16.msra.mxu0 %v3946_v10  ;;  %v194_v14 = vld [vmem:[#allocation4 + $0x18] sm:$0xff]  ;;  %p4508_p6 = pnand %p4507_p5, %p4501_p2 }
  0xab   :  { %3951 = vmatprep.subr.bf16.mxu0 %v3950_v16  ;;  %3980 = vmatprep.subr.bf16.mxu1 %v4545_v0 }
  0xad   :  { %3636 = vmatmul.mubr.f32.vlgmr.msra.gmra.mrb[0].mxu1 %v4547_v1 }
  0xae   :  { %3953 = vmatpush3.bf16.msra.mxu0 %v3950_v16  ;;  %3982 = vmatpush3.bf16.msra.mxu1 %v4785_v9 }
  0xaf   :  { %3955 = vmatprep.subr.bf16.mxu0 %v3954_v21  ;;  %3983 = vmatprep.subr.bf16.mxu1 %v4545_v0 }
  0xb0   :  { %3646 = vmatprep.mubr.msk.f32.mxu1 %vm4546_vm0, %v4547_v1 }
  0xb2   :  { %3957 = vmatpush3.bf16.msra.mxu0 %v3954_v21  ;;  %3985 = vmatpush3.bf16.msra.mxu1 %v4788_v15 }
  0xb3   :  { %3959 = vmatprep.subr.bf16.mxu0 %v3958_v24  ;;  %3986 = vmatprep.subr.bf16.mxu1 %v4545_v0 }
  0xb6   :  { %3961 = vmatpush3.bf16.msra.mxu0 %v3958_v24 }
  0xb7   :  { %3963 = vmatprep.subr.bf16.mxu0 %v3962_v27 }
  0xba   :  { %3965 = vmatpush3.bf16.msra.mxu0 %v3962_v27 }
  0xbb   :  { %3967 = vmatprep.subr.bf16.mxu0 %v3966_v30 }
  0xbe   :  { %3969 = vmatpush3.bf16.msra.mxu0 %v3966_v30 }
  0xbf   :  { %3971 = vmatprep.subr.bf16.mxu0 %v3970_v33 }
  0xc2   :  { %3973 = vmatpush3.bf16.msra.mxu0 %v3970_v33 }
  0xc3   :  { %4004 = vmatprep.subr.bf16.mxu0 %v4545_v0 }
  0xc5   :  { %3616 = vmatmul.mubr.f32.vlgmr.msra.gmra.mrb[0].mxu0 %v192_v34 }
  0xc6   :  { %4006 = vmatpush3.bf16.msra.mxu0 %v4785_v9  ;;  %3618 = vmatprep.mubr.f32.mxu0 %v193_v13 }
  0xc7   :  { %4007 = vmatprep.subr.bf16.mxu0 %v4545_v0 }
  0xc9   :  { %3619 = vmatmul.mubr.f32.gmra.mrb[2].mxu0 %v194_v14 }
  0xca   :  { %4009 = vmatpush3.bf16.msra.mxu0 %v4788_v15 }
  0xcb   :  { %4016 = vmatprep.subr.bf16.mxu0 %v4545_v0 }
 0x11a   :  { %v4809_v35 = vpop.permute.xlu0 %405 }
 0x180   :  { %v394_v36 = vpop.f32.mrb[0].mxu1 }
 0x181   :  { %v408_v37 = vadd.f32 %v4809_v35, %v394_v36  ;;  %v3637_v38 = vpop.f32.mrb[1].mxu1 }
 0x183   :  { %410 = vrot.lane.b32.xlu0 %v408_v37, %s4548_s16 }
 0x198   :  { %v3617_v39 = vpop.f32.mrb[0].mxu0 }
 0x199   :  { %v271_v40 = vpop.f32.mrb[1].mxu0  ;;  %v277_v62 = vadd.f32 %v3617_v39, %v4816_v41 }
 0x19a   :  { %v272_v42 = vadd.f32 %v4816_v41, %v271_v40 }
 0x19c   :  { %v398_v43 = vadd.f32 %v394_v36, %v272_v42  ;;  %v3620_v20 = vpop.f32.mrb[2].mxu0 }
 0x19d   :  { %v281_v21 = vpop.f32.mrb[3].mxu0 }
 0x19e   :  { %v3343_v44 = vmul.f32 -1.442695, %v398_v43  ;;  %v282_v26 = vadd.f32 %v4816_v41, %v281_v21 }
 0x1a0   :  { %4158 = vpow2.f32 %v3343_v44 }
 0x1aa   :  { %v4159_v45 = vpop.eup %4158 }
 0x1ab   :  { %v402_v46 = vadd.f32 1.0, %v4159_v45 }
 0x1ad   :  { %4160 = vrcp.f32 %v402_v46 }
 0x1b7   :  { %v4161_v47 = vpop.eup %4160 }
 0x1f5   :  { %v411_v48 = vpop.permute.xlu0 %410 }
 0x1f6   :  { %v413_v49 = vmul.f32 %v4161_v47, %v411_v48  ;;  %v287_v48 = vadd.f32 %v3620_v20, %v4816_v41 }
 0x1f8   :  { %415 = vrot.lane.b32.xlu1 %v413_v49, %s4548_s16 }
 0x26a   :  { %v416_v50 = vpop.permute.xlu1 %415 }
 0x26b   :  { %v418_v51 = vadd.f32 %v416_v50, %v272_v42 }
 0x26d   :  { %4162 = vtanh.f32 %v418_v51 }
 0x277   :  { %v4163_v52 = vpop.eup %4162 }
 0x278   :  { %v420_v53 = vsub.f32 0.0, %v4163_v52 }
 0x27a   :  { %422 = vrot.lane.b32.xlu1 %v420_v53, %s4549_s3 }
 0x2ec   :  { %v423_v54 = vpop.permute.xlu1 %422 }
 0x2ed   :  { %v425_v55 = vmul.f32 %v4161_v47, %v423_v54 }
 0x2ef   :  { %427 = vrot.lane.b32.xlu0 %v425_v55, %s4550_s0 }
 0x361   :  { %v428_v56 = vpop.permute.xlu0 %427 }
 0x362   :  { %v430_v57 = vadd.f32 %v4163_v52, %v428_v56 }
 0x364   :  { %432 = vrot.lane.b32.xlu1 %v430_v57, %s4548_s16 }
 0x3d6   :  { %v433_v58 = vpop.permute.xlu1 %432 }
 0x3d7   :  { %435 = vst.msk [vmem:[#allocation3] sm:$0xff] %vm324_vm1, %v433_v58  ;;  %3647 = vmatmul.mubr.msk.f32.vlgmr.msra.gmra.mrb[2].mxu1 %vm324_vm1, %v433_v58 }
 0x3d8   :  { %3988 = vmatpush3.bf16.msra.mxu1 %v4785_v9  ;;  %3657 = vmatprep.mubr.msk.f32.mxu1 %vm4546_vm0, %v4547_v1 }
 0x3d9   :  { %3989 = vmatprep.subr.bf16.mxu1 %v4545_v0 }
 0x3dc   :  { %3991 = vmatpush3.bf16.msra.mxu1 %v4788_v15 }
 0x3dd   :  { %3992 = vmatprep.subr.bf16.mxu1 %v4545_v0 }
 0x4aa   :  { %v505_v59 = vpop.f32.mrb[2].mxu1 }
 0x4ab   :  { %v516_v60 = vadd.f32 %v505_v59, %v4809_v35  ;;  %v3648_v61 = vpop.f32.mrb[3].mxu1  ;;  %v509_v63 = vadd.f32 %v505_v59, %v277_v62 }
 0x4ac   :  { %v196_v61 = vld [vmem:[#allocation4 + $0x28] sm:$0xff] }
 0x4ad   :  { %518 = vrot.lane.b32.xlu0 %v516_v60, %s4548_s16  ;;  %v3345_v2 = vmul.f32 -1.442695, %v509_v63  ;;  %v195_v60 = vld [vmem:[#allocation4 + $0x20] sm:$0xff] }
 0x4ae   :  { %3621 = vmatprep.mubr.f32.mxu0 %v195_v60 }
 0x4af   :  { %4164 = vpow2.f32 %v3345_v2  ;;  %3622 = vmatmul.mubr.f32.gmra.mrb[4].mxu0 %v196_v61 }
 0x4b9   :  { %v4165_v3 = vpop.eup %4164 }
 0x4ba   :  { %v513_v4 = vadd.f32 1.0, %v4165_v3 }
 0x4bc   :  { %4166 = vrcp.f32 %v513_v4 }
 0x4c6   :  { %v4167_v5 = vpop.eup %4166 }
 0x51f   :  { %v519_v6 = vpop.permute.xlu0 %518 }
 0x520   :  { %v521_v7 = vmul.f32 %v4167_v5, %v519_v6 }
 0x522   :  { %523 = vrot.lane.b32.xlu1 %v521_v7, %s4548_s16 }
 0x582   :  { %v3623_v4 = vpop.f32.mrb[4].mxu0 }
 0x594   :  { %v524_v8 = vpop.permute.xlu1 %523 }
 0x595   :  { %v526_v10 = vadd.f32 %v524_v8, %v277_v62 }
 0x597   :  { %4168 = vtanh.f32 %v526_v10 }
 0x5a1   :  { %v4169_v11 = vpop.eup %4168 }
 0x5a2   :  { %v528_v12 = vsub.f32 %v430_v57, %v4169_v11 }
 0x5a4   :  { %530 = vrot.lane.b32.xlu0 %v528_v12, %s4549_s3 }
 0x616   :  { %v531_v16 = vpop.permute.xlu0 %530 }
 0x617   :  { %v533_v17 = vmul.f32 %v4167_v5, %v531_v16  ;;  %v291_v5 = vpop.f32.mrb[5].mxu0 }
 0x619   :  { %535 = vrot.lane.b32.xlu1 %v533_v17, %s4550_s0 }
 0x68b   :  { %v536_v18 = vpop.permute.xlu1 %535 }
 0x68c   :  { %v538_v19 = vadd.f32 %v4169_v11, %v536_v18  ;;  %v292_v11 = vadd.f32 %v4816_v41, %v291_v5 }
 0x68e   :  { %540 = vrot.lane.b32.xlu0 %v538_v19, %s4548_s16 }
 0x700   :  { %v541_v22 = vpop.permute.xlu0 %540 }
 0x701   :  { %543 = vst.msk [vmem:[#allocation3 + $0x8] sm:$0xff] %vm324_vm1, %v541_v22  ;;  %3658 = vmatmul.mubr.msk.f32.vlgmr.msra.gmra.mrb[4].mxu1 %vm324_vm1, %v541_v22 }
 0x702   :  { %3994 = vmatpush3.bf16.msra.mxu1 %v4785_v9  ;;  %3668 = vmatprep.mubr.msk.f32.mxu1 %vm4546_vm0, %v4547_v1 }
 0x703   :  { %3995 = vmatprep.subr.bf16.mxu1 %v4545_v0 }
 0x706   :  { %3997 = vmatpush3.bf16.msra.mxu1 %v4788_v15 }
 0x707   :  { %3998 = vmatprep.subr.bf16.mxu1 %v4545_v0 }
 0x708   :  { %v1203_v60 = vld [vmem:[#allocation3 + $0x8] sm:$0xff] }
 0x7d4   :  { %v613_v23 = vpop.f32.mrb[4].mxu1 }
 0x7d5   :  { %v624_v24 = vadd.f32 %v613_v23, %v4809_v35  ;;  %v3659_v25 = vpop.f32.mrb[5].mxu1  ;;  %v617_v27 = vadd.f32 %v613_v23, %v282_v26 }
 0x7d6   :  { %v198_v25 = vld [vmem:[#allocation4 + $0x38] sm:$0xff] }
 0x7d7   :  { %626 = vrot.lane.b32.xlu1 %v624_v24, %s4548_s16  ;;  %v3347_v28 = vmul.f32 -1.442695, %v617_v27  ;;  %v197_v24 = vld [vmem:[#allocation4 + $0x30] sm:$0xff] }
 0x7d8   :  { %3624 = vmatprep.mubr.f32.mxu0 %v197_v24 }
 0x7d9   :  { %4170 = vpow2.f32 %v3347_v28  ;;  %3625 = vmatmul.mubr.f32.gmra.mrb[6].mxu0 %v198_v25 }
 0x7da   :  { %3690 = vmatprep.mubr.msk.f32.mxu0 %vm4546_vm0, %v4547_v1 }
 0x7e3   :  { %v4171_v29 = vpop.eup %4170 }
 0x7e4   :  { %v621_v30 = vadd.f32 1.0, %v4171_v29 }
 0x7e6   :  { %4172 = vrcp.f32 %v621_v30 }
 0x7f0   :  { %v4173_v31 = vpop.eup %4172 }
 0x849   :  { %v627_v32 = vpop.permute.xlu1 %626 }
 0x84a   :  { %v629_v33 = vmul.f32 %v4173_v31, %v627_v32 }
 0x84c   :  { %631 = vrot.lane.b32.xlu0 %v629_v33, %s4548_s16 }
 0x8ac   :  { %v4884_v30 = vpop.f32.mrb[6].mxu0 }
 0x8be   :  { %v632_v34 = vpop.permute.xlu0 %631 }
 0x8bf   :  { %v634_v36 = vadd.f32 %v632_v34, %v282_v26 }
 0x8c1   :  { %4174 = vtanh.f32 %v634_v36 }
 0x8cb   :  { %v4175_v37 = vpop.eup %4174 }
 0x8cc   :  { %v636_v38 = vsub.f32 %v538_v19, %v4175_v37 }
 0x8ce   :  { %638 = vrot.lane.b32.xlu1 %v636_v38, %s4549_s3 }
 0x940   :  { %v639_v39 = vpop.permute.xlu1 %638 }
 0x941   :  { %v641_v40 = vmul.f32 %v4173_v31, %v639_v39  ;;  %v4886_v31 = vpop.f32.mrb[7].mxu0 }
 0x943   :  { %643 = vrot.lane.b32.xlu0 %v641_v40, %s4550_s0 }
 0x9b5   :  { %v644_v42 = vpop.permute.xlu0 %643 }
 0x9b6   :  { %v646_v43 = vadd.f32 %v4175_v37, %v644_v42  ;;  %v297_v37 = vadd.f32 %v3623_v4, %v4816_v41 }
 0x9b8   :  { %648 = vrot.lane.b32.xlu1 %v646_v43, %s4548_s16 }
 0xa2a   :  { %v649_v44 = vpop.permute.xlu1 %648 }
 0xa2b   :  { %651 = vst.msk [vmem:[#allocation3 + $0x10] sm:$0xff] %vm324_vm1, %v649_v44  ;;  %3669 = vmatmul.mubr.msk.f32.vlgmr.msra.gmra.mrb[6].mxu1 %vm324_vm1, %v649_v44 }
 0xa2c   :  { %4000 = vmatpush3.bf16.msra.mxu1 %v4785_v9  ;;  %3679 = vmatprep.mubr.msk.f32.mxu1 %vm4546_vm0, %v4547_v1 }
 0xa2d   :  { %4001 = vmatprep.subr.bf16.mxu1 %v4545_v0 }
 0xa30   :  { %4003 = vmatpush3.bf16.msra.mxu1 %v4788_v15 }
 0xa31   :  { %4010 = vmatprep.subr.bf16.mxu1 %v4545_v0 }
 0xa32   :  { %v1204_v61 = vld [vmem:[#allocation3 + $0x10] sm:$0xff] }
 0xafe   :  { %v721_v45 = vpop.f32.mrb[6].mxu1 }
 0xaff   :  { %v732_v46 = vadd.f32 %v721_v45, %v4809_v35  ;;  %v3670_v47 = vpop.f32.mrb[7].mxu1  ;;  %v725_v49 = vadd.f32 %v721_v45, %v287_v48 }
 0xb01   :  { %734 = vrot.lane.b32.xlu0 %v732_v46, %s4548_s16  ;;  %v3349_v50 = vmul.f32 -1.442695, %v725_v49  ;;  %v1193_v49 = vld [vmem:[#allocation10 + $0x8] sm:$0xff] }
 0xb03   :  { %4176 = vpow2.f32 %v3349_v50 }
 0xb0d   :  { %v4177_v51 = vpop.eup %4176 }
 0xb0e   :  { %v729_v52 = vadd.f32 1.0, %v4177_v51 }
 0xb10   :  { %4178 = vrcp.f32 %v729_v52 }
 0xb1a   :  { %v4179_v53 = vpop.eup %4178 }
 0xb73   :  { %v735_v54 = vpop.permute.xlu0 %734 }
 0xb74   :  { %v737_v55 = vmul.f32 %v4179_v53, %v735_v54 }
 0xb76   :  { %739 = vrot.lane.b32.xlu1 %v737_v55, %s4548_s16  ;;  %v1194_v55 = vld [vmem:[#allocation10 + $0x10] sm:$0xff] }
 0xbe8   :  { %v740_v56 = vpop.permute.xlu1 %739 }
 0xbe9   :  { %v742_v57 = vadd.f32 %v740_v56, %v287_v48  ;;  %v1192_v48 = vld [vmem:[#allocation10] sm:$0xff]  ;;  %v1195_v56 = vld [vmem:[#allocation10 + $0x18] sm:$0xff] }
 0xbea   :  { %v4022_v50 = vpack.c.bf16 %v1193_v49, %v1192_v48 }
 0xbeb   :  { %4180 = vtanh.f32 %v742_v57  ;;  %v4026_v57 = vpack.c.bf16 %v1195_v56, %v1194_v55 }
 0xbf5   :  { %v4181_v58 = vpop.eup %4180 }
 0xbf6   :  { %v744_v59 = vsub.f32 %v646_v43, %v4181_v58 }
 0xbf8   :  { %746 = vrot.lane.b32.xlu0 %v744_v59, %s4549_s3  ;;  %v1202_v59 = vld [vmem:[#allocation3] sm:$0xff] }
 0xc6a   :  { %v747_v62 = vpop.permute.xlu0 %746 }
 0xc6b   :  { %v749_v63 = vmul.f32 %v4179_v53, %v747_v62 }
 0xc6d   :  { %751 = vrot.lane.b32.xlu1 %v749_v63, %s4550_s0 }
 0xcdf   :  { %v752_v2 = vpop.permute.xlu1 %751 }
 0xce0   :  { %v754_v3 = vadd.f32 %v4181_v58, %v752_v2 }
 0xce2   :  { %756 = vrot.lane.b32.xlu0 %v754_v3, %s4548_s16 }
 0xd54   :  { %v757_v6 = vpop.permute.xlu0 %756 }
 0xd55   :  { %759 = vst.msk [vmem:[#allocation3 + $0x18] sm:$0xff] %vm324_vm1, %v757_v6  ;;  %3680 = vmatmul.mubr.msk.f32.vlgmr.msra.gmra.mrb[8].mxu1 %vm324_vm1, %v757_v6 }
 0xd56   :  { %4012 = vmatpush3.bf16.msra.mxu1 %v4785_v9  ;;  %3701 = vmatprep.mubr.msk.f32.mxu1 %vm4546_vm0, %v4547_v1 }
 0xd57   :  { %4013 = vmatprep.subr.bf16.mxu1 %v4545_v0 }
 0xd5a   :  { %4015 = vmatpush3.bf16.msra.mxu1 %v4788_v15 }
 0xd5b   :  { %4023 = vmatprep.subr.bf16.mxu1 %v4022_v50 }
 0xd5c   :  { %v1205_v62 = vld [vmem:[#allocation3 + $0x18] sm:$0xff] }
 0xe28   :  { %v829_v7 = vpop.f32.mrb[8].mxu1 }
 0xe29   :  { %v840_v8 = vadd.f32 %v829_v7, %v4809_v35  ;;  %v3681_v10 = vpop.f32.mrb[9].mxu1  ;;  %v833_v12 = vadd.f32 %v829_v7, %v292_v11 }
 0xe2b   :  { %842 = vrot.lane.b32.xlu1 %v840_v8, %s4548_s16  ;;  %v3351_v13 = vmul.f32 -1.442695, %v833_v12 }
 0xe2d   :  { %4182 = vpow2.f32 %v3351_v13  ;;  %v302_v13 = vadd.f32 %v4816_v41, %v4886_v31 }
 0xe37   :  { %v4183_v14 = vpop.eup %4182 }
 0xe38   :  { %v837_v16 = vadd.f32 1.0, %v4183_v14 }
 0xe3a   :  { %4184 = vrcp.f32 %v837_v16 }
 0xe44   :  { %v4185_v17 = vpop.eup %4184 }
 0xe9d   :  { %v843_v18 = vpop.permute.xlu1 %842 }
 0xe9e   :  { %v845_v19 = vmul.f32 %v4185_v17, %v843_v18 }
 0xea0   :  { %847 = vrot.lane.b32.xlu0 %v845_v19, %s4548_s16 }
 0xf12   :  { %v848_v20 = vpop.permute.xlu0 %847 }
 0xf13   :  { %v850_v21 = vadd.f32 %v848_v20, %v292_v11 }
 0xf15   :  { %4186 = vtanh.f32 %v850_v21 }
 0xf1f   :  { %v4187_v22 = vpop.eup %4186 }
 0xf20   :  { %v852_v23 = vsub.f32 %v754_v3, %v4187_v22 }
 0xf22   :  { %854 = vrot.lane.b32.xlu1 %v852_v23, %s4549_s3 }
 0xf94   :  { %v855_v26 = vpop.permute.xlu1 %854 }
 0xf95   :  { %v857_v27 = vmul.f32 %v4185_v17, %v855_v26 }
 0xf97   :  { %859 = vrot.lane.b32.xlu0 %v857_v27, %s4550_s0 }
0x1009   :  { %v860_v28 = vpop.permute.xlu0 %859 }
0x100a   :  { %v862_v29 = vadd.f32 %v4187_v22, %v860_v28  ;;  %v1196_v28 = vld [vmem:[#allocation12] sm:$0xff] }
0x100c   :  { %864 = vrot.lane.b32.xlu1 %v862_v29, %s4548_s16 }
0x107e   :  { %v865_v32 = vpop.permute.xlu1 %864 }
0x107f   :  { %867 = vst.msk [vmem:[#allocation3 + $0x20] sm:$0xff] %vm324_vm1, %v865_v32  ;;  %3691 = vmatmul.mubr.msk.f32.vlgmr.msra.gmra.mrb[8].mxu0 %vm324_vm1, %v865_v32  ;;  %v1198_v32 = vld [vmem:[#allocation12 + $0x10] sm:$0xff] }
0x1080   :  { %4018 = vmatpush3.bf16.msra.mxu0 %v4785_v9  ;;  %3712 = vmatprep.mubr.msk.f32.mxu0 %vm4546_vm0, %v4547_v1 }
0x1081   :  { %4019 = vmatprep.subr.bf16.mxu0 %v4545_v0 }
0x1084   :  { %4021 = vmatpush3.bf16.msra.mxu0 %v4788_v15 }
0x1085   :  { %4030 = vmatprep.subr.bf16.mxu0 %v4545_v0 }
0x1086   :  { %v1206_v63 = vld [vmem:[#allocation3 + $0x20] sm:$0xff] }
0x1152   :  { %v937_v33 = vpop.f32.mrb[8].mxu0 }
0x1153   :  { %v948_v34 = vadd.f32 %v937_v33, %v4809_v35  ;;  %v3692_v36 = vpop.f32.mrb[9].mxu0  ;;  %v941_v38 = vadd.f32 %v937_v33, %v297_v37  ;;  %v1199_v33 = vld [vmem:[#allocation12 + $0x18] sm:$0xff] }
0x1154   :  { %v3367_v36 = vld [vmem:[#allocation15] ss:$0 sm:$0xff] }
0x1155   :  { %950 = vrot.lane.b32.xlu0 %v948_v34, %s4548_s16  ;;  %v3353_v39 = vmul.f32 -1.442695, %v941_v38  ;;  %v4935_v34 = vpack.c.bf16 %v1199_v33, %v1198_v32 }
0x1157   :  { %4188 = vpow2.f32 %v3353_v39 }
0x1161   :  { %v4189_v9 = vpop.eup %4188 }
0x1162   :  { %v945_v40 = vadd.f32 1.0, %v4189_v9 }
0x1164   :  { %4190 = vrcp.f32 %v945_v40 }
0x116e   :  { %v4191_v42 = vpop.eup %4190 }
0x11c7   :  { %v951_v43 = vpop.permute.xlu0 %950 }
0x11c8   :  { %v953_v44 = vmul.f32 %v4191_v42, %v951_v43 }
0x11ca   :  { %955 = vrot.lane.b32.xlu1 %v953_v44, %s4548_s16 }
0x123c   :  { %v956_v15 = vpop.permute.xlu1 %955 }
0x123d   :  { %v958_v45 = vadd.f32 %v956_v15, %v297_v37 }
0x123f   :  { %4192 = vtanh.f32 %v958_v45 }
0x1249   :  { %v4193_v46 = vpop.eup %4192 }
0x124a   :  { %v960_v47 = vsub.f32 %v862_v29, %v4193_v46  ;;  %v1197_v29 = vld [vmem:[#allocation12 + $0x8] sm:$0xff] }
0x124b   :  { %v4931_v31 = vpack.c.bf16 %v1197_v29, %v1196_v28 }
0x124c   :  { %962 = vrot.lane.b32.xlu0 %v960_v47, %s4549_s3 }
0x12be   :  { %v963_v51 = vpop.permute.xlu0 %962 }
0x12bf   :  { %v965_v52 = vmul.f32 %v4191_v42, %v963_v51 }
0x12c1   :  { %967 = vrot.lane.b32.xlu1 %v965_v52, %s4550_s0 }
0x1333   :  { %v968_v53 = vpop.permute.xlu1 %967 }
0x1334   :  { %v970_v54 = vadd.f32 %v4193_v46, %v968_v53  ;;  %v4964_v46 = vld [vmem:[#allocation13] ss:$0 sm:$0xff] }
0x1336   :  { %972 = vrot.lane.b32.xlu0 %v970_v54, %s4548_s16 }
0x13a8   :  { %v973_v58 = vpop.permute.xlu0 %972 }
0x13a9   :  { %975 = vst.msk [vmem:[#allocation3 + $0x28] sm:$0xff] %vm324_vm1, %v973_v58  ;;  %3702 = vmatmul.mubr.msk.f32.vlgmr.msra.gmra.mrb[10].mxu1 %vm324_vm1, %v973_v58 }
0x13aa   :  { %4025 = vmatpush3.bf16.msra.mxu1 %v4022_v50  ;;  %3723 = vmatprep.mubr.msk.f32.mxu1 %vm324_vm1, %v1202_v59 }
0x13ab   :  { %4027 = vmatprep.subr.bf16.mxu1 %v4026_v57 }
0x13ae   :  { %4029 = vmatpush3.bf16.msra.mxu1 %v4026_v57 }
0x13af   :  { %4042 = vmatprep.subr.bf16.mxu1 %v4545_v0 }
0x13b0   :  { %v1207_v2 = vld [vmem:[#allocation3 + $0x28] sm:$0xff] }
0x13b1   :  { %3724 = vmatmul.mubr.msk.f32.vlgmr.msra.gmra.mrb[12].mxu1 %vm324_vm1, %v1203_v60 }
0x13b2   :  { %3726 = vmatprep.mubr.msk.f32.mxu1 %vm324_vm1, %v1204_v61  ;;  %4044 = vmatpush3.bf16.msra.mxu1 %v4931_v31 }
0x13b3   :  { %4045 = vmatprep.subr.bf16.mxu1 %v4545_v0 }
0x13b5   :  { %3727 = vmatmul.mubr.msk.f32.gmra.mrb[14].mxu1 %vm324_vm1, %v1205_v62  ;;  %v307_v62 = vadd.f32 %v4884_v30, %v4816_v41 }
0x13b6   :  { %3729 = vmatprep.mubr.msk.f32.mxu1 %vm324_vm1, %v1206_v63  ;;  %4047 = vmatpush3.bf16.msra.mxu1 %v4935_v34 }
0x13b7   :  { %4054 = vmatprep.subr.bf16.mxu1 %v4545_v0 }
0x13b9   :  { %3730 = vmatmul.mubr.msk.f32.gmra.mrb[16].mxu1 %vm324_vm1, %v1207_v2 }
0x147c   :  { %v1045_v3 = vpop.f32.mrb[10].mxu1 }
0x147d   :  { %v1056_v4 = vadd.f32 %v1045_v3, %v4809_v35  ;;  %v3703_v5 = vpop.f32.mrb[11].mxu1  ;;  %v1049_v14 = vadd.f32 %v1045_v3, %v302_v13 }
0x147f   :  { %1058 = vrot.lane.b32.xlu1 %v1056_v4, %s4548_s16  ;;  %v3355_v16 = vmul.f32 -1.442695, %v1049_v14 }
0x1481   :  { %4194 = vpow2.f32 %v3355_v16 }
0x1484   :  { %v4914_v6 = vpop.f32.mrb[12].mxu1 }
0x1485   :  { %v4916_v7 = vpop.f32.mrb[13].mxu1 }
0x1486   :  { %v1307_v47 = vadd.f32 %v4964_v46, %v4916_v7 }
0x1488   :  { %v4918_v8 = vpop.f32.mrb[14].mxu1 }
0x1489   :  { %v4920_v10 = vpop.f32.mrb[15].mxu1 }
0x148b   :  { %v4195_v17 = vpop.eup %4194 }
0x148c   :  { %v4922_v11 = vpop.f32.mrb[16].mxu1  ;;  %v1053_v18 = vadd.f32 1.0, %v4195_v17 }
0x148d   :  { %v4924_v12 = vpop.f32.mrb[17].mxu1 }
0x148e   :  { %4196 = vrcp.f32 %v1053_v18 }
0x1498   :  { %v4197_v19 = vpop.eup %4196 }
0x14f1   :  { %v1059_v20 = vpop.permute.xlu1 %1058 }
0x14f2   :  { %v1061_v21 = vmul.f32 %v4197_v19, %v1059_v20 }
0x14f4   :  { %1063 = vrot.lane.b32.xlu0 %v1061_v21, %s4548_s16 }
0x1566   :  { %v1064_v22 = vpop.permute.xlu0 %1063 }
0x1567   :  { %v1066_v23 = vadd.f32 %v1064_v22, %v302_v13 }
0x1569   :  { %4198 = vtanh.f32 %v1066_v23 }
0x1573   :  { %v4199_v24 = vpop.eup %4198 }
0x1574   :  { %v1068_v25 = vsub.f32 %v970_v54, %v4199_v24 }
0x1576   :  { %1070 = vrot.lane.b32.xlu1 %v1068_v25, %s4549_s3 }
0x15e8   :  { %v1071_v26 = vpop.permute.xlu1 %1070 }
0x15e9   :  { %v1073_v27 = vmul.f32 %v4197_v19, %v1071_v26  ;;  %v1312_v26 = vadd.f32 %v4914_v6, %v4964_v46 }
0x15eb   :  { %1075 = vrot.lane.b32.xlu0 %v1073_v27, %s4550_s0 }
0x15ef   :  { %1436 = vrot.lane.b32.xlu0 %v3367_v36, %s4548_s16 }
0x165d   :  { %v1076_v37 = vpop.permute.xlu0 %1075 }
0x165e   :  { %v4940_v38 = vadd.f32 %v4199_v24, %v1076_v37 }
0x1660   :  { %1080 = vrot.lane.b32.xlu1 %v4940_v38, %s4548_s16 }
0x1661   :  { %v4960_v43 = vpop.permute.xlu0 %1436 }
0x16d2   :  { %v1081_v39 = vpop.permute.xlu1 %1080 }
0x16d3   :  { %1083 = vst.msk [vmem:[#allocation3 + $0x30] sm:$0xff] %vm324_vm1, %v1081_v39  ;;  %3713 = vmatmul.mubr.msk.f32.vlgmr.msra.gmra.mrb[10].mxu0 %vm324_vm1, %v1081_v39 }
0x16d4   :  { %4032 = vmatpush3.bf16.msra.mxu0 %v4931_v31  ;;  %3743 = vmatprep.mubr.msk.f32.mxu0 %vm4546_vm0, %v4547_v1 }
0x16d5   :  { %4033 = vmatprep.subr.bf16.mxu0 %v4545_v0 }
0x16d8   :  { %4035 = vmatpush3.bf16.msra.mxu0 %v4935_v34 }
0x16d9   :  { %4036 = vmatprep.subr.bf16.mxu0 %v4545_v0 }
0x16da   :  { %v1208_v9 = vld [vmem:[#allocation3 + $0x30] sm:$0xff] }
0x16db   :  { %3744 = vmatmul.mubr.f32.vlgmr.msra.gmra.mrb[12].mxu0 %v4547_v1  ;;  %3732 = vmatprep.mubr.msk.f32.mxu1 %vm324_vm1, %v1208_v9 }
0x16dc   :  { %4038 = vmatpush3.bf16.msra.mxu0 %v4931_v31  ;;  %3754 = vmatprep.mubr.msk.f32.mxu0 %vm4546_vm0, %v4547_v1 }
0x16dd   :  { %4039 = vmatprep.subr.bf16.mxu0 %v4545_v0 }
0x16e0   :  { %4041 = vmatpush3.bf16.msra.mxu0 %v4935_v34 }
0x16e1   :  { %4048 = vmatprep.subr.bf16.mxu0 %v4545_v0 }
0x17a6   :  { %v1153_v40 = vpop.f32.mrb[10].mxu0 }
0x17a7   :  { %v3714_v42 = vpop.f32.mrb[11].mxu0  ;;  %v1164_v61 = vadd.f32 %v1153_v40, %v4809_v35  ;;  %v1157_v63 = vadd.f32 %v1153_v40, %v307_v62 }
0x17a9   :  { %v3357_v2 = vmul.f32 -1.442695, %v1157_v63 }
0x17ae   :  { %v1425_v44 = vpop.f32.mrb[12].mxu0 }
0x17af   :  { %v3745_v15 = vpop.f32.mrb[13].mxu0  ;;  %v1439_v45 = vadd.f32 %v4960_v43, %v1425_v44  ;;  %v1429_v48 = vadd.f32 %v1425_v44, %v1307_v47 }
0x17b1   :  { %1441 = vrot.lane.b32.xlu1 %v1439_v45, %s4548_s16  ;;  %v3368_v49 = vmul.f32 -1.442695, %v1429_v48 }
0x17b3   :  { %4200 = vpow2.f32 %v3368_v49 }
0x17bd   :  { %v4201_v50 = vpop.eup %4200 }
0x17be   :  { %v1433_v51 = vadd.f32 1.0, %v4201_v50 }
0x17c0   :  { %4202 = vrcp.f32 %v1433_v51 }
0x17ca   :  { %v4203_v52 = vpop.eup %4202 }
0x1823   :  { %v1442_v53 = vpop.permute.xlu1 %1441 }
0x1824   :  { %v1444_v54 = vmul.f32 %v4203_v52, %v1442_v53 }
0x1826   :  { %1446 = vrot.lane.b32.xlu0 %v1444_v54, %s4548_s16  ;;  %v1317_v54 = vadd.f32 %v4964_v46, %v4920_v10 }
0x1898   :  { %v1447_v55 = vpop.permute.xlu0 %1446 }
0x1899   :  { %v1449_v56 = vadd.f32 %v1447_v55, %v1307_v47 }
0x189b   :  { %4204 = vtanh.f32 %v1449_v56 }
0x189c   :  { %4206 = vpow2.f32 %v3357_v2 }
0x18a5   :  { %v4205_v57 = vpop.eup %4204 }
0x18a6   :  { %v1451_v58 = vsub.f32 0.0, %v4205_v57  ;;  %v4207_v3 = vpop.eup %4206 }
0x18a7   :  { %v1161_v4 = vadd.f32 1.0, %v4207_v3 }
0x18a8   :  { %1453 = vrot.lane.b32.xlu1 %v1451_v58, %s4549_s3 }
0x18a9   :  { %4208 = vrcp.f32 %v1161_v4 }
0x18b3   :  { %v4209_v13 = vpop.eup %4208 }
0x191a   :  { %v1454_v59 = vpop.permute.xlu1 %1453 }
0x191b   :  { %v1456_v60 = vmul.f32 %v4203_v52, %v1454_v59 }
0x191d   :  { %1458 = vrot.lane.b32.xlu0 %v1456_v60, %s4550_s0 }
0x1921   :  { %1166 = vrot.lane.b32.xlu0 %v1164_v61, %s4548_s16 }
0x198f   :  { %v1459_v5 = vpop.permute.xlu0 %1458 }
0x1990   :  { %v1461_v7 = vadd.f32 %v4205_v57, %v1459_v5 }
0x1992   :  { %1463 = vrot.lane.b32.xlu1 %v1461_v7, %s4548_s16 }
0x1993   :  { %v1167_v14 = vpop.permute.xlu0 %1166 }
0x1994   :  { %v1169_v16 = vmul.f32 %v4209_v13, %v1167_v14 }
0x1996   :  { %1171 = vrot.lane.b32.xlu0 %v1169_v16, %s4548_s16 }
0x1a04   :  { %v1464_v35 = vpop.permute.xlu1 %1463 }
0x1a05   :  { %1466 = vst.msk [vmem:[#allocation3] sm:$0xff] %vm324_vm1, %v1464_v35  ;;  %3755 = vmatmul.mubr.msk.f32.vlgmr.msra.gmra.mrb[14].mxu0 %vm324_vm1, %v1464_v35 }
0x1a06   :  { %4050 = vmatpush3.bf16.msra.mxu0 %v4931_v31  ;;  %3776 = vmatprep.mubr.msk.f32.mxu0 %vm4546_vm0, %v4547_v1 }
0x1a07   :  { %4051 = vmatprep.subr.bf16.mxu0 %v4545_v0 }
0x1a08   :  { %v1172_v41 = vpop.permute.xlu0 %1171 }
0x1a09   :  { %v1174_v30 = vadd.f32 %v1172_v41, %v307_v62  ;;  %v1322_v41 = vadd.f32 %v4918_v8, %v4964_v46 }
0x1a0a   :  { %4053 = vmatpush3.bf16.msra.mxu0 %v4935_v34 }
0x1a0b   :  { %4210 = vtanh.f32 %v1174_v30  ;;  %4060 = vmatprep.subr.bf16.mxu0 %v4545_v0 }
0x1a15   :  { %v4211_v17 = vpop.eup %4210 }
0x1a16   :  { %v1176_v18 = vsub.f32 %v4940_v38, %v4211_v17 }
0x1a18   :  { %1178 = vrot.lane.b32.xlu0 %v1176_v18, %s4549_s3 }
0x1a8a   :  { %v1179_v19 = vpop.permute.xlu0 %1178 }
0x1a8b   :  { %v1181_v20 = vmul.f32 %v4209_v13, %v1179_v19 }
0x1a8d   :  { %1183 = vrot.lane.b32.xlu0 %v1181_v20, %s4550_s0 }
0x1ad8   :  { %v1536_v21 = vpop.f32.mrb[14].mxu0 }
0x1ad9   :  { %v1547_v22 = vadd.f32 %v1536_v21, %v4960_v43  ;;  %v3756_v23 = vpop.f32.mrb[15].mxu0  ;;  %v1540_v27 = vadd.f32 %v1536_v21, %v1312_v26 }
0x1adb   :  { %1549 = vrot.lane.b32.xlu1 %v1547_v22, %s4548_s16  ;;  %v3370_v28 = vmul.f32 -1.442695, %v1540_v27 }
0x1add   :  { %4212 = vpow2.f32 %v3370_v28 }
0x1ae7   :  { %v4213_v29 = vpop.eup %4212 }
0x1ae8   :  { %v1544_v32 = vadd.f32 1.0, %v4213_v29 }
0x1aea   :  { %4214 = vrcp.f32 %v1544_v32 }
0x1af4   :  { %v4215_v33 = vpop.eup %4214 }
0x1aff   :  { %v1184_v24 = vpop.permute.xlu0 %1183 }
0x1b00   :  { %v1186_v25 = vadd.f32 %v4211_v17, %v1184_v24 }
0x1b02   :  { %1188 = vrot.lane.b32.xlu0 %v1186_v25, %s4548_s16 }
0x1b4d   :  { %v1550_v36 = vpop.permute.xlu1 %1549 }
0x1b4e   :  { %v1552_v37 = vmul.f32 %v4215_v33, %v1550_v36 }
0x1b50   :  { %1554 = vrot.lane.b32.xlu1 %v1552_v37, %s4548_s16 }
0x1b74   :  { %v1189_v38 = vpop.permute.xlu0 %1188 }
0x1b75   :  { %1191 = vst.msk [vmem:[#allocation3 + $0x38] sm:$0xff] %vm324_vm1, %v1189_v38  ;;  %v1327_v38 = vadd.f32 %v4964_v46, %v4924_v12 }
0x1b7c   :  { %v1209_v39 = vld [vmem:[#allocation3 + $0x38] sm:$0xff] }
0x1b7d   :  { %3733 = vmatmul.mubr.msk.f32.gmra.mrb[18].mxu1 %vm324_vm1, %v1209_v39 }
0x1b7e   :  { %3765 = vmatprep.mubr.msk.f32.mxu1 %vm4546_vm0, %v4547_v1 }
0x1bc2   :  { %v1555_v6 = vpop.permute.xlu1 %1554 }
0x1bc3   :  { %v1557_v9 = vadd.f32 %v1555_v6, %v1312_v26 }
0x1bc5   :  { %4216 = vtanh.f32 %v1557_v9 }
0x1bcf   :  { %v4217_v40 = vpop.eup %4216 }
0x1bd0   :  { %v1559_v42 = vsub.f32 %v1461_v7, %v4217_v40 }
0x1bd2   :  { %1561 = vrot.lane.b32.xlu1 %v1559_v42, %s4549_s3 }
0x1c44   :  { %v1562_v44 = vpop.permute.xlu1 %1561 }
0x1c45   :  { %v1564_v15 = vmul.f32 %v4215_v33, %v1562_v44 }
0x1c47   :  { %1566 = vrot.lane.b32.xlu1 %v1564_v15, %s4550_s0 }
0x1c50   :  { %v5000_v45 = vpop.f32.mrb[18].mxu1 }
0x1c51   :  { %v5002_v47 = vpop.f32.mrb[19].mxu1 }
0x1cb9   :  { %v1567_v48 = vpop.permute.xlu1 %1566 }
0x1cba   :  { %v1569_v49 = vadd.f32 %v4217_v40, %v1567_v48 }
0x1cbc   :  { %1571 = vrot.lane.b32.xlu1 %v1569_v49, %s4548_s16 }
0x1d2e   :  { %v1572_v50 = vpop.permute.xlu1 %1571 }
0x1d2f   :  { %1574 = vst.msk [vmem:[#allocation3 + $0x8] sm:$0xff] %vm324_vm1, %v1572_v50  ;;  %3766 = vmatmul.mubr.msk.f32.vlgmr.msra.gmra.mrb[20].mxu1 %vm324_vm1, %v1572_v50 }
0x1d30   :  { %4056 = vmatpush3.bf16.msra.mxu1 %v4931_v31  ;;  %3787 = vmatprep.mubr.msk.f32.mxu1 %vm4546_vm0, %v4547_v1 }
0x1d31   :  { %4057 = vmatprep.subr.bf16.mxu1 %v4545_v0 }
0x1d34   :  { %4059 = vmatpush3.bf16.msra.mxu1 %v4935_v34 }
0x1d35   :  { %4066 = vmatprep.subr.bf16.mxu1 %v4545_v0 }
0x1e02   :  { %v1644_v51 = vpop.f32.mrb[20].mxu1 }
0x1e03   :  { %v1655_v52 = vadd.f32 %v1644_v51, %v4960_v43  ;;  %v3767_v53 = vpop.f32.mrb[21].mxu1  ;;  %v1648_v55 = vadd.f32 %v1644_v51, %v1317_v54 }
0x1e05   :  { %1657 = vrot.lane.b32.xlu0 %v1655_v52, %s4548_s16  ;;  %v3372_v56 = vmul.f32 -1.442695, %v1648_v55 }
0x1e07   :  { %4218 = vpow2.f32 %v3372_v56 }
0x1e11   :  { %v4219_v57 = vpop.eup %4218 }
0x1e12   :  { %v1652_v58 = vadd.f32 1.0, %v4219_v57 }
0x1e14   :  { %4220 = vrcp.f32 %v1652_v58 }
0x1e1e   :  { %v4221_v59 = vpop.eup %4220 }
0x1e77   :  { %v1658_v60 = vpop.permute.xlu0 %1657 }
0x1e78   :  { %v1660_v61 = vmul.f32 %v4221_v59, %v1658_v60 }
0x1e7a   :  { %1662 = vrot.lane.b32.xlu1 %v1660_v61, %s4548_s16 }
0x1eec   :  { %v1663_v62 = vpop.permute.xlu1 %1662 }
0x1eed   :  { %v1665_v63 = vadd.f32 %v1663_v62, %v1317_v54 }
0x1eef   :  { %4222 = vtanh.f32 %v1665_v63 }
0x1ef9   :  { %v4223_v2 = vpop.eup %4222 }
0x1efa   :  { %v1667_v3 = vsub.f32 %v1569_v49, %v4223_v2 }
0x1efc   :  { %1669 = vrot.lane.b32.xlu0 %v1667_v3, %s4549_s3 }
0x1f6e   :  { %v1670_v4 = vpop.permute.xlu0 %1669 }
0x1f6f   :  { %v1672_v10 = vmul.f32 %v4221_v59, %v1670_v4  ;;  %v1332_v59 = vadd.f32 %v4922_v11, %v4964_v46  ;;  %v2223_v11 = vld [vmem:[%s5292_s9] sm:$0xff] }
0x1f71   :  { %1674 = vrot.lane.b32.xlu1 %v1672_v10, %s4550_s0 }
0x1fe3   :  { %v1675_v5 = vpop.permute.xlu1 %1674 }
0x1fe4   :  { %v1677_v7 = vadd.f32 %v4223_v2, %v1675_v5 }
0x1fe6   :  { %1679 = vrot.lane.b32.xlu0 %v1677_v7, %s4548_s16 }
0x2058   :  { %v1680_v13 = vpop.permute.xlu0 %1679 }
0x2059   :  { %1682 = vst.msk [vmem:[#allocation3 + $0x10] sm:$0xff] %vm324_vm1, %v1680_v13  ;;  %3777 = vmatmul.mubr.msk.f32.vlgmr.msra.gmra.mrb[16].mxu0 %vm324_vm1, %v1680_v13 }
0x205a   :  { %4062 = vmatpush3.bf16.msra.mxu0 %v4931_v31  ;;  %3798 = vmatprep.mubr.msk.f32.mxu0 %vm4546_vm0, %v4547_v1 }
0x205b   :  { %4063 = vmatprep.subr.bf16.mxu0 %v4545_v0 }
0x205e   :  { %4065 = vmatpush3.bf16.msra.mxu0 %v4935_v34 }
0x205f   :  { %4072 = vmatprep.subr.bf16.mxu0 %v4545_v0 }
0x212c   :  { %v1752_v14 = vpop.f32.mrb[16].mxu0 }
0x212d   :  { %v1763_v16 = vadd.f32 %v1752_v14, %v4960_v43  ;;  %v3778_v35 = vpop.f32.mrb[17].mxu0  ;;  %v1756_v30 = vadd.f32 %v1752_v14, %v1322_v41 }
0x212f   :  { %1765 = vrot.lane.b32.xlu1 %v1763_v16, %s4548_s16  ;;  %v3374_v17 = vmul.f32 -1.442695, %v1756_v30  ;;  %v2225_v30 = vld [vmem:[%s5292_s9 + $0x10] sm:$0xff] }
0x2131   :  { %4224 = vpow2.f32 %v3374_v17  ;;  %v2226_v17 = vld [vmem:[%s5292_s9 + $0x18] sm:$0xff] }
0x213b   :  { %v4225_v18 = vpop.eup %4224 }
0x213c   :  { %v1760_v19 = vadd.f32 1.0, %v4225_v18  ;;  %v4082_v18 = vpack.c.bf16 %v2226_v17, %v2225_v30 }
0x213e   :  { %4226 = vrcp.f32 %v1760_v19 }
0x2148   :  { %v4227_v20 = vpop.eup %4226 }
0x21a1   :  { %v1766_v21 = vpop.permute.xlu1 %1765 }
0x21a2   :  { %v1768_v22 = vmul.f32 %v4227_v20, %v1766_v21  ;;  %v2234_v21 = vld [vmem:[#allocation3 + $0x8] sm:$0xff] }
0x21a4   :  { %1770 = vrot.lane.b32.xlu0 %v1768_v22, %s4548_s16  ;;  %v2235_v22 = vld [vmem:[#allocation3 + $0x10] sm:$0xff] }
0x2216   :  { %v1771_v23 = vpop.permute.xlu0 %1770 }
0x2217   :  { %v1773_v24 = vadd.f32 %v1771_v23, %v1322_v41 }
0x2219   :  { %4228 = vtanh.f32 %v1773_v24 }
0x2223   :  { %v4229_v25 = vpop.eup %4228 }
0x2224   :  { %v1775_v26 = vsub.f32 %v1677_v7, %v4229_v25  ;;  %v2224_v7 = vld [vmem:[%s5292_s9 + $0x8] sm:$0xff] }
0x2225   :  { %v4078_v13 = vpack.c.bf16 %v2224_v7, %v2223_v11 }
0x2226   :  { %1777 = vrot.lane.b32.xlu1 %v1775_v26, %s4549_s3 }
0x2298   :  { %v1778_v27 = vpop.permute.xlu1 %1777 }
0x2299   :  { %v1780_v8 = vmul.f32 %v4227_v20, %v1778_v27  ;;  %v2233_v20 = vld [vmem:[#allocation3] sm:$0xff] }
0x229b   :  { %1782 = vrot.lane.b32.xlu0 %v1780_v8, %s4550_s0 }
0x230d   :  { %v1783_v28 = vpop.permute.xlu0 %1782 }
0x230e   :  { %v1785_v29 = vadd.f32 %v4229_v25, %v1783_v28 }
0x2310   :  { %1787 = vrot.lane.b32.xlu1 %v1785_v29, %s4548_s16 }
0x2382   :  { %v1788_v32 = vpop.permute.xlu1 %1787 }
0x2383   :  { %1790 = vst.msk [vmem:[#allocation3 + $0x18] sm:$0xff] %vm324_vm1, %v1788_v32  ;;  %3788 = vmatmul.mubr.msk.f32.vlgmr.msra.gmra.mrb[22].mxu1 %vm324_vm1, %v1788_v32 }
0x2384   :  { %4068 = vmatpush3.bf16.msra.mxu1 %v4931_v31  ;;  %3809 = vmatprep.mubr.msk.f32.mxu1 %vm4546_vm0, %v4547_v1 }
0x2385   :  { %4069 = vmatprep.subr.bf16.mxu1 %v4545_v0 }
0x2388   :  { %4071 = vmatpush3.bf16.msra.mxu1 %v4935_v34 }
0x2389   :  { %4079 = vmatprep.subr.bf16.mxu1 %v4078_v13 }
0x238a   :  { %v2236_v23 = vld [vmem:[#allocation3 + $0x18] sm:$0xff] }
0x2456   :  { %v1860_v33 = vpop.f32.mrb[22].mxu1 }
0x2457   :  { %v1871_v36 = vadd.f32 %v1860_v33, %v4960_v43  ;;  %v3789_v37 = vpop.f32.mrb[23].mxu1  ;;  %v1864_v39 = vadd.f32 %v1860_v33, %v1327_v38 }
0x2459   :  { %1873 = vrot.lane.b32.xlu0 %v1871_v36, %s4548_s16  ;;  %v3376_v6 = vmul.f32 -1.442695, %v1864_v39 }
0x245b   :  { %4230 = vpow2.f32 %v3376_v6 }
0x2465   :  { %v4231_v9 = vpop.eup %4230 }
0x2466   :  { %v1868_v40 = vadd.f32 1.0, %v4231_v9 }
0x2468   :  { %4232 = vrcp.f32 %v1868_v40 }
0x2472   :  { %v4233_v42 = vpop.eup %4232 }
0x24cb   :  { %v1874_v44 = vpop.permute.xlu0 %1873 }
0x24cc   :  { %v1876_v15 = vmul.f32 %v4233_v42, %v1874_v44 }
0x24ce   :  { %1878 = vrot.lane.b32.xlu1 %v1876_v15, %s4548_s16 }
0x2540   :  { %v1879_v48 = vpop.permute.xlu1 %1878 }
0x2541   :  { %v1881_v49 = vadd.f32 %v1879_v48, %v1327_v38  ;;  %v1337_v38 = vadd.f32 %v4964_v46, %v5002_v47 }
0x2543   :  { %4234 = vtanh.f32 %v1881_v49 }
0x254d   :  { %v4235_v50 = vpop.eup %4234 }
0x254e   :  { %v1883_v51 = vsub.f32 %v1785_v29, %v4235_v50 }
0x2550   :  { %1885 = vrot.lane.b32.xlu0 %v1883_v51, %s4549_s3 }
0x25c2   :  { %v1886_v52 = vpop.permute.xlu0 %1885 }
0x25c3   :  { %v1888_v12 = vmul.f32 %v4233_v42, %v1886_v52 }
0x25c5   :  { %1890 = vrot.lane.b32.xlu1 %v1888_v12, %s4550_s0  ;;  %v2227_v12 = vld [vmem:[#allocation16] sm:$0xff] }
0x2637   :  { %v1891_v53 = vpop.permute.xlu1 %1890 }
0x2638   :  { %v1893_v54 = vadd.f32 %v4235_v50, %v1891_v53  ;;  %v2228_v53 = vld [vmem:[#allocation16 + $0x8] sm:$0xff] }
0x263a   :  { %1895 = vrot.lane.b32.xlu0 %v1893_v54, %s4548_s16 }
0x26ac   :  { %v1896_v55 = vpop.permute.xlu0 %1895 }
0x26ad   :  { %1898 = vst.msk [vmem:[#allocation3 + $0x20] sm:$0xff] %vm324_vm1, %v1896_v55  ;;  %3799 = vmatmul.mubr.msk.f32.vlgmr.msra.gmra.mrb[18].mxu0 %vm324_vm1, %v1896_v55  ;;  %v2229_v55 = vld [vmem:[#allocation16 + $0x10] sm:$0xff] }
0x26ae   :  { %4074 = vmatpush3.bf16.msra.mxu0 %v4931_v31  ;;  %3820 = vmatprep.mubr.msk.f32.mxu0 %vm4546_vm0, %v4547_v1 }
0x26af   :  { %4075 = vmatprep.subr.bf16.mxu0 %v4545_v0 }
0x26b2   :  { %4077 = vmatpush3.bf16.msra.mxu0 %v4935_v34 }
0x26b3   :  { %4086 = vmatprep.subr.bf16.mxu0 %v4545_v0 }
0x26b4   :  { %v2237_v24 = vld [vmem:[#allocation3 + $0x20] sm:$0xff] }
0x2780   :  { %v1968_v56 = vpop.f32.mrb[18].mxu0 }
0x2781   :  { %v1979_v57 = vadd.f32 %v1968_v56, %v4960_v43  ;;  %v3800_v58 = vpop.f32.mrb[19].mxu0  ;;  %v1972_v60 = vadd.f32 %v1968_v56, %v1332_v59  ;;  %v2230_v56 = vld [vmem:[#allocation16 + $0x18] sm:$0xff] }
0x2782   :  { %v3392_v58 = vld [vmem:[%s5295_s12] ss:$0 sm:$0xff] }
0x2783   :  { %1981 = vrot.lane.b32.xlu1 %v1979_v57, %s4548_s16  ;;  %v3378_v31 = vmul.f32 -1.442695, %v1972_v60  ;;  %v5112_v57 = vpack.c.bf16 %v2230_v56, %v2229_v55 }
0x2785   :  { %4236 = vpow2.f32 %v3378_v31 }
0x278f   :  { %v4237_v61 = vpop.eup %4236 }
0x2790   :  { %v1976_v62 = vadd.f32 1.0, %v4237_v61 }
0x2792   :  { %4238 = vrcp.f32 %v1976_v62 }
0x279c   :  { %v4239_v63 = vpop.eup %4238 }
0x27f5   :  { %v1982_v2 = vpop.permute.xlu1 %1981 }
0x27f6   :  { %v1984_v34 = vmul.f32 %v4239_v63, %v1982_v2 }
0x27f8   :  { %1986 = vrot.lane.b32.xlu0 %v1984_v34, %s4548_s16 }
0x286a   :  { %v1987_v3 = vpop.permute.xlu0 %1986 }
0x286b   :  { %v1989_v4 = vadd.f32 %v1987_v3, %v1332_v59 }
0x286d   :  { %4240 = vtanh.f32 %v1989_v4 }
0x2877   :  { %v4241_v10 = vpop.eup %4240 }
0x2878   :  { %v1991_v5 = vsub.f32 %v1893_v54, %v4241_v10  ;;  %v5108_v54 = vpack.c.bf16 %v2228_v53, %v2227_v12 }
0x287a   :  { %1993 = vrot.lane.b32.xlu1 %v1991_v5, %s4549_s3 }
0x28ec   :  { %v1994_v14 = vpop.permute.xlu1 %1993 }
0x28ed   :  { %v1996_v16 = vmul.f32 %v4239_v63, %v1994_v14 }
0x28ef   :  { %1998 = vrot.lane.b32.xlu0 %v1996_v16, %s4550_s0 }
0x2961   :  { %v1999_v35 = vpop.permute.xlu0 %1998 }
0x2962   :  { %v2001_v41 = vadd.f32 %v4241_v10, %v1999_v35  ;;  %v5147_v10 = vld [vmem:[%s5294_s11] ss:$0 sm:$0xff] }
0x2964   :  { %2003 = vrot.lane.b32.xlu1 %v2001_v41, %s4548_s16 }
0x29d6   :  { %v2004_v19 = vpop.permute.xlu1 %2003 }
0x29d7   :  { %2006 = vst.msk [vmem:[#allocation3 + $0x28] sm:$0xff] %vm324_vm1, %v2004_v19  ;;  %3810 = vmatmul.mubr.msk.f32.vlgmr.msra.gmra.mrb[24].mxu1 %vm324_vm1, %v2004_v19 }
0x29d8   :  { %4081 = vmatpush3.bf16.msra.mxu1 %v4078_v13  ;;  %3831 = vmatprep.mubr.msk.f32.mxu1 %vm324_vm1, %v2233_v20 }
0x29d9   :  { %4083 = vmatprep.subr.bf16.mxu1 %v4082_v18 }
0x29dc   :  { %4085 = vmatpush3.bf16.msra.mxu1 %v4082_v18 }
0x29dd   :  { %4098 = vmatprep.subr.bf16.mxu1 %v4545_v0 }
0x29de   :  { %v2238_v25 = vld [vmem:[#allocation3 + $0x28] sm:$0xff] }
0x29df   :  { %3832 = vmatmul.mubr.msk.f32.vlgmr.msra.gmra.mrb[26].mxu1 %vm324_vm1, %v2234_v21 }
0x29e0   :  { %3834 = vmatprep.mubr.msk.f32.mxu1 %vm324_vm1, %v2235_v22  ;;  %4100 = vmatpush3.bf16.msra.mxu1 %v5108_v54 }
0x29e1   :  { %4101 = vmatprep.subr.bf16.mxu1 %v4545_v0 }
0x29e3   :  { %3835 = vmatmul.mubr.msk.f32.gmra.mrb[28].mxu1 %vm324_vm1, %v2236_v23  ;;  %v1342_v23 = vadd.f32 %v5000_v45, %v4964_v46 }
0x29e4   :  { %3837 = vmatprep.mubr.msk.f32.mxu1 %vm324_vm1, %v2237_v24  ;;  %4103 = vmatpush3.bf16.msra.mxu1 %v5112_v57 }
0x29e5   :  { %4110 = vmatprep.subr.bf16.mxu1 %v4545_v0 }
0x29e7   :  { %3838 = vmatmul.mubr.msk.f32.gmra.mrb[30].mxu1 %vm324_vm1, %v2238_v25 }
0x2aaa   :  { %v2076_v26 = vpop.f32.mrb[24].mxu1 }
0x2aab   :  { %v2087_v27 = vadd.f32 %v2076_v26, %v4960_v43  ;;  %v3811_v8 = vpop.f32.mrb[25].mxu1  ;;  %v2080_v39 = vadd.f32 %v2076_v26, %v1337_v38 }
0x2aad   :  { %2089 = vrot.lane.b32.xlu0 %v2087_v27, %s4548_s16  ;;  %v3380_v6 = vmul.f32 -1.442695, %v2080_v39 }
0x2aaf   :  { %4242 = vpow2.f32 %v3380_v6 }
0x2ab2   :  { %v5091_v28 = vpop.f32.mrb[26].mxu1 }
0x2ab3   :  { %v5093_v29 = vpop.f32.mrb[27].mxu1 }
0x2ab4   :  { %v2338_v5 = vadd.f32 %v5147_v10, %v5093_v29 }
0x2ab6   :  { %v5095_v32 = vpop.f32.mrb[28].mxu1 }
0x2ab7   :  { %v5097_v33 = vpop.f32.mrb[29].mxu1 }
0x2ab9   :  { %v4243_v9 = vpop.eup %4242 }
0x2aba   :  { %v5099_v36 = vpop.f32.mrb[30].mxu1  ;;  %v2084_v40 = vadd.f32 1.0, %v4243_v9 }
0x2abb   :  { %v5101_v37 = vpop.f32.mrb[31].mxu1 }
0x2abc   :  { %4244 = vrcp.f32 %v2084_v40 }
0x2ac6   :  { %v4245_v42 = vpop.eup %4244 }
0x2b1f   :  { %v2090_v44 = vpop.permute.xlu0 %2089 }
0x2b20   :  { %v2092_v15 = vmul.f32 %v4245_v42, %v2090_v44 }
0x2b22   :  { %2094 = vrot.lane.b32.xlu1 %v2092_v15, %s4548_s16 }
0x2b94   :  { %v2095_v48 = vpop.permute.xlu1 %2094 }
0x2b95   :  { %v2097_v49 = vadd.f32 %v2095_v48, %v1337_v38 }
0x2b97   :  { %4246 = vtanh.f32 %v2097_v49 }
0x2ba1   :  { %v4247_v50 = vpop.eup %4246 }
0x2ba2   :  { %v2099_v51 = vsub.f32 %v2001_v41, %v4247_v50 }
0x2ba4   :  { %2101 = vrot.lane.b32.xlu0 %v2099_v51, %s4549_s3 }
0x2c16   :  { %v2102_v52 = vpop.permute.xlu0 %2101 }
0x2c17   :  { %v2104_v47 = vmul.f32 %v4245_v42, %v2102_v52  ;;  %v2343_v52 = vadd.f32 %v5091_v28, %v5147_v10 }
0x2c19   :  { %2106 = vrot.lane.b32.xlu1 %v2104_v47, %s4550_s0 }
0x2c1d   :  { %2467 = vrot.lane.b32.xlu1 %v3392_v58, %s4548_s16 }
0x2c8b   :  { %v2107_v59 = vpop.permute.xlu1 %2106 }
0x2c8c   :  { %v5120_v60 = vadd.f32 %v4247_v50, %v2107_v59 }
0x2c8e   :  { %2111 = vrot.lane.b32.xlu0 %v5120_v60, %s4548_s16 }
0x2c8f   :  { %v5140_v2 = vpop.permute.xlu1 %2467 }
0x2d00   :  { %v2112_v31 = vpop.permute.xlu0 %2111 }
0x2d01   :  { %2114 = vst.msk [vmem:[#allocation3 + $0x30] sm:$0xff] %vm324_vm1, %v2112_v31  ;;  %3821 = vmatmul.mubr.msk.f32.vlgmr.msra.gmra.mrb[20].mxu0 %vm324_vm1, %v2112_v31 }
0x2d02   :  { %4088 = vmatpush3.bf16.msra.mxu0 %v5108_v54  ;;  %3851 = vmatprep.mubr.msk.f32.mxu0 %vm4546_vm0, %v4547_v1 }
0x2d03   :  { %4089 = vmatprep.subr.bf16.mxu0 %v4545_v0 }
0x2d06   :  { %4091 = vmatpush3.bf16.msra.mxu0 %v5112_v57 }
0x2d07   :  { %4092 = vmatprep.subr.bf16.mxu0 %v4545_v0 }
0x2d08   :  { %v2239_v61 = vld [vmem:[#allocation3 + $0x30] sm:$0xff] }
0x2d09   :  { %3852 = vmatmul.mubr.f32.vlgmr.msra.gmra.mrb[22].mxu0 %v4547_v1  ;;  %3840 = vmatprep.mubr.msk.f32.mxu1 %vm324_vm1, %v2239_v61 }
0x2d0a   :  { %4094 = vmatpush3.bf16.msra.mxu0 %v5108_v54  ;;  %3862 = vmatprep.mubr.msk.f32.mxu0 %vm4546_vm0, %v4547_v1 }
0x2d0b   :  { %4095 = vmatprep.subr.bf16.mxu0 %v4545_v0 }
0x2d0e   :  { %4097 = vmatpush3.bf16.msra.mxu0 %v5112_v57 }
0x2d0f   :  { %4104 = vmatprep.subr.bf16.mxu0 %v4545_v0 }
0x2dd4   :  { %v2184_v62 = vpop.f32.mrb[20].mxu0 }
0x2dd5   :  { %v3822_v63 = vpop.f32.mrb[21].mxu0  ;;  %v2195_v22 = vadd.f32 %v2184_v62, %v4960_v43  ;;  %v2188_v24 = vadd.f32 %v2184_v62, %v1342_v23 }
0x2dd7   :  { %v3382_v25 = vmul.f32 -1.442695, %v2188_v24 }
0x2ddc   :  { %v2456_v34 = vpop.f32.mrb[22].mxu0 }
0x2ddd   :  { %v3853_v3 = vpop.f32.mrb[23].mxu0  ;;  %v2470_v4 = vadd.f32 %v5140_v2, %v2456_v34  ;;  %v2460_v11 = vadd.f32 %v2456_v34, %v2338_v5 }
0x2ddf   :  { %2472 = vrot.lane.b32.xlu0 %v2470_v4, %s4548_s16  ;;  %v3393_v7 = vmul.f32 -1.442695, %v2460_v11 }
0x2de1   :  { %4248 = vpow2.f32 %v3393_v7 }
0x2deb   :  { %v4249_v13 = vpop.eup %4248 }
0x2dec   :  { %v2464_v14 = vadd.f32 1.0, %v4249_v13 }
0x2dee   :  { %4250 = vrcp.f32 %v2464_v14 }
0x2df8   :  { %v4251_v16 = vpop.eup %4250 }
0x2e51   :  { %v2473_v35 = vpop.permute.xlu0 %2472 }
0x2e52   :  { %v2475_v41 = vmul.f32 %v4251_v16, %v2473_v35 }
0x2e54   :  { %2477 = vrot.lane.b32.xlu1 %v2475_v41, %s4548_s16  ;;  %v2348_v41 = vadd.f32 %v5147_v10, %v5097_v33 }
0x2ec6   :  { %v2478_v30 = vpop.permute.xlu1 %2477 }
0x2ec7   :  { %v2480_v17 = vadd.f32 %v2478_v30, %v2338_v5 }
0x2ec9   :  { %4252 = vtanh.f32 %v2480_v17 }
0x2eca   :  { %4254 = vpow2.f32 %v3382_v25 }
0x2ed3   :  { %v4253_v18 = vpop.eup %4252 }
0x2ed4   :  { %v2482_v19 = vsub.f32 0.0, %v4253_v18  ;;  %v4255_v26 = vpop.eup %4254 }
0x2ed5   :  { %v2192_v27 = vadd.f32 1.0, %v4255_v26 }
0x2ed6   :  { %2484 = vrot.lane.b32.xlu0 %v2482_v19, %s4549_s3 }
0x2ed7   :  { %4256 = vrcp.f32 %v2192_v27 }
0x2ee1   :  { %v4257_v38 = vpop.eup %4256 }
0x2f48   :  { %v2485_v20 = vpop.permute.xlu0 %2484 }
0x2f49   :  { %v2487_v21 = vmul.f32 %v4251_v16, %v2485_v20 }
0x2f4b   :  { %2489 = vrot.lane.b32.xlu1 %v2487_v21, %s4550_s0 }
0x2f4f   :  { %2197 = vrot.lane.b32.xlu1 %v2195_v22, %s4548_s16 }
0x2fbd   :  { %v2490_v8 = vpop.permute.xlu1 %2489 }
0x2fbe   :  { %v2492_v29 = vadd.f32 %v4253_v18, %v2490_v8 }
0x2fc0   :  { %2495 = vrot.lane.b32.xlu0 %v2492_v29, %s4548_s16 }
0x2fc1   :  { %v2198_v39 = vpop.permute.xlu1 %2197 }
0x2fc2   :  { %v2200_v6 = vmul.f32 %v4257_v38, %v2198_v39 }
0x2fc4   :  { %2202 = vrot.lane.b32.xlu1 %v2200_v6, %s4548_s16 }
0x3032   :  { %v2496_v43 = vpop.permute.xlu0 %2495 }
0x3033   :  { %3863 = vmatmul.mubr.msk.f32.vlgmr.msra.gmra.mrb[24].mxu0 %vm324_vm1, %v2496_v43 }
0x3034   :  { %4106 = vmatpush3.bf16.msra.mxu0 %v5108_v54  ;;  %3884 = vmatprep.mubr.msk.f32.mxu0 %vm4546_vm0, %v4547_v1 }
0x3035   :  { %4107 = vmatprep.subr.bf16.mxu0 %v4545_v0 }
0x3036   :  { %v2203_v46 = vpop.permute.xlu1 %2202 }
0x3037   :  { %v2205_v45 = vadd.f32 %v2203_v46, %v1342_v23  ;;  %v2353_v46 = vadd.f32 %v5095_v32, %v5147_v10 }
0x3038   :  { %4109 = vmatpush3.bf16.msra.mxu0 %v5112_v57 }
0x3039   :  { %4258 = vtanh.f32 %v2205_v45  ;;  %4116 = vmatprep.subr.bf16.mxu0 %v4545_v0 }
0x3043   :  { %v4259_v9 = vpop.eup %4258 }
0x3044   :  { %v2207_v40 = vsub.f32 %v5120_v60, %v4259_v9 }
0x3046   :  { %2209 = vrot.lane.b32.xlu1 %v2207_v40, %s4549_s3 }
0x30b8   :  { %v2210_v42 = vpop.permute.xlu1 %2209 }
0x30b9   :  { %v2212_v44 = vmul.f32 %v4257_v38, %v2210_v42 }
0x30bb   :  { %2214 = vrot.lane.b32.xlu1 %v2212_v44, %s4550_s0 }
0x3106   :  { %v2565_v15 = vpop.f32.mrb[24].mxu0 }
0x3107   :  { %v2576_v48 = vadd.f32 %v2565_v15, %v5140_v2  ;;  %v3864_v49 = vpop.f32.mrb[25].mxu0  ;;  %v2569_v47 = vadd.f32 %v2565_v15, %v2343_v52 }
0x3109   :  { %2578 = vrot.lane.b32.xlu0 %v2576_v48, %s4548_s16  ;;  %v3395_v12 = vmul.f32 -1.442695, %v2569_v47 }
0x310b   :  { %4260 = vpow2.f32 %v3395_v12 }
0x3115   :  { %v4261_v53 = vpop.eup %4260 }
0x3116   :  { %v2573_v55 = vadd.f32 1.0, %v4261_v53 }
0x3118   :  { %4262 = vrcp.f32 %v2573_v55 }
0x3122   :  { %v4263_v56 = vpop.eup %4262 }
0x312d   :  { %v2215_v50 = vpop.permute.xlu1 %2214 }
0x312e   :  { %v2217_v51 = vadd.f32 %v4259_v9, %v2215_v50 }
0x3130   :  { %2219 = vrot.lane.b32.xlu1 %v2217_v51, %s4548_s16 }
0x317b   :  { %v2579_v58 = vpop.permute.xlu0 %2578 }
0x317c   :  { %v2581_v59 = vmul.f32 %v4263_v56, %v2579_v58 }
0x317e   :  { %2583 = vrot.lane.b32.xlu0 %v2581_v59, %s4548_s16 }
0x31a2   :  { %v2220_v60 = vpop.permute.xlu1 %2219 }
0x31a3   :  { %2222 = vst.msk [vmem:[#allocation3 + $0x38] sm:$0xff] %vm324_vm1, %v2220_v60  ;;  %v2358_v60 = vadd.f32 %v5147_v10, %v5101_v37 }
0x31aa   :  { %v2240_v31 = vld [vmem:[#allocation3 + $0x38] sm:$0xff] }
0x31ab   :  { %3841 = vmatmul.mubr.msk.f32.gmra.mrb[32].mxu1 %vm324_vm1, %v2240_v31 }
0x31ac   :  { %3873 = vmatprep.mubr.msk.f32.mxu1 %vm4546_vm0, %v4547_v1 }
0x31f0   :  { %v2584_v28 = vpop.permute.xlu0 %2583 }
0x31f1   :  { %v2586_v61 = vadd.f32 %v2584_v28, %v2343_v52 }
0x31f3   :  { %4264 = vtanh.f32 %v2586_v61 }
0x31fd   :  { %v4265_v62 = vpop.eup %4264 }
0x31fe   :  { %v2588_v63 = vsub.f32 %v2492_v29, %v4265_v62 }
0x3200   :  { %2590 = vrot.lane.b32.xlu0 %v2588_v63, %s4549_s3 }
0x3272   :  { %v2591_v34 = vpop.permute.xlu0 %2590 }
0x3273   :  { %v2593_v3 = vmul.f32 %v4263_v56, %v2591_v34 }
0x3275   :  { %2595 = vrot.lane.b32.xlu0 %v2593_v3, %s4550_s0 }
0x327e   :  { %v5182_v4 = vpop.f32.mrb[32].mxu1 }
0x327f   :  { %v5184_v5 = vpop.f32.mrb[33].mxu1 }
0x32e7   :  { %v2596_v11 = vpop.permute.xlu0 %2595 }
0x32e8   :  { %v2598_v7 = vadd.f32 %v4265_v62, %v2596_v11 }
0x32ea   :  { %2601 = vrot.lane.b32.xlu0 %v2598_v7, %s4548_s16 }
0x335c   :  { %v2602_v13 = vpop.permute.xlu0 %2601 }
0x335d   :  { %3874 = vmatmul.mubr.msk.f32.vlgmr.msra.gmra.mrb[34].mxu1 %vm324_vm1, %v2602_v13 }
0x335e   :  { %4112 = vmatpush3.bf16.msra.mxu1 %v5108_v54  ;;  %3895 = vmatprep.mubr.msk.f32.mxu1 %vm4546_vm0, %v4547_v1 }
0x335f   :  { %4113 = vmatprep.subr.bf16.mxu1 %v4545_v0 }
0x3362   :  { %4115 = vmatpush3.bf16.msra.mxu1 %v5112_v57 }
0x3363   :  { %4122 = vmatprep.subr.bf16.mxu1 %v4545_v0 }
0x3430   :  { %v2671_v14 = vpop.f32.mrb[34].mxu1 }
0x3431   :  { %v2682_v16 = vadd.f32 %v2671_v14, %v5140_v2  ;;  %v3875_v35 = vpop.f32.mrb[35].mxu1  ;;  %v2675_v30 = vadd.f32 %v2671_v14, %v2348_v41 }
0x3433   :  { %2684 = vrot.lane.b32.xlu1 %v2682_v16, %s4548_s16  ;;  %v3397_v17 = vmul.f32 -1.442695, %v2675_v30 }
0x3435   :  { %4266 = vpow2.f32 %v3397_v17 }
0x343f   :  { %v4267_v18 = vpop.eup %4266 }
0x3440   :  { %v2679_v19 = vadd.f32 1.0, %v4267_v18 }
0x3442   :  { %4268 = vrcp.f32 %v2679_v19 }
0x344c   :  { %v4269_v20 = vpop.eup %4268 }
0x34a5   :  { %v2685_v21 = vpop.permute.xlu1 %2684 }
0x34a6   :  { %v2687_v22 = vmul.f32 %v4269_v20, %v2685_v21 }
0x34a8   :  { %2689 = vrot.lane.b32.xlu0 %v2687_v22, %s4548_s16 }
0x351a   :  { %v2690_v23 = vpop.permute.xlu0 %2689 }
0x351b   :  { %v2692_v24 = vadd.f32 %v2690_v23, %v2348_v41 }
0x351d   :  { %4270 = vtanh.f32 %v2692_v24 }
0x3527   :  { %v4271_v25 = vpop.eup %4270 }
0x3528   :  { %v2694_v26 = vsub.f32 %v2598_v7, %v4271_v25 }
0x352a   :  { %2696 = vrot.lane.b32.xlu1 %v2694_v26, %s4549_s3 }
0x359c   :  { %v2697_v27 = vpop.permute.xlu1 %2696 }
0x359d   :  { %v2699_v33 = vmul.f32 %v4269_v20, %v2697_v27  ;;  %v2363_v20 = vadd.f32 %v5099_v36, %v5147_v10 }
0x359f   :  { %2701 = vrot.lane.b32.xlu0 %v2699_v33, %s4550_s0 }
0x3611   :  { %v2702_v8 = vpop.permute.xlu0 %2701 }
0x3612   :  { %v2704_v29 = vadd.f32 %v4271_v25, %v2702_v8 }
0x3614   :  { %2707 = vrot.lane.b32.xlu1 %v2704_v29, %s4548_s16 }
0x3686   :  { %v2708_v38 = vpop.permute.xlu1 %2707 }
0x3687   :  { %3885 = vmatmul.mubr.msk.f32.vlgmr.msra.gmra.mrb[26].mxu0 %vm324_vm1, %v2708_v38 }
0x3688   :  { %4118 = vmatpush3.bf16.msra.mxu0 %v5108_v54  ;;  %3906 = vmatprep.mubr.msk.f32.mxu0 %vm4546_vm0, %v4547_v1 }
0x3689   :  { %4119 = vmatprep.subr.bf16.mxu0 %v4545_v0 }
0x368c   :  { %4121 = vmatpush3.bf16.msra.mxu0 %v5112_v57 }
0x368d   :  { %4128 = vmatprep.subr.bf16.mxu0 %v4545_v0 }
0x375a   :  { %v2777_v39 = vpop.f32.mrb[26].mxu0 }
0x375b   :  { %v2788_v6 = vadd.f32 %v2777_v39, %v5140_v2  ;;  %v3886_v43 = vpop.f32.mrb[27].mxu0  ;;  %v2781_v45 = vadd.f32 %v2777_v39, %v2353_v46 }
0x375d   :  { %2790 = vrot.lane.b32.xlu0 %v2788_v6, %s4548_s16  ;;  %v3399_v9 = vmul.f32 -1.442695, %v2781_v45 }
0x375f   :  { %4272 = vpow2.f32 %v3399_v9  ;;  %v2368_v9 = vadd.f32 %v5147_v10, %v5184_v5 }
0x3769   :  { %v4273_v40 = vpop.eup %4272 }
0x376a   :  { %v2785_v42 = vadd.f32 1.0, %v4273_v40 }
0x376c   :  { %4274 = vrcp.f32 %v2785_v42 }
0x3776   :  { %v4275_v44 = vpop.eup %4274 }
0x37cf   :  { %v2791_v15 = vpop.permute.xlu0 %2790 }
0x37d0   :  { %v2793_v48 = vmul.f32 %v4275_v44, %v2791_v15 }
0x37d2   :  { %2795 = vrot.lane.b32.xlu1 %v2793_v48, %s4548_s16 }
0x3844   :  { %v2796_v49 = vpop.permute.xlu1 %2795 }
0x3845   :  { %v2798_v50 = vadd.f32 %v2796_v49, %v2353_v46 }
0x3847   :  { %4276 = vtanh.f32 %v2798_v50 }
0x3851   :  { %v4277_v51 = vpop.eup %4276 }
0x3852   :  { %v2800_v52 = vsub.f32 %v2704_v29, %v4277_v51 }
0x3854   :  { %2802 = vrot.lane.b32.xlu0 %v2800_v52, %s4549_s3 }
0x38c6   :  { %v2803_v47 = vpop.permute.xlu0 %2802 }
0x38c7   :  { %v2805_v32 = vmul.f32 %v4275_v44, %v2803_v47 }
0x38c9   :  { %2807 = vrot.lane.b32.xlu1 %v2805_v32, %s4550_s0 }
0x393b   :  { %v2808_v12 = vpop.permute.xlu1 %2807 }
0x393c   :  { %v2810_v53 = vadd.f32 %v4277_v51, %v2808_v12 }
0x393e   :  { %2813 = vrot.lane.b32.xlu0 %v2810_v53, %s4548_s16 }
0x39b0   :  { %v2814_v55 = vpop.permute.xlu0 %2813 }
0x39b1   :  { %3896 = vmatmul.mubr.msk.f32.vlgmr.msra.gmra.mrb[36].mxu1 %vm324_vm1, %v2814_v55 }
0x39b2   :  { %4124 = vmatpush3.bf16.msra.mxu1 %v5108_v54  ;;  %3917 = vmatprep.mubr.msk.f32.mxu1 %vm4546_vm0, %v4547_v1 }
0x39b3   :  { %4125 = vmatprep.subr.bf16.mxu1 %v4545_v0 }
0x39b6   :  { %4127 = vmatpush3.bf16.msra.mxu1 %v5112_v57 }
0x39b7   :  { %4134 = vmatprep.subr.bf16.mxu1 %v4545_v0 }
0x3a84   :  { %v2883_v56 = vpop.f32.mrb[36].mxu1 }
0x3a85   :  { %v2894_v58 = vadd.f32 %v2883_v56, %v5140_v2  ;;  %v3897_v59 = vpop.f32.mrb[37].mxu1  ;;  %v2887_v31 = vadd.f32 %v2883_v56, %v2358_v60 }
0x3a87   :  { %2896 = vrot.lane.b32.xlu1 %v2894_v58, %s4548_s16  ;;  %v3401_v28 = vmul.f32 -1.442695, %v2887_v31 }
0x3a89   :  { %4278 = vpow2.f32 %v3401_v28 }
0x3a93   :  { %v4279_v61 = vpop.eup %4278 }
0x3a94   :  { %v2891_v62 = vadd.f32 1.0, %v4279_v61 }
0x3a96   :  { %4280 = vrcp.f32 %v2891_v62 }
0x3aa0   :  { %v4281_v63 = vpop.eup %4280 }
0x3af9   :  { %v2897_v34 = vpop.permute.xlu1 %2896 }
0x3afa   :  { %v2899_v3 = vmul.f32 %v4281_v63, %v2897_v34 }
0x3afc   :  { %2901 = vrot.lane.b32.xlu0 %v2899_v3, %s4548_s16 }
0x3b6e   :  { %v2902_v11 = vpop.permute.xlu0 %2901 }
0x3b6f   :  { %v2904_v7 = vadd.f32 %v2902_v11, %v2358_v60  ;;  %v2373_v60 = vadd.f32 %v5182_v4, %v5147_v10  ;;  %v3236_v10 = vld [vmem:[#allocation18 + $0x8] sm:$0xff]  ;;  %v3237_v4 = vld [vmem:[#allocation18 + $0x10] sm:$0xff] }
0x3b71   :  { %4282 = vtanh.f32 %v2904_v7 }
0x3b7b   :  { %v4283_v13 = vpop.eup %4282 }
0x3b7c   :  { %v2906_v14 = vsub.f32 %v2810_v53, %v4283_v13 }
0x3b7e   :  { %2908 = vrot.lane.b32.xlu1 %v2906_v14, %s4549_s3  ;;  %v3235_v14 = vld [vmem:[#allocation18] sm:$0xff] }
0x3bf0   :  { %v2909_v16 = vpop.permute.xlu1 %2908 }
0x3bf1   :  { %v2911_v37 = vmul.f32 %v4281_v63, %v2909_v16  ;;  %v4135_v16 = vpack.c.bf16 %v3236_v10, %v3235_v14 }
0x3bf3   :  { %2913 = vrot.lane.b32.xlu0 %v2911_v37, %s4550_s0  ;;  %v3238_v37 = vld [vmem:[#allocation18 + $0x18] sm:$0xff] }
0x3c65   :  { %v2914_v35 = vpop.permute.xlu0 %2913 }
0x3c66   :  { %v2916_v41 = vadd.f32 %v4283_v13, %v2914_v35  ;;  %v4138_v35 = vpack.c.bf16 %v3238_v37, %v3237_v4 }
0x3c68   :  { %2919 = vrot.lane.b32.xlu1 %v2916_v41, %s4548_s16 }
0x3cda   :  { %v2920_v30 = vpop.permute.xlu1 %2919 }
0x3cdb   :  { %3907 = vmatmul.mubr.msk.f32.vlgmr.msra.gmra.mrb[28].mxu0 %vm324_vm1, %v2920_v30 }
0x3cdc   :  { %4130 = vmatpush3.bf16.msra.mxu0 %v5108_v54  ;;  %3928 = vmatprep.mubr.msk.f32.mxu0 %vm4546_vm0, %v4547_v1 }
0x3cdd   :  { %4131 = vmatprep.subr.bf16.mxu0 %v4545_v0 }
0x3ce0   :  { %4133 = vmatpush3.bf16.msra.mxu0 %v5112_v57 }
0x3dae   :  { %v2989_v17 = vpop.f32.mrb[28].mxu0 }
0x3daf   :  { %v3000_v18 = vadd.f32 %v2989_v17, %v5140_v2  ;;  %v3908_v19 = vpop.f32.mrb[29].mxu0  ;;  %v2993_v21 = vadd.f32 %v2989_v17, %v2363_v20 }
0x3db1   :  { %3002 = vrot.lane.b32.xlu0 %v3000_v18, %s4548_s16  ;;  %v3403_v22 = vmul.f32 -1.442695, %v2993_v21 }
0x3db3   :  { %4284 = vpow2.f32 %v3403_v22 }
0x3dbd   :  { %v4285_v54 = vpop.eup %4284 }
0x3dbe   :  { %v2997_v23 = vadd.f32 1.0, %v4285_v54 }
0x3dc0   :  { %4286 = vrcp.f32 %v2997_v23 }
0x3dca   :  { %v4287_v24 = vpop.eup %4286 }
0x3e23   :  { %v3003_v25 = vpop.permute.xlu0 %3002 }
0x3e24   :  { %v3005_v26 = vmul.f32 %v4287_v24, %v3003_v25 }
0x3e26   :  { %3007 = vrot.lane.b32.xlu1 %v3005_v26, %s4548_s16 }
0x3e98   :  { %v3008_v57 = vpop.permute.xlu1 %3007 }
0x3e99   :  { %v3010_v27 = vadd.f32 %v3008_v57, %v2363_v20  ;;  %v3408_v20 = vld [vmem:[%s5297_s14] ss:$0 sm:$0xff] }
0x3e9b   :  { %4288 = vtanh.f32 %v3010_v27 }
0x3ea5   :  { %v4289_v33 = vpop.eup %4288 }
0x3ea6   :  { %v3012_v8 = vsub.f32 %v2916_v41, %v4289_v33 }
0x3ea8   :  { %3014 = vrot.lane.b32.xlu0 %v3012_v8, %s4549_s3 }
0x3f1a   :  { %v3015_v29 = vpop.permute.xlu0 %3014 }
0x3f1b   :  { %v3017_v36 = vmul.f32 %v4287_v24, %v3015_v29 }
0x3f1d   :  { %3019 = vrot.lane.b32.xlu1 %v3017_v36, %s4550_s0 }
0x3f8f   :  { %v3020_v38 = vpop.permute.xlu1 %3019 }
0x3f90   :  { %v3022_v39 = vadd.f32 %v4289_v33, %v3020_v38 }
0x3f92   :  { %3025 = vrot.lane.b32.xlu0 %v3022_v39, %s4548_s16 }
0x4004   :  { %v3026_v6 = vpop.permute.xlu0 %3025 }
0x4005   :  { %3918 = vmatmul.mubr.msk.f32.vlgmr.msra.gmra.mrb[38].mxu1 %vm324_vm1, %v3026_v6 }
0x4006   :  { %3939 = vmatprep.mubr.msk.f32.mxu1 %vm4546_vm0, %v4547_v1  ;;  %4136 = vmatpush3.bf16.msra.mxu1 %v4135_v16 }
0x4007   :  { %4137 = vmatprep.subr.bf16.mxu1 %v4545_v0 }
0x400a   :  { %4139 = vmatpush3.bf16.msra.mxu1 %v4138_v35 }
0x40d8   :  { %v3095_v43 = vpop.f32.mrb[38].mxu1 }
0x40d9   :  { %v3106_v46 = vadd.f32 %v3095_v43, %v5140_v2  ;;  %v3919_v45 = vpop.f32.mrb[39].mxu1  ;;  %v3099_v40 = vadd.f32 %v3095_v43, %v2368_v9 }
0x40db   :  { %3108 = vrot.lane.b32.xlu1 %v3106_v46, %s4548_s16  ;;  %v3405_v42 = vmul.f32 -1.442695, %v3099_v40 }
0x40dd   :  { %4290 = vpow2.f32 %v3405_v42 }
0x40e7   :  { %v4291_v44 = vpop.eup %4290 }
0x40e8   :  { %v3103_v15 = vadd.f32 1.0, %v4291_v44 }
0x40ea   :  { %4292 = vrcp.f32 %v3103_v15 }
0x40f4   :  { %v4293_v48 = vpop.eup %4292 }
0x414d   :  { %v3109_v49 = vpop.permute.xlu1 %3108 }
0x414e   :  { %v3111_v50 = vmul.f32 %v4293_v48, %v3109_v49 }
0x4150   :  { %3113 = vrot.lane.b32.xlu0 %v3111_v50, %s4548_s16 }
0x41c2   :  { %v3114_v1 = vpop.permute.xlu0 %3113 }
0x41c3   :  { %v3116_v51 = vadd.f32 %v3114_v1, %v2368_v9 }
0x41c5   :  { %4294 = vtanh.f32 %v3116_v51 }
0x41cf   :  { %v4295_v52 = vpop.eup %4294 }
0x41d0   :  { %v3118_v47 = vsub.f32 %v3022_v39, %v4295_v52 }
0x41d2   :  { %3120 = vrot.lane.b32.xlu1 %v3118_v47, %s4549_s3 }
0x4244   :  { %v3121_v32 = vpop.permute.xlu1 %3120 }
0x4245   :  { %v3123_v5 = vmul.f32 %v4293_v48, %v3121_v32 }
0x4247   :  { %3125 = vrot.lane.b32.xlu0 %v3123_v5, %s4550_s0 }
0x42b9   :  { %v3126_v12 = vpop.permute.xlu0 %3125 }
0x42ba   :  { %v3128_v53 = vadd.f32 %v4295_v52, %v3126_v12 }
0x42bc   :  { %3131 = vrot.lane.b32.xlu1 %v3128_v53, %s4548_s16 }
0x432e   :  { %v3132_v55 = vpop.permute.xlu1 %3131 }
0x432f   :  { %3929 = vmatmul.mubr.msk.f32.vlgmr.msra.gmra.mrb[30].mxu0 %vm324_vm1, %v3132_v55 }
0x4402   :  { %v3201_v56 = vpop.f32.mrb[30].mxu0 }
0x4403   :  { %v3212_v58 = vadd.f32 %v3201_v56, %v5140_v2  ;;  %v3930_v59 = vpop.f32.mrb[31].mxu0  ;;  %v3205_v31 = vadd.f32 %v3201_v56, %v2373_v60 }
0x4405   :  { %3214 = vrot.lane.b32.xlu0 %v3212_v58, %s4548_s16  ;;  %v3407_v28 = vmul.f32 -1.442695, %v3205_v31 }
0x4407   :  { %4296 = vpow2.f32 %v3407_v28 }
0x4411   :  { %v4297_v61 = vpop.eup %4296 }
0x4412   :  { %v3209_v62 = vadd.f32 1.0, %v4297_v61 }
0x4414   :  { %4298 = vrcp.f32 %v3209_v62 }
0x441e   :  { %v4299_v63 = vpop.eup %4298 }
0x4477   :  { %v3215_v34 = vpop.permute.xlu0 %3214 }
0x4478   :  { %v3217_v3 = vmul.f32 %v4299_v63, %v3215_v34 }
0x447a   :  { %3219 = vrot.lane.b32.xlu1 %v3217_v3, %s4548_s16 }
0x44ec   :  { %v3220_v11 = vpop.permute.xlu1 %3219 }
0x44ed   :  { %v3222_v7 = vadd.f32 %v3220_v11, %v2373_v60 }
0x44ef   :  { %4300 = vtanh.f32 %v3222_v7 }
0x44f9   :  { %v4301_v2 = vpop.eup %4300 }
0x44fa   :  { %v3224_v13 = vsub.f32 %v3128_v53, %v4301_v2 }
0x44fc   :  { %3226 = vrot.lane.b32.xlu0 %v3224_v13, %s4549_s3 }
0x456e   :  { %v3227_v41 = vpop.permute.xlu0 %3226 }
0x456f   :  { %v3229_v30 = vmul.f32 %v4299_v63, %v3227_v41 }
0x4571   :  { %3231 = vrot.lane.b32.xlu1 %v3229_v30, %s4550_s0 }
0x45e3   :  { %v3232_v17 = vpop.permute.xlu1 %3231 }
0x45e4   :  { %v3234_v18 = vadd.f32 %v4301_v2, %v3232_v17 }
0x45e6   :  { %3247 = vrot.lane.b32.xlu0 %v3234_v18, %s4548_s16 }
0x4658   :  { %v3248_v19 = vpop.permute.xlu0 %3247 }
0x4659   :  { %3940 = vmatmul.mubr.msk.f32.vlgmr.msra.gmra.mrb[40].mxu1 %vm324_vm1, %v3248_v19 }
0x472c   :  { %v3317_v21 = vpop.f32.mrb[40].mxu1 }
0x472d   :  { %v3318_v0 = vadd.f32 %v3408_v20, %v3317_v21  ;;  %v3941_v22 = vpop.f32.mrb[41].mxu1 }
0x472f   :  { %3321 = vst [vmem:[#allocation19] sm:$0xff] %v3318_v0 }
0x4730   :  { %4511 = shalt.err (!%p4508_p6)
}
0x4731   :  { %s4512_s29 = scalar_lea.hbm %s5298_s15, 128 }
0x4732   :  { %p4513_p7 = scmp.ne.s32.totalorder %s5298_s15, %s4512_s29  ;;  %p4516_p8 = scmp.lt.u32.totalorder %s4512_s29, %s5298_s15 }
0x4734   :  { %p4518_p9 = pnand %p4516_p8, %p4513_p7 }
0x4736   :  { %4521 = shalt.err (!%p4518_p9)
}
0x4737   :  { %3331 = dma.vmem_to_hbm [thread:$0]  %s3329_s2, 128, %s5298_s15, [#allocation6]  }
0x4738   :  { %4532 = dma.done.wait [#allocation6], 128  }
0x4739   :  { %4533 = vsyncadd [#allocation6], 4294967168 }
0x473a   :  { %3335 = vsyncpa [#allocation5], 1 }
0x473b   :  { %3336 = vsyncpa [#allocation8], 1 }
0x473c   :  { %3337 = vsyncpa [#allocation11], 1 }
0x473d   :  { %3338 = vsyncpa [#allocation14], 1 }
0x473e   :  { %3339 = vsyncpa [#allocation17], 1 }
0x473f   :  { %3340 = vsyncpa [#allocation6], 1 }

</bundles_post_ra>
